<compile_context>
chip_gen: v7x
topology: tpu7x:2x2x1
jax: 0.10.0
libtpu: 0.0.40
codegen_flags: <defaults>
</compile_context>

<pallas_src>
import functools

import jax
import jax.numpy as jnp
from jax import lax
from jax.experimental import pallas as pl
from jax.experimental.pallas import tpu as pltpu

HIDDEN_NEURONS = 6
INPUT_NEURONS = 9
OUTPUT_NEURONS = 4

_LANES = 128          # lanes per vreg (fast axis)
_SUBLANES = 8         # sublanes per f32 vreg
# Batch tiles are multiples of 16*128 so the per-block sublane count divides
# both the f32 chunk (8 sublanes = 1 vreg) and the bf16 chunk (16 sublanes).
_MIN_TILE = 16 * _LANES   # 2048 batch elements


def _round_up(n, m):
    return ((n + m - 1) // m) * m


# ----------------------------- kernel helpers --------------------------------

def _read_linear_params(w_ref, b_ref, n_out, n_in, dtype):
    """Read a PyTorch-layout (out, in) weight (flattened row-major) + bias from
    SMEM into plain traced scalars, once per kernel invocation (hoisted out of
    the chunk loop so per-chunk SMEM traffic is zero)."""
    w = [[w_ref[n * n_in + k].astype(dtype) for k in range(n_in)]
         for n in range(n_out)]
    b = [b_ref[n].astype(dtype) for n in range(n_out)]
    return w, b


def _linear_rows(rows_in, w, b):
    """y[n] = sum_k w[n][k] * x[k] + b[n] on lane-dense (chunk, 128) slabs,
    fully unrolled scalar-times-vector VPU FMAs (no MXU, no broadcasts)."""
    out = []
    n_in = len(rows_in)
    for n in range(len(w)):
        acc = w[n][0] * rows_in[0]
        for k in range(1, n_in):
            acc = acc + w[n][k] * rows_in[k]
        out.append(acc + b[n])
    return out


def _autoencoder_kernel(x_ref,
                        w1_ref, b1_ref,
                        w2_ref, b2_ref,
                        w3_ref, b3_ref,
                        w4_ref, b4_ref,
                        out_ref, *, compute_dtype):
    """One batch tile, feature-major: x_ref/out_ref are (9, sbt, 128) VMEM blocks."""
    cd = jnp.dtype(compute_dtype)

    # Hoisted parameter reads (loop-invariant scalars).
    w1, b1 = _read_linear_params(w1_ref, b1_ref, HIDDEN_NEURONS, INPUT_NEURONS, cd)
    w2, b2 = _read_linear_params(w2_ref, b2_ref, OUTPUT_NEURONS, HIDDEN_NEURONS, cd)
    w3, b3 = _read_linear_params(w3_ref, b3_ref, HIDDEN_NEURONS, OUTPUT_NEURONS, cd)
    w4, b4 = _read_linear_params(w4_ref, b4_ref, INPUT_NEURONS, HIDDEN_NEURONS, cd)

    sbt = x_ref.shape[1]
    # One full vreg per feature row per chunk: 8 sublanes in f32, 16 in bf16
    # (a bf16 vreg holds 16x128), so bf16 halves the vreg-op count.
    chunk = 16 if cd == jnp.dtype(jnp.bfloat16) else _SUBLANES
    n_chunks = sbt // chunk          # sbt is a multiple of 16 by construction

    def body(c, carry):
        r0 = pl.multiple_of(c * chunk, chunk)
        # 9 lane-dense (chunk, 128) feature slabs; cast to the compute dtype.
        xs = [x_ref[k, pl.ds(r0, chunk), :].astype(cd)
              for k in range(INPUT_NEURONS)]
        # ---- encode ----
        h = [jnp.tanh(t) for t in _linear_rows(xs, w1, b1)]     # EUP tanh
        z = _linear_rows(h, w2, b2)
        # ---- decode ----
        d = [jnp.tanh(t) for t in z]
        d = [jnp.tanh(t) for t in _linear_rows(d, w3, b3)]
        y = _linear_rows(d, w4, b4)
        for k in range(INPUT_NEURONS):
            out_ref[k, pl.ds(r0, chunk), :] = y[k].astype(out_ref.dtype)
        return carry

    lax.fori_loop(0, n_chunks, body, 0, unroll=2)


# -------------------------------- wrappers ------------------------------------

@functools.partial(jax.jit,
                   static_argnames=("batch_tile", "compute_dtype", "core_parallel"))
def autoencoder_forward_fm(x_fm, params, *, batch_tile=131072,
                           compute_dtype=jnp.float32, core_parallel=False):
    """Feature-major forward: x_fm is (INPUT_NEURONS, B) f32 -> (INPUT_NEURONS, B).

    This is the zero-layout-pass path: HBM traffic is exactly one read + one
    write of the activations.  Use compute_dtype=jnp.bfloat16 on v6e/v7x to
    halve the VALU op count (keep f32 on v5e).  core_parallel=True switches the
    batch grid axis to CORE_PARALLEL for a genuine 2-TensorCore split on v7x.
    """
    x_fm = x_fm.astype(jnp.float32)
    assert x_fm.shape[0] == INPUT_NEURONS
    B = x_fm.shape[1]

    # Equalized tiles (bounds final-tile padding waste to < _MIN_TILE rows).
    num_tiles = max(1, -(-B // max(batch_tile, _MIN_TILE)))
    tile = _round_up(-(-B // num_tiles), _MIN_TILE)
    b_pad = _round_up(B, tile)
    num_tiles = b_pad // tile
    sbt = tile // _LANES

    if b_pad != B:
        x_fm = jnp.pad(x_fm, ((0, 0), (0, b_pad - B)))
    x_blocks = x_fm.reshape(INPUT_NEURONS, b_pad // _LANES, _LANES)

    # Flattened PyTorch-layout (out, in) weights + biases -> SMEM scalar tables
    # (whole-array operands: fetched once, resident across all grid steps).
    w1f = params["w1"].reshape(-1)
    w2f = params["w2"].reshape(-1)
    w3f = params["w3"].reshape(-1)
    w4f = params["w4"].reshape(-1)

    smem_spec = pl.BlockSpec(memory_space=pltpu.MemorySpace.SMEM)
    act_spec = pl.BlockSpec((INPUT_NEURONS, sbt, _LANES), lambda i: (0, i, 0))

    dim_sem = (pltpu.CORE_PARALLEL,) if core_parallel else ("parallel",)

    cost = pl.CostEstimate(
        flops=2 * 156 * b_pad,                       # 156 MACs per element
        transcendentals=25 * b_pad,                  # 25 tanh per element
        bytes_accessed=2 * INPUT_NEURONS * 4 * b_pad)

    out_fm = pl.pallas_call(
        functools.partial(_autoencoder_kernel, compute_dtype=compute_dtype),
        grid=(num_tiles,),
        in_specs=[
            act_spec,                      # x tile (auto double-buffered DMA)
            smem_spec, smem_spec,          # w1, b1
            smem_spec, smem_spec,          # w2, b2
            smem_spec, smem_spec,          # w3, b3
            smem_spec, smem_spec,          # w4, b4
        ],
        out_specs=act_spec,
        out_shape=jax.ShapeDtypeStruct(
            (INPUT_NEURONS, b_pad // _LANES, _LANES), jnp.float32),
        compiler_params=pltpu.CompilerParams(
            dimension_semantics=dim_sem,
            vmem_limit_bytes=40 * 1024 * 1024),
        cost_estimate=cost,
    )(x_blocks, w1f, params["b1"], w2f, params["b2"],
      w3f, params["b3"], w4f, params["b4"])

    return out_fm.reshape(INPUT_NEURONS, b_pad)[:, :B]


@functools.partial(jax.jit,
                   static_argnames=("batch_tile", "compute_dtype", "core_parallel"))
def autoencoder_forward(x, params, *, batch_tile=131072,
                        compute_dtype=jnp.float32, core_parallel=False):
    """Batch-major convenience wrapper: x is (B, INPUT_NEURONS) -> (B, INPUT_NEURONS).

    The transpose(+pad+reshape) to/from the feature-major layout is a single
    jit-fused copy pass in each direction; callers that can hold activations
    feature-major should use `autoencoder_forward_fm` and pay none.
    """
    y_fm = autoencoder_forward_fm(
        x.astype(jnp.float32).T, params, batch_tile=batch_tile,
        compute_dtype=compute_dtype, core_parallel=core_parallel)
    return y_fm.T


# ----------------------------- init & reference ------------------------------

def _xavier_normal(key, out_features, in_features):
    # torch.nn.init.xavier_normal_: std = sqrt(2 / (fan_in + fan_out)),
    # weight shape (out_features, in_features).
    std = jnp.sqrt(2.0 / (in_features + out_features))
    return jax.random.normal(key, (out_features, in_features), jnp.float32) * std


def init_params(key):
    k1, k2, k3, k4 = jax.random.split(key, 4)
    return {
        # encode
        "w1": _xavier_normal(k1, HIDDEN_NEURONS, INPUT_NEURONS),     # (6, 9)
        "b1": jnp.full((HIDDEN_NEURONS,), 0.01, jnp.float32),
        "w2": _xavier_normal(k2, OUTPUT_NEURONS, HIDDEN_NEURONS),    # (4, 6)
        "b2": jnp.full((OUTPUT_NEURONS,), 0.01, jnp.float32),
        # decode
        "w3": _xavier_normal(k3, HIDDEN_NEURONS, OUTPUT_NEURONS),    # (6, 4)
        "b3": jnp.full((HIDDEN_NEURONS,), 0.01, jnp.float32),
        "w4": _xavier_normal(k4, INPUT_NEURONS, HIDDEN_NEURONS),     # (9, 6)
        "b4": jnp.full((INPUT_NEURONS,), 0.01, jnp.float32),
    }


def _reference_forward(x, p):
    """Pure-JAX reference mirroring the PyTorch module (y = x @ W.T + b)."""
    h = jnp.tanh(x @ p["w1"].T + p["b1"])
    z = h @ p["w2"].T + p["b2"]
    d = jnp.tanh(z)
    d = jnp.tanh(d @ p["w3"].T + p["b3"])
    return d @ p["w4"].T + p["b4"]


if __name__ == "__main__":
    key = jax.random.PRNGKey(0)
    pkey, xkey1, xkey2 = jax.random.split(key, 3)
    params = init_params(pkey)

    # 1) Small batch, batch-major interface (matches the PyTorch module usage).
    x_small = jax.random.normal(xkey1, (8, INPUT_NEURONS), jnp.float32)
    out_small = jax.block_until_ready(autoencoder_forward(x_small, params))
    ref_small = _reference_forward(x_small, params)
    assert out_small.shape == (8, INPUT_NEURONS)
    assert jnp.allclose(out_small, ref_small, atol=1e-4, rtol=1e-4), \
        "mismatch vs reference (small batch)"

    # 2) Non-divisible batch via the zero-layout-pass feature-major interface,
    #    with a small tile override to exercise the multi-tile pipelined grid.
    B = 2600
    x_big = jax.random.normal(xkey2, (B, INPUT_NEURONS), jnp.float32)
    ref_big = _reference_forward(x_big, params)
    out_fm = jax.block_until_ready(
        autoencoder_forward_fm(x_big.T, params, batch_tile=2048))
    assert out_fm.shape == (INPUT_NEURONS, B)
    assert jnp.allclose(out_fm.T, ref_big, atol=1e-4, rtol=1e-4), \
        "mismatch vs reference (feature-major, gridded batch)"

    # 3) bf16 compute path (v6e/v7x VALU-halving option). bf16 intermediates
    #    intentionally trade precision for throughput -> looser tolerance.
    out_bf16 = jax.block_until_ready(
        autoencoder_forward(x_big, params, batch_tile=2048,
                            compute_dtype=jnp.bfloat16))
    assert out_bf16.shape == (B, INPUT_NEURONS)
    assert jnp.allclose(out_bf16, ref_big, atol=1e-1, rtol=1e-1), \
        "mismatch vs reference (bf16 compute path)"

    print("KERNEL_OK")
</pallas_src>

<mosaic_0001>
module attributes {stable_mosaic.version = 11 : i64} {
  func.func @_autoencoder_kernel(%arg0: i32, %arg1: memref<9x16x128xf32, #tpu.memory_space<vmem>>, %arg2: memref<54xf32, #tpu.memory_space<smem>>, %arg3: memref<6xf32, #tpu.memory_space<smem>>, %arg4: memref<24xf32, #tpu.memory_space<smem>>, %arg5: memref<4xf32, #tpu.memory_space<smem>>, %arg6: memref<24xf32, #tpu.memory_space<smem>>, %arg7: memref<6xf32, #tpu.memory_space<smem>>, %arg8: memref<54xf32, #tpu.memory_space<smem>>, %arg9: memref<9xf32, #tpu.memory_space<smem>>, %arg10: memref<9x16x128xf32, #tpu.memory_space<vmem>>) attributes {dimension_semantics = [#tpu.dimension_semantics<parallel>], iteration_bounds = array<i64: 1>, scalar_prefetch = 0 : i64, scratch_operands = 0 : i64, tpu.core_type = #tpu.core_type<tc>, window_params = [{transform_indices = @transform_0, window_bounds = array<i64: 9, 16, 128>}, {transform_indices = @transform_1, window_bounds = array<i64: 54>}, {transform_indices = @transform_2, window_bounds = array<i64: 6>}, {transform_indices = @transform_3, window_bounds = array<i64: 24>}, {transform_indices = @transform_4, window_bounds = array<i64: 4>}, {transform_indices = @transform_5, window_bounds = array<i64: 24>}, {transform_indices = @transform_6, window_bounds = array<i64: 6>}, {transform_indices = @transform_7, window_bounds = array<i64: 54>}, {transform_indices = @transform_8, window_bounds = array<i64: 9>}, {transform_indices = @transform_9, window_bounds = array<i64: 9, 16, 128>}]} {
    %c0 = arith.constant 0 : index
    %0 = memref.load %arg2[%c0] : memref<54xf32, #tpu.memory_space<smem>>
    %c1 = arith.constant 1 : index
    %1 = memref.load %arg2[%c1] : memref<54xf32, #tpu.memory_space<smem>>
    %c2 = arith.constant 2 : index
    %2 = memref.load %arg2[%c2] : memref<54xf32, #tpu.memory_space<smem>>
    %c3 = arith.constant 3 : index
    %3 = memref.load %arg2[%c3] : memref<54xf32, #tpu.memory_space<smem>>
    %c4 = arith.constant 4 : index
    %4 = memref.load %arg2[%c4] : memref<54xf32, #tpu.memory_space<smem>>
    %c5 = arith.constant 5 : index
    %5 = memref.load %arg2[%c5] : memref<54xf32, #tpu.memory_space<smem>>
    %c6 = arith.constant 6 : index
    %6 = memref.load %arg2[%c6] : memref<54xf32, #tpu.memory_space<smem>>
    %c7 = arith.constant 7 : index
    %7 = memref.load %arg2[%c7] : memref<54xf32, #tpu.memory_space<smem>>
    %c8 = arith.constant 8 : index
    %8 = memref.load %arg2[%c8] : memref<54xf32, #tpu.memory_space<smem>>
    %c9 = arith.constant 9 : index
    %9 = memref.load %arg2[%c9] : memref<54xf32, #tpu.memory_space<smem>>
    %c10 = arith.constant 10 : index
    %10 = memref.load %arg2[%c10] : memref<54xf32, #tpu.memory_space<smem>>
    %c11 = arith.constant 11 : index
    %11 = memref.load %arg2[%c11] : memref<54xf32, #tpu.memory_space<smem>>
    %c12 = arith.constant 12 : index
    %12 = memref.load %arg2[%c12] : memref<54xf32, #tpu.memory_space<smem>>
    %c13 = arith.constant 13 : index
    %13 = memref.load %arg2[%c13] : memref<54xf32, #tpu.memory_space<smem>>
    %c14 = arith.constant 14 : index
    %14 = memref.load %arg2[%c14] : memref<54xf32, #tpu.memory_space<smem>>
    %c15 = arith.constant 15 : index
    %15 = memref.load %arg2[%c15] : memref<54xf32, #tpu.memory_space<smem>>
    %c16 = arith.constant 16 : index
    %16 = memref.load %arg2[%c16] : memref<54xf32, #tpu.memory_space<smem>>
    %c17 = arith.constant 17 : index
    %17 = memref.load %arg2[%c17] : memref<54xf32, #tpu.memory_space<smem>>
    %c18 = arith.constant 18 : index
    %18 = memref.load %arg2[%c18] : memref<54xf32, #tpu.memory_space<smem>>
    %c19 = arith.constant 19 : index
    %19 = memref.load %arg2[%c19] : memref<54xf32, #tpu.memory_space<smem>>
    %c20 = arith.constant 20 : index
    %20 = memref.load %arg2[%c20] : memref<54xf32, #tpu.memory_space<smem>>
    %c21 = arith.constant 21 : index
    %21 = memref.load %arg2[%c21] : memref<54xf32, #tpu.memory_space<smem>>
    %c22 = arith.constant 22 : index
    %22 = memref.load %arg2[%c22] : memref<54xf32, #tpu.memory_space<smem>>
    %c23 = arith.constant 23 : index
    %23 = memref.load %arg2[%c23] : memref<54xf32, #tpu.memory_space<smem>>
    %c24 = arith.constant 24 : index
    %24 = memref.load %arg2[%c24] : memref<54xf32, #tpu.memory_space<smem>>
    %c25 = arith.constant 25 : index
    %25 = memref.load %arg2[%c25] : memref<54xf32, #tpu.memory_space<smem>>
    %c26 = arith.constant 26 : index
    %26 = memref.load %arg2[%c26] : memref<54xf32, #tpu.memory_space<smem>>
    %c27 = arith.constant 27 : index
    %27 = memref.load %arg2[%c27] : memref<54xf32, #tpu.memory_space<smem>>
    %c28 = arith.constant 28 : index
    %28 = memref.load %arg2[%c28] : memref<54xf32, #tpu.memory_space<smem>>
    %c29 = arith.constant 29 : index
    %29 = memref.load %arg2[%c29] : memref<54xf32, #tpu.memory_space<smem>>
    %c30 = arith.constant 30 : index
    %30 = memref.load %arg2[%c30] : memref<54xf32, #tpu.memory_space<smem>>
    %c31 = arith.constant 31 : index
    %31 = memref.load %arg2[%c31] : memref<54xf32, #tpu.memory_space<smem>>
    %c32 = arith.constant 32 : index
    %32 = memref.load %arg2[%c32] : memref<54xf32, #tpu.memory_space<smem>>
    %c33 = arith.constant 33 : index
    %33 = memref.load %arg2[%c33] : memref<54xf32, #tpu.memory_space<smem>>
    %c34 = arith.constant 34 : index
    %34 = memref.load %arg2[%c34] : memref<54xf32, #tpu.memory_space<smem>>
    %c35 = arith.constant 35 : index
    %35 = memref.load %arg2[%c35] : memref<54xf32, #tpu.memory_space<smem>>
    %c36 = arith.constant 36 : index
    %36 = memref.load %arg2[%c36] : memref<54xf32, #tpu.memory_space<smem>>
    %c37 = arith.constant 37 : index
    %37 = memref.load %arg2[%c37] : memref<54xf32, #tpu.memory_space<smem>>
    %c38 = arith.constant 38 : index
    %38 = memref.load %arg2[%c38] : memref<54xf32, #tpu.memory_space<smem>>
    %c39 = arith.constant 39 : index
    %39 = memref.load %arg2[%c39] : memref<54xf32, #tpu.memory_space<smem>>
    %c40 = arith.constant 40 : index
    %40 = memref.load %arg2[%c40] : memref<54xf32, #tpu.memory_space<smem>>
    %c41 = arith.constant 41 : index
    %41 = memref.load %arg2[%c41] : memref<54xf32, #tpu.memory_space<smem>>
    %c42 = arith.constant 42 : index
    %42 = memref.load %arg2[%c42] : memref<54xf32, #tpu.memory_space<smem>>
    %c43 = arith.constant 43 : index
    %43 = memref.load %arg2[%c43] : memref<54xf32, #tpu.memory_space<smem>>
    %c44 = arith.constant 44 : index
    %44 = memref.load %arg2[%c44] : memref<54xf32, #tpu.memory_space<smem>>
    %c45 = arith.constant 45 : index
    %45 = memref.load %arg2[%c45] : memref<54xf32, #tpu.memory_space<smem>>
    %c46 = arith.constant 46 : index
    %46 = memref.load %arg2[%c46] : memref<54xf32, #tpu.memory_space<smem>>
    %c47 = arith.constant 47 : index
    %47 = memref.load %arg2[%c47] : memref<54xf32, #tpu.memory_space<smem>>
    %c48 = arith.constant 48 : index
    %48 = memref.load %arg2[%c48] : memref<54xf32, #tpu.memory_space<smem>>
    %c49 = arith.constant 49 : index
    %49 = memref.load %arg2[%c49] : memref<54xf32, #tpu.memory_space<smem>>
    %c50 = arith.constant 50 : index
    %50 = memref.load %arg2[%c50] : memref<54xf32, #tpu.memory_space<smem>>
    %c51 = arith.constant 51 : index
    %51 = memref.load %arg2[%c51] : memref<54xf32, #tpu.memory_space<smem>>
    %c52 = arith.constant 52 : index
    %52 = memref.load %arg2[%c52] : memref<54xf32, #tpu.memory_space<smem>>
    %c53 = arith.constant 53 : index
    %53 = memref.load %arg2[%c53] : memref<54xf32, #tpu.memory_space<smem>>
    %c0_0 = arith.constant 0 : index
    %54 = memref.load %arg3[%c0_0] : memref<6xf32, #tpu.memory_space<smem>>
    %c1_1 = arith.constant 1 : index
    %55 = memref.load %arg3[%c1_1] : memref<6xf32, #tpu.memory_space<smem>>
    %c2_2 = arith.constant 2 : index
    %56 = memref.load %arg3[%c2_2] : memref<6xf32, #tpu.memory_space<smem>>
    %c3_3 = arith.constant 3 : index
    %57 = memref.load %arg3[%c3_3] : memref<6xf32, #tpu.memory_space<smem>>
    %c4_4 = arith.constant 4 : index
    %58 = memref.load %arg3[%c4_4] : memref<6xf32, #tpu.memory_space<smem>>
    %c5_5 = arith.constant 5 : index
    %59 = memref.load %arg3[%c5_5] : memref<6xf32, #tpu.memory_space<smem>>
    %c0_6 = arith.constant 0 : index
    %60 = memref.load %arg4[%c0_6] : memref<24xf32, #tpu.memory_space<smem>>
    %c1_7 = arith.constant 1 : index
    %61 = memref.load %arg4[%c1_7] : memref<24xf32, #tpu.memory_space<smem>>
    %c2_8 = arith.constant 2 : index
    %62 = memref.load %arg4[%c2_8] : memref<24xf32, #tpu.memory_space<smem>>
    %c3_9 = arith.constant 3 : index
    %63 = memref.load %arg4[%c3_9] : memref<24xf32, #tpu.memory_space<smem>>
    %c4_10 = arith.constant 4 : index
    %64 = memref.load %arg4[%c4_10] : memref<24xf32, #tpu.memory_space<smem>>
    %c5_11 = arith.constant 5 : index
    %65 = memref.load %arg4[%c5_11] : memref<24xf32, #tpu.memory_space<smem>>
    %c6_12 = arith.constant 6 : index
    %66 = memref.load %arg4[%c6_12] : memref<24xf32, #tpu.memory_space<smem>>
    %c7_13 = arith.constant 7 : index
    %67 = memref.load %arg4[%c7_13] : memref<24xf32, #tpu.memory_space<smem>>
    %c8_14 = arith.constant 8 : index
    %68 = memref.load %arg4[%c8_14] : memref<24xf32, #tpu.memory_space<smem>>
    %c9_15 = arith.constant 9 : index
    %69 = memref.load %arg4[%c9_15] : memref<24xf32, #tpu.memory_space<smem>>
    %c10_16 = arith.constant 10 : index
    %70 = memref.load %arg4[%c10_16] : memref<24xf32, #tpu.memory_space<smem>>
    %c11_17 = arith.constant 11 : index
    %71 = memref.load %arg4[%c11_17] : memref<24xf32, #tpu.memory_space<smem>>
    %c12_18 = arith.constant 12 : index
    %72 = memref.load %arg4[%c12_18] : memref<24xf32, #tpu.memory_space<smem>>
    %c13_19 = arith.constant 13 : index
    %73 = memref.load %arg4[%c13_19] : memref<24xf32, #tpu.memory_space<smem>>
    %c14_20 = arith.constant 14 : index
    %74 = memref.load %arg4[%c14_20] : memref<24xf32, #tpu.memory_space<smem>>
    %c15_21 = arith.constant 15 : index
    %75 = memref.load %arg4[%c15_21] : memref<24xf32, #tpu.memory_space<smem>>
    %c16_22 = arith.constant 16 : index
    %76 = memref.load %arg4[%c16_22] : memref<24xf32, #tpu.memory_space<smem>>
    %c17_23 = arith.constant 17 : index
    %77 = memref.load %arg4[%c17_23] : memref<24xf32, #tpu.memory_space<smem>>
    %c18_24 = arith.constant 18 : index
    %78 = memref.load %arg4[%c18_24] : memref<24xf32, #tpu.memory_space<smem>>
    %c19_25 = arith.constant 19 : index
    %79 = memref.load %arg4[%c19_25] : memref<24xf32, #tpu.memory_space<smem>>
    %c20_26 = arith.constant 20 : index
    %80 = memref.load %arg4[%c20_26] : memref<24xf32, #tpu.memory_space<smem>>
    %c21_27 = arith.constant 21 : index
    %81 = memref.load %arg4[%c21_27] : memref<24xf32, #tpu.memory_space<smem>>
    %c22_28 = arith.constant 22 : index
    %82 = memref.load %arg4[%c22_28] : memref<24xf32, #tpu.memory_space<smem>>
    %c23_29 = arith.constant 23 : index
    %83 = memref.load %arg4[%c23_29] : memref<24xf32, #tpu.memory_space<smem>>
    %c0_30 = arith.constant 0 : index
    %84 = memref.load %arg5[%c0_30] : memref<4xf32, #tpu.memory_space<smem>>
    %c1_31 = arith.constant 1 : index
    %85 = memref.load %arg5[%c1_31] : memref<4xf32, #tpu.memory_space<smem>>
    %c2_32 = arith.constant 2 : index
    %86 = memref.load %arg5[%c2_32] : memref<4xf32, #tpu.memory_space<smem>>
    %c3_33 = arith.constant 3 : index
    %87 = memref.load %arg5[%c3_33] : memref<4xf32, #tpu.memory_space<smem>>
    %c0_34 = arith.constant 0 : index
    %88 = memref.load %arg6[%c0_34] : memref<24xf32, #tpu.memory_space<smem>>
    %c1_35 = arith.constant 1 : index
    %89 = memref.load %arg6[%c1_35] : memref<24xf32, #tpu.memory_space<smem>>
    %c2_36 = arith.constant 2 : index
    %90 = memref.load %arg6[%c2_36] : memref<24xf32, #tpu.memory_space<smem>>
    %c3_37 = arith.constant 3 : index
    %91 = memref.load %arg6[%c3_37] : memref<24xf32, #tpu.memory_space<smem>>
    %c4_38 = arith.constant 4 : index
    %92 = memref.load %arg6[%c4_38] : memref<24xf32, #tpu.memory_space<smem>>
    %c5_39 = arith.constant 5 : index
    %93 = memref.load %arg6[%c5_39] : memref<24xf32, #tpu.memory_space<smem>>
    %c6_40 = arith.constant 6 : index
    %94 = memref.load %arg6[%c6_40] : memref<24xf32, #tpu.memory_space<smem>>
    %c7_41 = arith.constant 7 : index
    %95 = memref.load %arg6[%c7_41] : memref<24xf32, #tpu.memory_space<smem>>
    %c8_42 = arith.constant 8 : index
    %96 = memref.load %arg6[%c8_42] : memref<24xf32, #tpu.memory_space<smem>>
    %c9_43 = arith.constant 9 : index
    %97 = memref.load %arg6[%c9_43] : memref<24xf32, #tpu.memory_space<smem>>
    %c10_44 = arith.constant 10 : index
    %98 = memref.load %arg6[%c10_44] : memref<24xf32, #tpu.memory_space<smem>>
    %c11_45 = arith.constant 11 : index
    %99 = memref.load %arg6[%c11_45] : memref<24xf32, #tpu.memory_space<smem>>
    %c12_46 = arith.constant 12 : index
    %100 = memref.load %arg6[%c12_46] : memref<24xf32, #tpu.memory_space<smem>>
    %c13_47 = arith.constant 13 : index
    %101 = memref.load %arg6[%c13_47] : memref<24xf32, #tpu.memory_space<smem>>
    %c14_48 = arith.constant 14 : index
    %102 = memref.load %arg6[%c14_48] : memref<24xf32, #tpu.memory_space<smem>>
    %c15_49 = arith.constant 15 : index
    %103 = memref.load %arg6[%c15_49] : memref<24xf32, #tpu.memory_space<smem>>
    %c16_50 = arith.constant 16 : index
    %104 = memref.load %arg6[%c16_50] : memref<24xf32, #tpu.memory_space<smem>>
    %c17_51 = arith.constant 17 : index
    %105 = memref.load %arg6[%c17_51] : memref<24xf32, #tpu.memory_space<smem>>
    %c18_52 = arith.constant 18 : index
    %106 = memref.load %arg6[%c18_52] : memref<24xf32, #tpu.memory_space<smem>>
    %c19_53 = arith.constant 19 : index
    %107 = memref.load %arg6[%c19_53] : memref<24xf32, #tpu.memory_space<smem>>
    %c20_54 = arith.constant 20 : index
    %108 = memref.load %arg6[%c20_54] : memref<24xf32, #tpu.memory_space<smem>>
    %c21_55 = arith.constant 21 : index
    %109 = memref.load %arg6[%c21_55] : memref<24xf32, #tpu.memory_space<smem>>
    %c22_56 = arith.constant 22 : index
    %110 = memref.load %arg6[%c22_56] : memref<24xf32, #tpu.memory_space<smem>>
    %c23_57 = arith.constant 23 : index
    %111 = memref.load %arg6[%c23_57] : memref<24xf32, #tpu.memory_space<smem>>
    %c0_58 = arith.constant 0 : index
    %112 = memref.load %arg7[%c0_58] : memref<6xf32, #tpu.memory_space<smem>>
    %c1_59 = arith.constant 1 : index
    %113 = memref.load %arg7[%c1_59] : memref<6xf32, #tpu.memory_space<smem>>
    %c2_60 = arith.constant 2 : index
    %114 = memref.load %arg7[%c2_60] : memref<6xf32, #tpu.memory_space<smem>>
    %c3_61 = arith.constant 3 : index
    %115 = memref.load %arg7[%c3_61] : memref<6xf32, #tpu.memory_space<smem>>
    %c4_62 = arith.constant 4 : index
    %116 = memref.load %arg7[%c4_62] : memref<6xf32, #tpu.memory_space<smem>>
    %c5_63 = arith.constant 5 : index
    %117 = memref.load %arg7[%c5_63] : memref<6xf32, #tpu.memory_space<smem>>
    %c0_64 = arith.constant 0 : index
    %118 = memref.load %arg8[%c0_64] : memref<54xf32, #tpu.memory_space<smem>>
    %c1_65 = arith.constant 1 : index
    %119 = memref.load %arg8[%c1_65] : memref<54xf32, #tpu.memory_space<smem>>
    %c2_66 = arith.constant 2 : index
    %120 = memref.load %arg8[%c2_66] : memref<54xf32, #tpu.memory_space<smem>>
    %c3_67 = arith.constant 3 : index
    %121 = memref.load %arg8[%c3_67] : memref<54xf32, #tpu.memory_space<smem>>
    %c4_68 = arith.constant 4 : index
    %122 = memref.load %arg8[%c4_68] : memref<54xf32, #tpu.memory_space<smem>>
    %c5_69 = arith.constant 5 : index
    %123 = memref.load %arg8[%c5_69] : memref<54xf32, #tpu.memory_space<smem>>
    %c6_70 = arith.constant 6 : index
    %124 = memref.load %arg8[%c6_70] : memref<54xf32, #tpu.memory_space<smem>>
    %c7_71 = arith.constant 7 : index
    %125 = memref.load %arg8[%c7_71] : memref<54xf32, #tpu.memory_space<smem>>
    %c8_72 = arith.constant 8 : index
    %126 = memref.load %arg8[%c8_72] : memref<54xf32, #tpu.memory_space<smem>>
    %c9_73 = arith.constant 9 : index
    %127 = memref.load %arg8[%c9_73] : memref<54xf32, #tpu.memory_space<smem>>
    %c10_74 = arith.constant 10 : index
    %128 = memref.load %arg8[%c10_74] : memref<54xf32, #tpu.memory_space<smem>>
    %c11_75 = arith.constant 11 : index
    %129 = memref.load %arg8[%c11_75] : memref<54xf32, #tpu.memory_space<smem>>
    %c12_76 = arith.constant 12 : index
    %130 = memref.load %arg8[%c12_76] : memref<54xf32, #tpu.memory_space<smem>>
    %c13_77 = arith.constant 13 : index
    %131 = memref.load %arg8[%c13_77] : memref<54xf32, #tpu.memory_space<smem>>
    %c14_78 = arith.constant 14 : index
    %132 = memref.load %arg8[%c14_78] : memref<54xf32, #tpu.memory_space<smem>>
    %c15_79 = arith.constant 15 : index
    %133 = memref.load %arg8[%c15_79] : memref<54xf32, #tpu.memory_space<smem>>
    %c16_80 = arith.constant 16 : index
    %134 = memref.load %arg8[%c16_80] : memref<54xf32, #tpu.memory_space<smem>>
    %c17_81 = arith.constant 17 : index
    %135 = memref.load %arg8[%c17_81] : memref<54xf32, #tpu.memory_space<smem>>
    %c18_82 = arith.constant 18 : index
    %136 = memref.load %arg8[%c18_82] : memref<54xf32, #tpu.memory_space<smem>>
    %c19_83 = arith.constant 19 : index
    %137 = memref.load %arg8[%c19_83] : memref<54xf32, #tpu.memory_space<smem>>
    %c20_84 = arith.constant 20 : index
    %138 = memref.load %arg8[%c20_84] : memref<54xf32, #tpu.memory_space<smem>>
    %c21_85 = arith.constant 21 : index
    %139 = memref.load %arg8[%c21_85] : memref<54xf32, #tpu.memory_space<smem>>
    %c22_86 = arith.constant 22 : index
    %140 = memref.load %arg8[%c22_86] : memref<54xf32, #tpu.memory_space<smem>>
    %c23_87 = arith.constant 23 : index
    %141 = memref.load %arg8[%c23_87] : memref<54xf32, #tpu.memory_space<smem>>
    %c24_88 = arith.constant 24 : index
    %142 = memref.load %arg8[%c24_88] : memref<54xf32, #tpu.memory_space<smem>>
    %c25_89 = arith.constant 25 : index
    %143 = memref.load %arg8[%c25_89] : memref<54xf32, #tpu.memory_space<smem>>
    %c26_90 = arith.constant 26 : index
    %144 = memref.load %arg8[%c26_90] : memref<54xf32, #tpu.memory_space<smem>>
    %c27_91 = arith.constant 27 : index
    %145 = memref.load %arg8[%c27_91] : memref<54xf32, #tpu.memory_space<smem>>
    %c28_92 = arith.constant 28 : index
    %146 = memref.load %arg8[%c28_92] : memref<54xf32, #tpu.memory_space<smem>>
    %c29_93 = arith.constant 29 : index
    %147 = memref.load %arg8[%c29_93] : memref<54xf32, #tpu.memory_space<smem>>
    %c30_94 = arith.constant 30 : index
    %148 = memref.load %arg8[%c30_94] : memref<54xf32, #tpu.memory_space<smem>>
    %c31_95 = arith.constant 31 : index
    %149 = memref.load %arg8[%c31_95] : memref<54xf32, #tpu.memory_space<smem>>
    %c32_96 = arith.constant 32 : index
    %150 = memref.load %arg8[%c32_96] : memref<54xf32, #tpu.memory_space<smem>>
    %c33_97 = arith.constant 33 : index
    %151 = memref.load %arg8[%c33_97] : memref<54xf32, #tpu.memory_space<smem>>
    %c34_98 = arith.constant 34 : index
    %152 = memref.load %arg8[%c34_98] : memref<54xf32, #tpu.memory_space<smem>>
    %c35_99 = arith.constant 35 : index
    %153 = memref.load %arg8[%c35_99] : memref<54xf32, #tpu.memory_space<smem>>
    %c36_100 = arith.constant 36 : index
    %154 = memref.load %arg8[%c36_100] : memref<54xf32, #tpu.memory_space<smem>>
    %c37_101 = arith.constant 37 : index
    %155 = memref.load %arg8[%c37_101] : memref<54xf32, #tpu.memory_space<smem>>
    %c38_102 = arith.constant 38 : index
    %156 = memref.load %arg8[%c38_102] : memref<54xf32, #tpu.memory_space<smem>>
    %c39_103 = arith.constant 39 : index
    %157 = memref.load %arg8[%c39_103] : memref<54xf32, #tpu.memory_space<smem>>
    %c40_104 = arith.constant 40 : index
    %158 = memref.load %arg8[%c40_104] : memref<54xf32, #tpu.memory_space<smem>>
    %c41_105 = arith.constant 41 : index
    %159 = memref.load %arg8[%c41_105] : memref<54xf32, #tpu.memory_space<smem>>
    %c42_106 = arith.constant 42 : index
    %160 = memref.load %arg8[%c42_106] : memref<54xf32, #tpu.memory_space<smem>>
    %c43_107 = arith.constant 43 : index
    %161 = memref.load %arg8[%c43_107] : memref<54xf32, #tpu.memory_space<smem>>
    %c44_108 = arith.constant 44 : index
    %162 = memref.load %arg8[%c44_108] : memref<54xf32, #tpu.memory_space<smem>>
    %c45_109 = arith.constant 45 : index
    %163 = memref.load %arg8[%c45_109] : memref<54xf32, #tpu.memory_space<smem>>
    %c46_110 = arith.constant 46 : index
    %164 = memref.load %arg8[%c46_110] : memref<54xf32, #tpu.memory_space<smem>>
    %c47_111 = arith.constant 47 : index
    %165 = memref.load %arg8[%c47_111] : memref<54xf32, #tpu.memory_space<smem>>
    %c48_112 = arith.constant 48 : index
    %166 = memref.load %arg8[%c48_112] : memref<54xf32, #tpu.memory_space<smem>>
    %c49_113 = arith.constant 49 : index
    %167 = memref.load %arg8[%c49_113] : memref<54xf32, #tpu.memory_space<smem>>
    %c50_114 = arith.constant 50 : index
    %168 = memref.load %arg8[%c50_114] : memref<54xf32, #tpu.memory_space<smem>>
    %c51_115 = arith.constant 51 : index
    %169 = memref.load %arg8[%c51_115] : memref<54xf32, #tpu.memory_space<smem>>
    %c52_116 = arith.constant 52 : index
    %170 = memref.load %arg8[%c52_116] : memref<54xf32, #tpu.memory_space<smem>>
    %c53_117 = arith.constant 53 : index
    %171 = memref.load %arg8[%c53_117] : memref<54xf32, #tpu.memory_space<smem>>
    %c0_118 = arith.constant 0 : index
    %172 = memref.load %arg9[%c0_118] : memref<9xf32, #tpu.memory_space<smem>>
    %c1_119 = arith.constant 1 : index
    %173 = memref.load %arg9[%c1_119] : memref<9xf32, #tpu.memory_space<smem>>
    %c2_120 = arith.constant 2 : index
    %174 = memref.load %arg9[%c2_120] : memref<9xf32, #tpu.memory_space<smem>>
    %c3_121 = arith.constant 3 : index
    %175 = memref.load %arg9[%c3_121] : memref<9xf32, #tpu.memory_space<smem>>
    %c4_122 = arith.constant 4 : index
    %176 = memref.load %arg9[%c4_122] : memref<9xf32, #tpu.memory_space<smem>>
    %c5_123 = arith.constant 5 : index
    %177 = memref.load %arg9[%c5_123] : memref<9xf32, #tpu.memory_space<smem>>
    %c6_124 = arith.constant 6 : index
    %178 = memref.load %arg9[%c6_124] : memref<9xf32, #tpu.memory_space<smem>>
    %c7_125 = arith.constant 7 : index
    %179 = memref.load %arg9[%c7_125] : memref<9xf32, #tpu.memory_space<smem>>
    %c8_126 = arith.constant 8 : index
    %180 = memref.load %arg9[%c8_126] : memref<9xf32, #tpu.memory_space<smem>>
    %c0_i32 = arith.constant 0 : i32
    %c8_i32 = arith.constant 8 : i32
    %181 = arith.muli %c0_i32, %c8_i32 : i32
    %182 = tpu.assume_multiple %181, 8 : i32
    %c0_127 = arith.constant 0 : index
    %183 = arith.index_cast %182 : i32 to index
    %c0_128 = arith.constant 0 : index
    %184 = vector.load %arg1[%c0_127, %183, %c0_128] : memref<9x16x128xf32, #tpu.memory_space<vmem>>, vector<1x8x128xf32>
    %185 = vector.shape_cast %184 : vector<1x8x128xf32> to vector<8x128xf32>
    %c1_129 = arith.constant 1 : index
    %186 = arith.index_cast %182 : i32 to index
    %c0_130 = arith.constant 0 : index
    %187 = vector.load %arg1[%c1_129, %186, %c0_130] : memref<9x16x128xf32, #tpu.memory_space<vmem>>, vector<1x8x128xf32>
    %188 = vector.shape_cast %187 : vector<1x8x128xf32> to vector<8x128xf32>
    %c2_131 = arith.constant 2 : index
    %189 = arith.index_cast %182 : i32 to index
    %c0_132 = arith.constant 0 : index
    %190 = vector.load %arg1[%c2_131, %189, %c0_132] : memref<9x16x128xf32, #tpu.memory_space<vmem>>, vector<1x8x128xf32>
    %191 = vector.shape_cast %190 : vector<1x8x128xf32> to vector<8x128xf32>
    %c3_133 = arith.constant 3 : index
    %192 = arith.index_cast %182 : i32 to index
    %c0_134 = arith.constant 0 : index
    %193 = vector.load %arg1[%c3_133, %192, %c0_134] : memref<9x16x128xf32, #tpu.memory_space<vmem>>, vector<1x8x128xf32>
    %194 = vector.shape_cast %193 : vector<1x8x128xf32> to vector<8x128xf32>
    %c4_135 = arith.constant 4 : index
    %195 = arith.index_cast %182 : i32 to index
    %c0_136 = arith.constant 0 : index
    %196 = vector.load %arg1[%c4_135, %195, %c0_136] : memref<9x16x128xf32, #tpu.memory_space<vmem>>, vector<1x8x128xf32>
    %197 = vector.shape_cast %196 : vector<1x8x128xf32> to vector<8x128xf32>
    %c5_137 = arith.constant 5 : index
    %198 = arith.index_cast %182 : i32 to index
    %c0_138 = arith.constant 0 : index
    %199 = vector.load %arg1[%c5_137, %198, %c0_138] : memref<9x16x128xf32, #tpu.memory_space<vmem>>, vector<1x8x128xf32>
    %200 = vector.shape_cast %199 : vector<1x8x128xf32> to vector<8x128xf32>
    %c6_139 = arith.constant 6 : index
    %201 = arith.index_cast %182 : i32 to index
    %c0_140 = arith.constant 0 : index
    %202 = vector.load %arg1[%c6_139, %201, %c0_140] : memref<9x16x128xf32, #tpu.memory_space<vmem>>, vector<1x8x128xf32>
    %203 = vector.shape_cast %202 : vector<1x8x128xf32> to vector<8x128xf32>
    %c7_141 = arith.constant 7 : index
    %204 = arith.index_cast %182 : i32 to index
    %c0_142 = arith.constant 0 : index
    %205 = vector.load %arg1[%c7_141, %204, %c0_142] : memref<9x16x128xf32, #tpu.memory_space<vmem>>, vector<1x8x128xf32>
    %206 = vector.shape_cast %205 : vector<1x8x128xf32> to vector<8x128xf32>
    %c8_143 = arith.constant 8 : index
    %207 = arith.index_cast %182 : i32 to index
    %c0_144 = arith.constant 0 : index
    %208 = vector.load %arg1[%c8_143, %207, %c0_144] : memref<9x16x128xf32, #tpu.memory_space<vmem>>, vector<1x8x128xf32>
    %209 = vector.shape_cast %208 : vector<1x8x128xf32> to vector<8x128xf32>
    %210 = vector.broadcast %0 : f32 to vector<8x128xf32>
    %211 = arith.mulf %210, %185 : vector<8x128xf32>
    %212 = vector.broadcast %1 : f32 to vector<8x128xf32>
    %213 = arith.mulf %212, %188 : vector<8x128xf32>
    %214 = arith.addf %211, %213 : vector<8x128xf32>
    %215 = vector.broadcast %2 : f32 to vector<8x128xf32>
    %216 = arith.mulf %215, %191 : vector<8x128xf32>
    %217 = arith.addf %214, %216 : vector<8x128xf32>
    %218 = vector.broadcast %3 : f32 to vector<8x128xf32>
    %219 = arith.mulf %218, %194 : vector<8x128xf32>
    %220 = arith.addf %217, %219 : vector<8x128xf32>
    %221 = vector.broadcast %4 : f32 to vector<8x128xf32>
    %222 = arith.mulf %221, %197 : vector<8x128xf32>
    %223 = arith.addf %220, %222 : vector<8x128xf32>
    %224 = vector.broadcast %5 : f32 to vector<8x128xf32>
    %225 = arith.mulf %224, %200 : vector<8x128xf32>
    %226 = arith.addf %223, %225 : vector<8x128xf32>
    %227 = vector.broadcast %6 : f32 to vector<8x128xf32>
    %228 = arith.mulf %227, %203 : vector<8x128xf32>
    %229 = arith.addf %226, %228 : vector<8x128xf32>
    %230 = vector.broadcast %7 : f32 to vector<8x128xf32>
    %231 = arith.mulf %230, %206 : vector<8x128xf32>
    %232 = arith.addf %229, %231 : vector<8x128xf32>
    %233 = vector.broadcast %8 : f32 to vector<8x128xf32>
    %234 = arith.mulf %233, %209 : vector<8x128xf32>
    %235 = arith.addf %232, %234 : vector<8x128xf32>
    %236 = vector.broadcast %54 : f32 to vector<8x128xf32>
    %237 = arith.addf %235, %236 : vector<8x128xf32>
    %238 = vector.broadcast %9 : f32 to vector<8x128xf32>
    %239 = arith.mulf %238, %185 : vector<8x128xf32>
    %240 = vector.broadcast %10 : f32 to vector<8x128xf32>
    %241 = arith.mulf %240, %188 : vector<8x128xf32>
    %242 = arith.addf %239, %241 : vector<8x128xf32>
    %243 = vector.broadcast %11 : f32 to vector<8x128xf32>
    %244 = arith.mulf %243, %191 : vector<8x128xf32>
    %245 = arith.addf %242, %244 : vector<8x128xf32>
    %246 = vector.broadcast %12 : f32 to vector<8x128xf32>
    %247 = arith.mulf %246, %194 : vector<8x128xf32>
    %248 = arith.addf %245, %247 : vector<8x128xf32>
    %249 = vector.broadcast %13 : f32 to vector<8x128xf32>
    %250 = arith.mulf %249, %197 : vector<8x128xf32>
    %251 = arith.addf %248, %250 : vector<8x128xf32>
    %252 = vector.broadcast %14 : f32 to vector<8x128xf32>
    %253 = arith.mulf %252, %200 : vector<8x128xf32>
    %254 = arith.addf %251, %253 : vector<8x128xf32>
    %255 = vector.broadcast %15 : f32 to vector<8x128xf32>
    %256 = arith.mulf %255, %203 : vector<8x128xf32>
    %257 = arith.addf %254, %256 : vector<8x128xf32>
    %258 = vector.broadcast %16 : f32 to vector<8x128xf32>
    %259 = arith.mulf %258, %206 : vector<8x128xf32>
    %260 = arith.addf %257, %259 : vector<8x128xf32>
    %261 = vector.broadcast %17 : f32 to vector<8x128xf32>
    %262 = arith.mulf %261, %209 : vector<8x128xf32>
    %263 = arith.addf %260, %262 : vector<8x128xf32>
    %264 = vector.broadcast %55 : f32 to vector<8x128xf32>
    %265 = arith.addf %263, %264 : vector<8x128xf32>
    %266 = vector.broadcast %18 : f32 to vector<8x128xf32>
    %267 = arith.mulf %266, %185 : vector<8x128xf32>
    %268 = vector.broadcast %19 : f32 to vector<8x128xf32>
    %269 = arith.mulf %268, %188 : vector<8x128xf32>
    %270 = arith.addf %267, %269 : vector<8x128xf32>
    %271 = vector.broadcast %20 : f32 to vector<8x128xf32>
    %272 = arith.mulf %271, %191 : vector<8x128xf32>
    %273 = arith.addf %270, %272 : vector<8x128xf32>
    %274 = vector.broadcast %21 : f32 to vector<8x128xf32>
    %275 = arith.mulf %274, %194 : vector<8x128xf32>
    %276 = arith.addf %273, %275 : vector<8x128xf32>
    %277 = vector.broadcast %22 : f32 to vector<8x128xf32>
    %278 = arith.mulf %277, %197 : vector<8x128xf32>
    %279 = arith.addf %276, %278 : vector<8x128xf32>
    %280 = vector.broadcast %23 : f32 to vector<8x128xf32>
    %281 = arith.mulf %280, %200 : vector<8x128xf32>
    %282 = arith.addf %279, %281 : vector<8x128xf32>
    %283 = vector.broadcast %24 : f32 to vector<8x128xf32>
    %284 = arith.mulf %283, %203 : vector<8x128xf32>
    %285 = arith.addf %282, %284 : vector<8x128xf32>
    %286 = vector.broadcast %25 : f32 to vector<8x128xf32>
    %287 = arith.mulf %286, %206 : vector<8x128xf32>
    %288 = arith.addf %285, %287 : vector<8x128xf32>
    %289 = vector.broadcast %26 : f32 to vector<8x128xf32>
    %290 = arith.mulf %289, %209 : vector<8x128xf32>
    %291 = arith.addf %288, %290 : vector<8x128xf32>
    %292 = vector.broadcast %56 : f32 to vector<8x128xf32>
    %293 = arith.addf %291, %292 : vector<8x128xf32>
    %294 = vector.broadcast %27 : f32 to vector<8x128xf32>
    %295 = arith.mulf %294, %185 : vector<8x128xf32>
    %296 = vector.broadcast %28 : f32 to vector<8x128xf32>
    %297 = arith.mulf %296, %188 : vector<8x128xf32>
    %298 = arith.addf %295, %297 : vector<8x128xf32>
    %299 = vector.broadcast %29 : f32 to vector<8x128xf32>
    %300 = arith.mulf %299, %191 : vector<8x128xf32>
    %301 = arith.addf %298, %300 : vector<8x128xf32>
    %302 = vector.broadcast %30 : f32 to vector<8x128xf32>
    %303 = arith.mulf %302, %194 : vector<8x128xf32>
    %304 = arith.addf %301, %303 : vector<8x128xf32>
    %305 = vector.broadcast %31 : f32 to vector<8x128xf32>
    %306 = arith.mulf %305, %197 : vector<8x128xf32>
    %307 = arith.addf %304, %306 : vector<8x128xf32>
    %308 = vector.broadcast %32 : f32 to vector<8x128xf32>
    %309 = arith.mulf %308, %200 : vector<8x128xf32>
    %310 = arith.addf %307, %309 : vector<8x128xf32>
    %311 = vector.broadcast %33 : f32 to vector<8x128xf32>
    %312 = arith.mulf %311, %203 : vector<8x128xf32>
    %313 = arith.addf %310, %312 : vector<8x128xf32>
    %314 = vector.broadcast %34 : f32 to vector<8x128xf32>
    %315 = arith.mulf %314, %206 : vector<8x128xf32>
    %316 = arith.addf %313, %315 : vector<8x128xf32>
    %317 = vector.broadcast %35 : f32 to vector<8x128xf32>
    %318 = arith.mulf %317, %209 : vector<8x128xf32>
    %319 = arith.addf %316, %318 : vector<8x128xf32>
    %320 = vector.broadcast %57 : f32 to vector<8x128xf32>
    %321 = arith.addf %319, %320 : vector<8x128xf32>
    %322 = vector.broadcast %36 : f32 to vector<8x128xf32>
    %323 = arith.mulf %322, %185 : vector<8x128xf32>
    %324 = vector.broadcast %37 : f32 to vector<8x128xf32>
    %325 = arith.mulf %324, %188 : vector<8x128xf32>
    %326 = arith.addf %323, %325 : vector<8x128xf32>
    %327 = vector.broadcast %38 : f32 to vector<8x128xf32>
    %328 = arith.mulf %327, %191 : vector<8x128xf32>
    %329 = arith.addf %326, %328 : vector<8x128xf32>
    %330 = vector.broadcast %39 : f32 to vector<8x128xf32>
    %331 = arith.mulf %330, %194 : vector<8x128xf32>
    %332 = arith.addf %329, %331 : vector<8x128xf32>
    %333 = vector.broadcast %40 : f32 to vector<8x128xf32>
    %334 = arith.mulf %333, %197 : vector<8x128xf32>
    %335 = arith.addf %332, %334 : vector<8x128xf32>
    %336 = vector.broadcast %41 : f32 to vector<8x128xf32>
    %337 = arith.mulf %336, %200 : vector<8x128xf32>
    %338 = arith.addf %335, %337 : vector<8x128xf32>
    %339 = vector.broadcast %42 : f32 to vector<8x128xf32>
    %340 = arith.mulf %339, %203 : vector<8x128xf32>
    %341 = arith.addf %338, %340 : vector<8x128xf32>
    %342 = vector.broadcast %43 : f32 to vector<8x128xf32>
    %343 = arith.mulf %342, %206 : vector<8x128xf32>
    %344 = arith.addf %341, %343 : vector<8x128xf32>
    %345 = vector.broadcast %44 : f32 to vector<8x128xf32>
    %346 = arith.mulf %345, %209 : vector<8x128xf32>
    %347 = arith.addf %344, %346 : vector<8x128xf32>
    %348 = vector.broadcast %58 : f32 to vector<8x128xf32>
    %349 = arith.addf %347, %348 : vector<8x128xf32>
    %350 = vector.broadcast %45 : f32 to vector<8x128xf32>
    %351 = arith.mulf %350, %185 : vector<8x128xf32>
    %352 = vector.broadcast %46 : f32 to vector<8x128xf32>
    %353 = arith.mulf %352, %188 : vector<8x128xf32>
    %354 = arith.addf %351, %353 : vector<8x128xf32>
    %355 = vector.broadcast %47 : f32 to vector<8x128xf32>
    %356 = arith.mulf %355, %191 : vector<8x128xf32>
    %357 = arith.addf %354, %356 : vector<8x128xf32>
    %358 = vector.broadcast %48 : f32 to vector<8x128xf32>
    %359 = arith.mulf %358, %194 : vector<8x128xf32>
    %360 = arith.addf %357, %359 : vector<8x128xf32>
    %361 = vector.broadcast %49 : f32 to vector<8x128xf32>
    %362 = arith.mulf %361, %197 : vector<8x128xf32>
    %363 = arith.addf %360, %362 : vector<8x128xf32>
    %364 = vector.broadcast %50 : f32 to vector<8x128xf32>
    %365 = arith.mulf %364, %200 : vector<8x128xf32>
    %366 = arith.addf %363, %365 : vector<8x128xf32>
    %367 = vector.broadcast %51 : f32 to vector<8x128xf32>
    %368 = arith.mulf %367, %203 : vector<8x128xf32>
    %369 = arith.addf %366, %368 : vector<8x128xf32>
    %370 = vector.broadcast %52 : f32 to vector<8x128xf32>
    %371 = arith.mulf %370, %206 : vector<8x128xf32>
    %372 = arith.addf %369, %371 : vector<8x128xf32>
    %373 = vector.broadcast %53 : f32 to vector<8x128xf32>
    %374 = arith.mulf %373, %209 : vector<8x128xf32>
    %375 = arith.addf %372, %374 : vector<8x128xf32>
    %376 = vector.broadcast %59 : f32 to vector<8x128xf32>
    %377 = arith.addf %375, %376 : vector<8x128xf32>
    %378 = math.tanh %237 : vector<8x128xf32>
    %379 = math.tanh %265 : vector<8x128xf32>
    %380 = math.tanh %293 : vector<8x128xf32>
    %381 = math.tanh %321 : vector<8x128xf32>
    %382 = math.tanh %349 : vector<8x128xf32>
    %383 = math.tanh %377 : vector<8x128xf32>
    %384 = vector.broadcast %60 : f32 to vector<8x128xf32>
    %385 = arith.mulf %384, %378 : vector<8x128xf32>
    %386 = vector.broadcast %61 : f32 to vector<8x128xf32>
    %387 = arith.mulf %386, %379 : vector<8x128xf32>
    %388 = arith.addf %385, %387 : vector<8x128xf32>
    %389 = vector.broadcast %62 : f32 to vector<8x128xf32>
    %390 = arith.mulf %389, %380 : vector<8x128xf32>
    %391 = arith.addf %388, %390 : vector<8x128xf32>
    %392 = vector.broadcast %63 : f32 to vector<8x128xf32>
    %393 = arith.mulf %392, %381 : vector<8x128xf32>
    %394 = arith.addf %391, %393 : vector<8x128xf32>
    %395 = vector.broadcast %64 : f32 to vector<8x128xf32>
    %396 = arith.mulf %395, %382 : vector<8x128xf32>
    %397 = arith.addf %394, %396 : vector<8x128xf32>
    %398 = vector.broadcast %65 : f32 to vector<8x128xf32>
    %399 = arith.mulf %398, %383 : vector<8x128xf32>
    %400 = arith.addf %397, %399 : vector<8x128xf32>
    %401 = vector.broadcast %84 : f32 to vector<8x128xf32>
    %402 = arith.addf %400, %401 : vector<8x128xf32>
    %403 = vector.broadcast %66 : f32 to vector<8x128xf32>
    %404 = arith.mulf %403, %378 : vector<8x128xf32>
    %405 = vector.broadcast %67 : f32 to vector<8x128xf32>
    %406 = arith.mulf %405, %379 : vector<8x128xf32>
    %407 = arith.addf %404, %406 : vector<8x128xf32>
    %408 = vector.broadcast %68 : f32 to vector<8x128xf32>
    %409 = arith.mulf %408, %380 : vector<8x128xf32>
    %410 = arith.addf %407, %409 : vector<8x128xf32>
    %411 = vector.broadcast %69 : f32 to vector<8x128xf32>
    %412 = arith.mulf %411, %381 : vector<8x128xf32>
    %413 = arith.addf %410, %412 : vector<8x128xf32>
    %414 = vector.broadcast %70 : f32 to vector<8x128xf32>
    %415 = arith.mulf %414, %382 : vector<8x128xf32>
    %416 = arith.addf %413, %415 : vector<8x128xf32>
    %417 = vector.broadcast %71 : f32 to vector<8x128xf32>
    %418 = arith.mulf %417, %383 : vector<8x128xf32>
    %419 = arith.addf %416, %418 : vector<8x128xf32>
    %420 = vector.broadcast %85 : f32 to vector<8x128xf32>
    %421 = arith.addf %419, %420 : vector<8x128xf32>
    %422 = vector.broadcast %72 : f32 to vector<8x128xf32>
    %423 = arith.mulf %422, %378 : vector<8x128xf32>
    %424 = vector.broadcast %73 : f32 to vector<8x128xf32>
    %425 = arith.mulf %424, %379 : vector<8x128xf32>
    %426 = arith.addf %423, %425 : vector<8x128xf32>
    %427 = vector.broadcast %74 : f32 to vector<8x128xf32>
    %428 = arith.mulf %427, %380 : vector<8x128xf32>
    %429 = arith.addf %426, %428 : vector<8x128xf32>
    %430 = vector.broadcast %75 : f32 to vector<8x128xf32>
    %431 = arith.mulf %430, %381 : vector<8x128xf32>
    %432 = arith.addf %429, %431 : vector<8x128xf32>
    %433 = vector.broadcast %76 : f32 to vector<8x128xf32>
    %434 = arith.mulf %433, %382 : vector<8x128xf32>
    %435 = arith.addf %432, %434 : vector<8x128xf32>
    %436 = vector.broadcast %77 : f32 to vector<8x128xf32>
    %437 = arith.mulf %436, %383 : vector<8x128xf32>
    %438 = arith.addf %435, %437 : vector<8x128xf32>
    %439 = vector.broadcast %86 : f32 to vector<8x128xf32>
    %440 = arith.addf %438, %439 : vector<8x128xf32>
    %441 = vector.broadcast %78 : f32 to vector<8x128xf32>
    %442 = arith.mulf %441, %378 : vector<8x128xf32>
    %443 = vector.broadcast %79 : f32 to vector<8x128xf32>
    %444 = arith.mulf %443, %379 : vector<8x128xf32>
    %445 = arith.addf %442, %444 : vector<8x128xf32>
    %446 = vector.broadcast %80 : f32 to vector<8x128xf32>
    %447 = arith.mulf %446, %380 : vector<8x128xf32>
    %448 = arith.addf %445, %447 : vector<8x128xf32>
    %449 = vector.broadcast %81 : f32 to vector<8x128xf32>
    %450 = arith.mulf %449, %381 : vector<8x128xf32>
    %451 = arith.addf %448, %450 : vector<8x128xf32>
    %452 = vector.broadcast %82 : f32 to vector<8x128xf32>
    %453 = arith.mulf %452, %382 : vector<8x128xf32>
    %454 = arith.addf %451, %453 : vector<8x128xf32>
    %455 = vector.broadcast %83 : f32 to vector<8x128xf32>
    %456 = arith.mulf %455, %383 : vector<8x128xf32>
    %457 = arith.addf %454, %456 : vector<8x128xf32>
    %458 = vector.broadcast %87 : f32 to vector<8x128xf32>
    %459 = arith.addf %457, %458 : vector<8x128xf32>
    %460 = math.tanh %402 : vector<8x128xf32>
    %461 = math.tanh %421 : vector<8x128xf32>
    %462 = math.tanh %440 : vector<8x128xf32>
    %463 = math.tanh %459 : vector<8x128xf32>
    %464 = vector.broadcast %88 : f32 to vector<8x128xf32>
    %465 = arith.mulf %464, %460 : vector<8x128xf32>
    %466 = vector.broadcast %89 : f32 to vector<8x128xf32>
    %467 = arith.mulf %466, %461 : vector<8x128xf32>
    %468 = arith.addf %465, %467 : vector<8x128xf32>
    %469 = vector.broadcast %90 : f32 to vector<8x128xf32>
    %470 = arith.mulf %469, %462 : vector<8x128xf32>
    %471 = arith.addf %468, %470 : vector<8x128xf32>
    %472 = vector.broadcast %91 : f32 to vector<8x128xf32>
    %473 = arith.mulf %472, %463 : vector<8x128xf32>
    %474 = arith.addf %471, %473 : vector<8x128xf32>
    %475 = vector.broadcast %112 : f32 to vector<8x128xf32>
    %476 = arith.addf %474, %475 : vector<8x128xf32>
    %477 = vector.broadcast %92 : f32 to vector<8x128xf32>
    %478 = arith.mulf %477, %460 : vector<8x128xf32>
    %479 = vector.broadcast %93 : f32 to vector<8x128xf32>
    %480 = arith.mulf %479, %461 : vector<8x128xf32>
    %481 = arith.addf %478, %480 : vector<8x128xf32>
    %482 = vector.broadcast %94 : f32 to vector<8x128xf32>
    %483 = arith.mulf %482, %462 : vector<8x128xf32>
    %484 = arith.addf %481, %483 : vector<8x128xf32>
    %485 = vector.broadcast %95 : f32 to vector<8x128xf32>
    %486 = arith.mulf %485, %463 : vector<8x128xf32>
    %487 = arith.addf %484, %486 : vector<8x128xf32>
    %488 = vector.broadcast %113 : f32 to vector<8x128xf32>
    %489 = arith.addf %487, %488 : vector<8x128xf32>
    %490 = vector.broadcast %96 : f32 to vector<8x128xf32>
    %491 = arith.mulf %490, %460 : vector<8x128xf32>
    %492 = vector.broadcast %97 : f32 to vector<8x128xf32>
    %493 = arith.mulf %492, %461 : vector<8x128xf32>
    %494 = arith.addf %491, %493 : vector<8x128xf32>
    %495 = vector.broadcast %98 : f32 to vector<8x128xf32>
    %496 = arith.mulf %495, %462 : vector<8x128xf32>
    %497 = arith.addf %494, %496 : vector<8x128xf32>
    %498 = vector.broadcast %99 : f32 to vector<8x128xf32>
    %499 = arith.mulf %498, %463 : vector<8x128xf32>
    %500 = arith.addf %497, %499 : vector<8x128xf32>
    %501 = vector.broadcast %114 : f32 to vector<8x128xf32>
    %502 = arith.addf %500, %501 : vector<8x128xf32>
    %503 = vector.broadcast %100 : f32 to vector<8x128xf32>
    %504 = arith.mulf %503, %460 : vector<8x128xf32>
    %505 = vector.broadcast %101 : f32 to vector<8x128xf32>
    %506 = arith.mulf %505, %461 : vector<8x128xf32>
    %507 = arith.addf %504, %506 : vector<8x128xf32>
    %508 = vector.broadcast %102 : f32 to vector<8x128xf32>
    %509 = arith.mulf %508, %462 : vector<8x128xf32>
    %510 = arith.addf %507, %509 : vector<8x128xf32>
    %511 = vector.broadcast %103 : f32 to vector<8x128xf32>
    %512 = arith.mulf %511, %463 : vector<8x128xf32>
    %513 = arith.addf %510, %512 : vector<8x128xf32>
    %514 = vector.broadcast %115 : f32 to vector<8x128xf32>
    %515 = arith.addf %513, %514 : vector<8x128xf32>
    %516 = vector.broadcast %104 : f32 to vector<8x128xf32>
    %517 = arith.mulf %516, %460 : vector<8x128xf32>
    %518 = vector.broadcast %105 : f32 to vector<8x128xf32>
    %519 = arith.mulf %518, %461 : vector<8x128xf32>
    %520 = arith.addf %517, %519 : vector<8x128xf32>
    %521 = vector.broadcast %106 : f32 to vector<8x128xf32>
    %522 = arith.mulf %521, %462 : vector<8x128xf32>
    %523 = arith.addf %520, %522 : vector<8x128xf32>
    %524 = vector.broadcast %107 : f32 to vector<8x128xf32>
    %525 = arith.mulf %524, %463 : vector<8x128xf32>
    %526 = arith.addf %523, %525 : vector<8x128xf32>
    %527 = vector.broadcast %116 : f32 to vector<8x128xf32>
    %528 = arith.addf %526, %527 : vector<8x128xf32>
    %529 = vector.broadcast %108 : f32 to vector<8x128xf32>
    %530 = arith.mulf %529, %460 : vector<8x128xf32>
    %531 = vector.broadcast %109 : f32 to vector<8x128xf32>
    %532 = arith.mulf %531, %461 : vector<8x128xf32>
    %533 = arith.addf %530, %532 : vector<8x128xf32>
    %534 = vector.broadcast %110 : f32 to vector<8x128xf32>
    %535 = arith.mulf %534, %462 : vector<8x128xf32>
    %536 = arith.addf %533, %535 : vector<8x128xf32>
    %537 = vector.broadcast %111 : f32 to vector<8x128xf32>
    %538 = arith.mulf %537, %463 : vector<8x128xf32>
    %539 = arith.addf %536, %538 : vector<8x128xf32>
    %540 = vector.broadcast %117 : f32 to vector<8x128xf32>
    %541 = arith.addf %539, %540 : vector<8x128xf32>
    %542 = math.tanh %476 : vector<8x128xf32>
    %543 = math.tanh %489 : vector<8x128xf32>
    %544 = math.tanh %502 : vector<8x128xf32>
    %545 = math.tanh %515 : vector<8x128xf32>
    %546 = math.tanh %528 : vector<8x128xf32>
    %547 = math.tanh %541 : vector<8x128xf32>
    %548 = vector.broadcast %118 : f32 to vector<8x128xf32>
    %549 = arith.mulf %548, %542 : vector<8x128xf32>
    %550 = vector.broadcast %119 : f32 to vector<8x128xf32>
    %551 = arith.mulf %550, %543 : vector<8x128xf32>
    %552 = arith.addf %549, %551 : vector<8x128xf32>
    %553 = vector.broadcast %120 : f32 to vector<8x128xf32>
    %554 = arith.mulf %553, %544 : vector<8x128xf32>
    %555 = arith.addf %552, %554 : vector<8x128xf32>
    %556 = vector.broadcast %121 : f32 to vector<8x128xf32>
    %557 = arith.mulf %556, %545 : vector<8x128xf32>
    %558 = arith.addf %555, %557 : vector<8x128xf32>
    %559 = vector.broadcast %122 : f32 to vector<8x128xf32>
    %560 = arith.mulf %559, %546 : vector<8x128xf32>
    %561 = arith.addf %558, %560 : vector<8x128xf32>
    %562 = vector.broadcast %123 : f32 to vector<8x128xf32>
    %563 = arith.mulf %562, %547 : vector<8x128xf32>
    %564 = arith.addf %561, %563 : vector<8x128xf32>
    %565 = vector.broadcast %172 : f32 to vector<8x128xf32>
    %566 = arith.addf %564, %565 : vector<8x128xf32>
    %567 = vector.broadcast %124 : f32 to vector<8x128xf32>
    %568 = arith.mulf %567, %542 : vector<8x128xf32>
    %569 = vector.broadcast %125 : f32 to vector<8x128xf32>
    %570 = arith.mulf %569, %543 : vector<8x128xf32>
    %571 = arith.addf %568, %570 : vector<8x128xf32>
    %572 = vector.broadcast %126 : f32 to vector<8x128xf32>
    %573 = arith.mulf %572, %544 : vector<8x128xf32>
    %574 = arith.addf %571, %573 : vector<8x128xf32>
    %575 = vector.broadcast %127 : f32 to vector<8x128xf32>
    %576 = arith.mulf %575, %545 : vector<8x128xf32>
    %577 = arith.addf %574, %576 : vector<8x128xf32>
    %578 = vector.broadcast %128 : f32 to vector<8x128xf32>
    %579 = arith.mulf %578, %546 : vector<8x128xf32>
    %580 = arith.addf %577, %579 : vector<8x128xf32>
    %581 = vector.broadcast %129 : f32 to vector<8x128xf32>
    %582 = arith.mulf %581, %547 : vector<8x128xf32>
    %583 = arith.addf %580, %582 : vector<8x128xf32>
    %584 = vector.broadcast %173 : f32 to vector<8x128xf32>
    %585 = arith.addf %583, %584 : vector<8x128xf32>
    %586 = vector.broadcast %130 : f32 to vector<8x128xf32>
    %587 = arith.mulf %586, %542 : vector<8x128xf32>
    %588 = vector.broadcast %131 : f32 to vector<8x128xf32>
    %589 = arith.mulf %588, %543 : vector<8x128xf32>
    %590 = arith.addf %587, %589 : vector<8x128xf32>
    %591 = vector.broadcast %132 : f32 to vector<8x128xf32>
    %592 = arith.mulf %591, %544 : vector<8x128xf32>
    %593 = arith.addf %590, %592 : vector<8x128xf32>
    %594 = vector.broadcast %133 : f32 to vector<8x128xf32>
    %595 = arith.mulf %594, %545 : vector<8x128xf32>
    %596 = arith.addf %593, %595 : vector<8x128xf32>
    %597 = vector.broadcast %134 : f32 to vector<8x128xf32>
    %598 = arith.mulf %597, %546 : vector<8x128xf32>
    %599 = arith.addf %596, %598 : vector<8x128xf32>
    %600 = vector.broadcast %135 : f32 to vector<8x128xf32>
    %601 = arith.mulf %600, %547 : vector<8x128xf32>
    %602 = arith.addf %599, %601 : vector<8x128xf32>
    %603 = vector.broadcast %174 : f32 to vector<8x128xf32>
    %604 = arith.addf %602, %603 : vector<8x128xf32>
    %605 = vector.broadcast %136 : f32 to vector<8x128xf32>
    %606 = arith.mulf %605, %542 : vector<8x128xf32>
    %607 = vector.broadcast %137 : f32 to vector<8x128xf32>
    %608 = arith.mulf %607, %543 : vector<8x128xf32>
    %609 = arith.addf %606, %608 : vector<8x128xf32>
    %610 = vector.broadcast %138 : f32 to vector<8x128xf32>
    %611 = arith.mulf %610, %544 : vector<8x128xf32>
    %612 = arith.addf %609, %611 : vector<8x128xf32>
    %613 = vector.broadcast %139 : f32 to vector<8x128xf32>
    %614 = arith.mulf %613, %545 : vector<8x128xf32>
    %615 = arith.addf %612, %614 : vector<8x128xf32>
    %616 = vector.broadcast %140 : f32 to vector<8x128xf32>
    %617 = arith.mulf %616, %546 : vector<8x128xf32>
    %618 = arith.addf %615, %617 : vector<8x128xf32>
    %619 = vector.broadcast %141 : f32 to vector<8x128xf32>
    %620 = arith.mulf %619, %547 : vector<8x128xf32>
    %621 = arith.addf %618, %620 : vector<8x128xf32>
    %622 = vector.broadcast %175 : f32 to vector<8x128xf32>
    %623 = arith.addf %621, %622 : vector<8x128xf32>
    %624 = vector.broadcast %142 : f32 to vector<8x128xf32>
    %625 = arith.mulf %624, %542 : vector<8x128xf32>
    %626 = vector.broadcast %143 : f32 to vector<8x128xf32>
    %627 = arith.mulf %626, %543 : vector<8x128xf32>
    %628 = arith.addf %625, %627 : vector<8x128xf32>
    %629 = vector.broadcast %144 : f32 to vector<8x128xf32>
    %630 = arith.mulf %629, %544 : vector<8x128xf32>
    %631 = arith.addf %628, %630 : vector<8x128xf32>
    %632 = vector.broadcast %145 : f32 to vector<8x128xf32>
    %633 = arith.mulf %632, %545 : vector<8x128xf32>
    %634 = arith.addf %631, %633 : vector<8x128xf32>
    %635 = vector.broadcast %146 : f32 to vector<8x128xf32>
    %636 = arith.mulf %635, %546 : vector<8x128xf32>
    %637 = arith.addf %634, %636 : vector<8x128xf32>
    %638 = vector.broadcast %147 : f32 to vector<8x128xf32>
    %639 = arith.mulf %638, %547 : vector<8x128xf32>
    %640 = arith.addf %637, %639 : vector<8x128xf32>
    %641 = vector.broadcast %176 : f32 to vector<8x128xf32>
    %642 = arith.addf %640, %641 : vector<8x128xf32>
    %643 = vector.broadcast %148 : f32 to vector<8x128xf32>
    %644 = arith.mulf %643, %542 : vector<8x128xf32>
    %645 = vector.broadcast %149 : f32 to vector<8x128xf32>
    %646 = arith.mulf %645, %543 : vector<8x128xf32>
    %647 = arith.addf %644, %646 : vector<8x128xf32>
    %648 = vector.broadcast %150 : f32 to vector<8x128xf32>
    %649 = arith.mulf %648, %544 : vector<8x128xf32>
    %650 = arith.addf %647, %649 : vector<8x128xf32>
    %651 = vector.broadcast %151 : f32 to vector<8x128xf32>
    %652 = arith.mulf %651, %545 : vector<8x128xf32>
    %653 = arith.addf %650, %652 : vector<8x128xf32>
    %654 = vector.broadcast %152 : f32 to vector<8x128xf32>
    %655 = arith.mulf %654, %546 : vector<8x128xf32>
    %656 = arith.addf %653, %655 : vector<8x128xf32>
    %657 = vector.broadcast %153 : f32 to vector<8x128xf32>
    %658 = arith.mulf %657, %547 : vector<8x128xf32>
    %659 = arith.addf %656, %658 : vector<8x128xf32>
    %660 = vector.broadcast %177 : f32 to vector<8x128xf32>
    %661 = arith.addf %659, %660 : vector<8x128xf32>
    %662 = vector.broadcast %154 : f32 to vector<8x128xf32>
    %663 = arith.mulf %662, %542 : vector<8x128xf32>
    %664 = vector.broadcast %155 : f32 to vector<8x128xf32>
    %665 = arith.mulf %664, %543 : vector<8x128xf32>
    %666 = arith.addf %663, %665 : vector<8x128xf32>
    %667 = vector.broadcast %156 : f32 to vector<8x128xf32>
    %668 = arith.mulf %667, %544 : vector<8x128xf32>
    %669 = arith.addf %666, %668 : vector<8x128xf32>
    %670 = vector.broadcast %157 : f32 to vector<8x128xf32>
    %671 = arith.mulf %670, %545 : vector<8x128xf32>
    %672 = arith.addf %669, %671 : vector<8x128xf32>
    %673 = vector.broadcast %158 : f32 to vector<8x128xf32>
    %674 = arith.mulf %673, %546 : vector<8x128xf32>
    %675 = arith.addf %672, %674 : vector<8x128xf32>
    %676 = vector.broadcast %159 : f32 to vector<8x128xf32>
    %677 = arith.mulf %676, %547 : vector<8x128xf32>
    %678 = arith.addf %675, %677 : vector<8x128xf32>
    %679 = vector.broadcast %178 : f32 to vector<8x128xf32>
    %680 = arith.addf %678, %679 : vector<8x128xf32>
    %681 = vector.broadcast %160 : f32 to vector<8x128xf32>
    %682 = arith.mulf %681, %542 : vector<8x128xf32>
    %683 = vector.broadcast %161 : f32 to vector<8x128xf32>
    %684 = arith.mulf %683, %543 : vector<8x128xf32>
    %685 = arith.addf %682, %684 : vector<8x128xf32>
    %686 = vector.broadcast %162 : f32 to vector<8x128xf32>
    %687 = arith.mulf %686, %544 : vector<8x128xf32>
    %688 = arith.addf %685, %687 : vector<8x128xf32>
    %689 = vector.broadcast %163 : f32 to vector<8x128xf32>
    %690 = arith.mulf %689, %545 : vector<8x128xf32>
    %691 = arith.addf %688, %690 : vector<8x128xf32>
    %692 = vector.broadcast %164 : f32 to vector<8x128xf32>
    %693 = arith.mulf %692, %546 : vector<8x128xf32>
    %694 = arith.addf %691, %693 : vector<8x128xf32>
    %695 = vector.broadcast %165 : f32 to vector<8x128xf32>
    %696 = arith.mulf %695, %547 : vector<8x128xf32>
    %697 = arith.addf %694, %696 : vector<8x128xf32>
    %698 = vector.broadcast %179 : f32 to vector<8x128xf32>
    %699 = arith.addf %697, %698 : vector<8x128xf32>
    %700 = vector.broadcast %166 : f32 to vector<8x128xf32>
    %701 = arith.mulf %700, %542 : vector<8x128xf32>
    %702 = vector.broadcast %167 : f32 to vector<8x128xf32>
    %703 = arith.mulf %702, %543 : vector<8x128xf32>
    %704 = arith.addf %701, %703 : vector<8x128xf32>
    %705 = vector.broadcast %168 : f32 to vector<8x128xf32>
    %706 = arith.mulf %705, %544 : vector<8x128xf32>
    %707 = arith.addf %704, %706 : vector<8x128xf32>
    %708 = vector.broadcast %169 : f32 to vector<8x128xf32>
    %709 = arith.mulf %708, %545 : vector<8x128xf32>
    %710 = arith.addf %707, %709 : vector<8x128xf32>
    %711 = vector.broadcast %170 : f32 to vector<8x128xf32>
    %712 = arith.mulf %711, %546 : vector<8x128xf32>
    %713 = arith.addf %710, %712 : vector<8x128xf32>
    %714 = vector.broadcast %171 : f32 to vector<8x128xf32>
    %715 = arith.mulf %714, %547 : vector<8x128xf32>
    %716 = arith.addf %713, %715 : vector<8x128xf32>
    %717 = vector.broadcast %180 : f32 to vector<8x128xf32>
    %718 = arith.addf %716, %717 : vector<8x128xf32>
    %c0_145 = arith.constant 0 : index
    %719 = arith.index_cast %182 : i32 to index
    %c0_146 = arith.constant 0 : index
    %720 = vector.load %arg10[%c0_145, %719, %c0_146] : memref<9x16x128xf32, #tpu.memory_space<vmem>>, vector<1x8x128xf32>
    %721 = vector.shape_cast %720 : vector<1x8x128xf32> to vector<8x128xf32>
    %722 = vector.shape_cast %566 : vector<8x128xf32> to vector<1x8x128xf32>
    tpu.vector_store %arg10[%c0_145, %719, %c0_146], %722 {strides = array<i32>} : memref<9x16x128xf32, #tpu.memory_space<vmem>>, vector<1x8x128xf32>,
    %c1_147 = arith.constant 1 : index
    %723 = arith.index_cast %182 : i32 to index
    %c0_148 = arith.constant 0 : index
    %724 = vector.load %arg10[%c1_147, %723, %c0_148] : memref<9x16x128xf32, #tpu.memory_space<vmem>>, vector<1x8x128xf32>
    %725 = vector.shape_cast %724 : vector<1x8x128xf32> to vector<8x128xf32>
    %726 = vector.shape_cast %585 : vector<8x128xf32> to vector<1x8x128xf32>
    tpu.vector_store %arg10[%c1_147, %723, %c0_148], %726 {strides = array<i32>} : memref<9x16x128xf32, #tpu.memory_space<vmem>>, vector<1x8x128xf32>,
    %c2_149 = arith.constant 2 : index
    %727 = arith.index_cast %182 : i32 to index
    %c0_150 = arith.constant 0 : index
    %728 = vector.load %arg10[%c2_149, %727, %c0_150] : memref<9x16x128xf32, #tpu.memory_space<vmem>>, vector<1x8x128xf32>
    %729 = vector.shape_cast %728 : vector<1x8x128xf32> to vector<8x128xf32>
    %730 = vector.shape_cast %604 : vector<8x128xf32> to vector<1x8x128xf32>
    tpu.vector_store %arg10[%c2_149, %727, %c0_150], %730 {strides = array<i32>} : memref<9x16x128xf32, #tpu.memory_space<vmem>>, vector<1x8x128xf32>,
    %c3_151 = arith.constant 3 : index
    %731 = arith.index_cast %182 : i32 to index
    %c0_152 = arith.constant 0 : index
    %732 = vector.load %arg10[%c3_151, %731, %c0_152] : memref<9x16x128xf32, #tpu.memory_space<vmem>>, vector<1x8x128xf32>
    %733 = vector.shape_cast %732 : vector<1x8x128xf32> to vector<8x128xf32>
    %734 = vector.shape_cast %623 : vector<8x128xf32> to vector<1x8x128xf32>
    tpu.vector_store %arg10[%c3_151, %731, %c0_152], %734 {strides = array<i32>} : memref<9x16x128xf32, #tpu.memory_space<vmem>>, vector<1x8x128xf32>,
    %c4_153 = arith.constant 4 : index
    %735 = arith.index_cast %182 : i32 to index
    %c0_154 = arith.constant 0 : index
    %736 = vector.load %arg10[%c4_153, %735, %c0_154] : memref<9x16x128xf32, #tpu.memory_space<vmem>>, vector<1x8x128xf32>
    %737 = vector.shape_cast %736 : vector<1x8x128xf32> to vector<8x128xf32>
    %738 = vector.shape_cast %642 : vector<8x128xf32> to vector<1x8x128xf32>
    tpu.vector_store %arg10[%c4_153, %735, %c0_154], %738 {strides = array<i32>} : memref<9x16x128xf32, #tpu.memory_space<vmem>>, vector<1x8x128xf32>,
    %c5_155 = arith.constant 5 : index
    %739 = arith.index_cast %182 : i32 to index
    %c0_156 = arith.constant 0 : index
    %740 = vector.load %arg10[%c5_155, %739, %c0_156] : memref<9x16x128xf32, #tpu.memory_space<vmem>>, vector<1x8x128xf32>
    %741 = vector.shape_cast %740 : vector<1x8x128xf32> to vector<8x128xf32>
    %742 = vector.shape_cast %661 : vector<8x128xf32> to vector<1x8x128xf32>
    tpu.vector_store %arg10[%c5_155, %739, %c0_156], %742 {strides = array<i32>} : memref<9x16x128xf32, #tpu.memory_space<vmem>>, vector<1x8x128xf32>,
    %c6_157 = arith.constant 6 : index
    %743 = arith.index_cast %182 : i32 to index
    %c0_158 = arith.constant 0 : index
    %744 = vector.load %arg10[%c6_157, %743, %c0_158] : memref<9x16x128xf32, #tpu.memory_space<vmem>>, vector<1x8x128xf32>
    %745 = vector.shape_cast %744 : vector<1x8x128xf32> to vector<8x128xf32>
    %746 = vector.shape_cast %680 : vector<8x128xf32> to vector<1x8x128xf32>
    tpu.vector_store %arg10[%c6_157, %743, %c0_158], %746 {strides = array<i32>} : memref<9x16x128xf32, #tpu.memory_space<vmem>>, vector<1x8x128xf32>,
    %c7_159 = arith.constant 7 : index
    %747 = arith.index_cast %182 : i32 to index
    %c0_160 = arith.constant 0 : index
    %748 = vector.load %arg10[%c7_159, %747, %c0_160] : memref<9x16x128xf32, #tpu.memory_space<vmem>>, vector<1x8x128xf32>
    %749 = vector.shape_cast %748 : vector<1x8x128xf32> to vector<8x128xf32>
    %750 = vector.shape_cast %699 : vector<8x128xf32> to vector<1x8x128xf32>
    tpu.vector_store %arg10[%c7_159, %747, %c0_160], %750 {strides = array<i32>} : memref<9x16x128xf32, #tpu.memory_space<vmem>>, vector<1x8x128xf32>,
    %c8_161 = arith.constant 8 : index
    %751 = arith.index_cast %182 : i32 to index
    %c0_162 = arith.constant 0 : index
    %752 = vector.load %arg10[%c8_161, %751, %c0_162] : memref<9x16x128xf32, #tpu.memory_space<vmem>>, vector<1x8x128xf32>
    %753 = vector.shape_cast %752 : vector<1x8x128xf32> to vector<8x128xf32>
    %754 = vector.shape_cast %718 : vector<8x128xf32> to vector<1x8x128xf32>
    tpu.vector_store %arg10[%c8_161, %751, %c0_162], %754 {strides = array<i32>} : memref<9x16x128xf32, #tpu.memory_space<vmem>>, vector<1x8x128xf32>,
    %c1_i32 = arith.constant 1 : i32
    %c8_i32_163 = arith.constant 8 : i32
    %755 = arith.muli %c1_i32, %c8_i32_163 : i32
    %756 = tpu.assume_multiple %755, 8 : i32
    %c0_164 = arith.constant 0 : index
    %757 = arith.index_cast %756 : i32 to index
    %c0_165 = arith.constant 0 : index
    %758 = vector.load %arg1[%c0_164, %757, %c0_165] : memref<9x16x128xf32, #tpu.memory_space<vmem>>, vector<1x8x128xf32>
    %759 = vector.shape_cast %758 : vector<1x8x128xf32> to vector<8x128xf32>
    %c1_166 = arith.constant 1 : index
    %760 = arith.index_cast %756 : i32 to index
    %c0_167 = arith.constant 0 : index
    %761 = vector.load %arg1[%c1_166, %760, %c0_167] : memref<9x16x128xf32, #tpu.memory_space<vmem>>, vector<1x8x128xf32>
    %762 = vector.shape_cast %761 : vector<1x8x128xf32> to vector<8x128xf32>
    %c2_168 = arith.constant 2 : index
    %763 = arith.index_cast %756 : i32 to index
    %c0_169 = arith.constant 0 : index
    %764 = vector.load %arg1[%c2_168, %763, %c0_169] : memref<9x16x128xf32, #tpu.memory_space<vmem>>, vector<1x8x128xf32>
    %765 = vector.shape_cast %764 : vector<1x8x128xf32> to vector<8x128xf32>
    %c3_170 = arith.constant 3 : index
    %766 = arith.index_cast %756 : i32 to index
    %c0_171 = arith.constant 0 : index
    %767 = vector.load %arg1[%c3_170, %766, %c0_171] : memref<9x16x128xf32, #tpu.memory_space<vmem>>, vector<1x8x128xf32>
    %768 = vector.shape_cast %767 : vector<1x8x128xf32> to vector<8x128xf32>
    %c4_172 = arith.constant 4 : index
    %769 = arith.index_cast %756 : i32 to index
    %c0_173 = arith.constant 0 : index
    %770 = vector.load %arg1[%c4_172, %769, %c0_173] : memref<9x16x128xf32, #tpu.memory_space<vmem>>, vector<1x8x128xf32>
    %771 = vector.shape_cast %770 : vector<1x8x128xf32> to vector<8x128xf32>
    %c5_174 = arith.constant 5 : index
    %772 = arith.index_cast %756 : i32 to index
    %c0_175 = arith.constant 0 : index
    %773 = vector.load %arg1[%c5_174, %772, %c0_175] : memref<9x16x128xf32, #tpu.memory_space<vmem>>, vector<1x8x128xf32>
    %774 = vector.shape_cast %773 : vector<1x8x128xf32> to vector<8x128xf32>
    %c6_176 = arith.constant 6 : index
    %775 = arith.index_cast %756 : i32 to index
    %c0_177 = arith.constant 0 : index
    %776 = vector.load %arg1[%c6_176, %775, %c0_177] : memref<9x16x128xf32, #tpu.memory_space<vmem>>, vector<1x8x128xf32>
    %777 = vector.shape_cast %776 : vector<1x8x128xf32> to vector<8x128xf32>
    %c7_178 = arith.constant 7 : index
    %778 = arith.index_cast %756 : i32 to index
    %c0_179 = arith.constant 0 : index
    %779 = vector.load %arg1[%c7_178, %778, %c0_179] : memref<9x16x128xf32, #tpu.memory_space<vmem>>, vector<1x8x128xf32>
    %780 = vector.shape_cast %779 : vector<1x8x128xf32> to vector<8x128xf32>
    %c8_180 = arith.constant 8 : index
    %781 = arith.index_cast %756 : i32 to index
    %c0_181 = arith.constant 0 : index
    %782 = vector.load %arg1[%c8_180, %781, %c0_181] : memref<9x16x128xf32, #tpu.memory_space<vmem>>, vector<1x8x128xf32>
    %783 = vector.shape_cast %782 : vector<1x8x128xf32> to vector<8x128xf32>
    %784 = vector.broadcast %0 : f32 to vector<8x128xf32>
    %785 = arith.mulf %784, %759 : vector<8x128xf32>
    %786 = vector.broadcast %1 : f32 to vector<8x128xf32>
    %787 = arith.mulf %786, %762 : vector<8x128xf32>
    %788 = arith.addf %785, %787 : vector<8x128xf32>
    %789 = vector.broadcast %2 : f32 to vector<8x128xf32>
    %790 = arith.mulf %789, %765 : vector<8x128xf32>
    %791 = arith.addf %788, %790 : vector<8x128xf32>
    %792 = vector.broadcast %3 : f32 to vector<8x128xf32>
    %793 = arith.mulf %792, %768 : vector<8x128xf32>
    %794 = arith.addf %791, %793 : vector<8x128xf32>
    %795 = vector.broadcast %4 : f32 to vector<8x128xf32>
    %796 = arith.mulf %795, %771 : vector<8x128xf32>
    %797 = arith.addf %794, %796 : vector<8x128xf32>
    %798 = vector.broadcast %5 : f32 to vector<8x128xf32>
    %799 = arith.mulf %798, %774 : vector<8x128xf32>
    %800 = arith.addf %797, %799 : vector<8x128xf32>
    %801 = vector.broadcast %6 : f32 to vector<8x128xf32>
    %802 = arith.mulf %801, %777 : vector<8x128xf32>
    %803 = arith.addf %800, %802 : vector<8x128xf32>
    %804 = vector.broadcast %7 : f32 to vector<8x128xf32>
    %805 = arith.mulf %804, %780 : vector<8x128xf32>
    %806 = arith.addf %803, %805 : vector<8x128xf32>
    %807 = vector.broadcast %8 : f32 to vector<8x128xf32>
    %808 = arith.mulf %807, %783 : vector<8x128xf32>
    %809 = arith.addf %806, %808 : vector<8x128xf32>
    %810 = vector.broadcast %54 : f32 to vector<8x128xf32>
    %811 = arith.addf %809, %810 : vector<8x128xf32>
    %812 = vector.broadcast %9 : f32 to vector<8x128xf32>
    %813 = arith.mulf %812, %759 : vector<8x128xf32>
    %814 = vector.broadcast %10 : f32 to vector<8x128xf32>
    %815 = arith.mulf %814, %762 : vector<8x128xf32>
    %816 = arith.addf %813, %815 : vector<8x128xf32>
    %817 = vector.broadcast %11 : f32 to vector<8x128xf32>
    %818 = arith.mulf %817, %765 : vector<8x128xf32>
    %819 = arith.addf %816, %818 : vector<8x128xf32>
    %820 = vector.broadcast %12 : f32 to vector<8x128xf32>
    %821 = arith.mulf %820, %768 : vector<8x128xf32>
    %822 = arith.addf %819, %821 : vector<8x128xf32>
    %823 = vector.broadcast %13 : f32 to vector<8x128xf32>
    %824 = arith.mulf %823, %771 : vector<8x128xf32>
    %825 = arith.addf %822, %824 : vector<8x128xf32>
    %826 = vector.broadcast %14 : f32 to vector<8x128xf32>
    %827 = arith.mulf %826, %774 : vector<8x128xf32>
    %828 = arith.addf %825, %827 : vector<8x128xf32>
    %829 = vector.broadcast %15 : f32 to vector<8x128xf32>
    %830 = arith.mulf %829, %777 : vector<8x128xf32>
    %831 = arith.addf %828, %830 : vector<8x128xf32>
    %832 = vector.broadcast %16 : f32 to vector<8x128xf32>
    %833 = arith.mulf %832, %780 : vector<8x128xf32>
    %834 = arith.addf %831, %833 : vector<8x128xf32>
    %835 = vector.broadcast %17 : f32 to vector<8x128xf32>
    %836 = arith.mulf %835, %783 : vector<8x128xf32>
    %837 = arith.addf %834, %836 : vector<8x128xf32>
    %838 = vector.broadcast %55 : f32 to vector<8x128xf32>
    %839 = arith.addf %837, %838 : vector<8x128xf32>
    %840 = vector.broadcast %18 : f32 to vector<8x128xf32>
    %841 = arith.mulf %840, %759 : vector<8x128xf32>
    %842 = vector.broadcast %19 : f32 to vector<8x128xf32>
    %843 = arith.mulf %842, %762 : vector<8x128xf32>
    %844 = arith.addf %841, %843 : vector<8x128xf32>
    %845 = vector.broadcast %20 : f32 to vector<8x128xf32>
    %846 = arith.mulf %845, %765 : vector<8x128xf32>
    %847 = arith.addf %844, %846 : vector<8x128xf32>
    %848 = vector.broadcast %21 : f32 to vector<8x128xf32>
    %849 = arith.mulf %848, %768 : vector<8x128xf32>
    %850 = arith.addf %847, %849 : vector<8x128xf32>
    %851 = vector.broadcast %22 : f32 to vector<8x128xf32>
    %852 = arith.mulf %851, %771 : vector<8x128xf32>
    %853 = arith.addf %850, %852 : vector<8x128xf32>
    %854 = vector.broadcast %23 : f32 to vector<8x128xf32>
    %855 = arith.mulf %854, %774 : vector<8x128xf32>
    %856 = arith.addf %853, %855 : vector<8x128xf32>
    %857 = vector.broadcast %24 : f32 to vector<8x128xf32>
    %858 = arith.mulf %857, %777 : vector<8x128xf32>
    %859 = arith.addf %856, %858 : vector<8x128xf32>
    %860 = vector.broadcast %25 : f32 to vector<8x128xf32>
    %861 = arith.mulf %860, %780 : vector<8x128xf32>
    %862 = arith.addf %859, %861 : vector<8x128xf32>
    %863 = vector.broadcast %26 : f32 to vector<8x128xf32>
    %864 = arith.mulf %863, %783 : vector<8x128xf32>
    %865 = arith.addf %862, %864 : vector<8x128xf32>
    %866 = vector.broadcast %56 : f32 to vector<8x128xf32>
    %867 = arith.addf %865, %866 : vector<8x128xf32>
    %868 = vector.broadcast %27 : f32 to vector<8x128xf32>
    %869 = arith.mulf %868, %759 : vector<8x128xf32>
    %870 = vector.broadcast %28 : f32 to vector<8x128xf32>
    %871 = arith.mulf %870, %762 : vector<8x128xf32>
    %872 = arith.addf %869, %871 : vector<8x128xf32>
    %873 = vector.broadcast %29 : f32 to vector<8x128xf32>
    %874 = arith.mulf %873, %765 : vector<8x128xf32>
    %875 = arith.addf %872, %874 : vector<8x128xf32>
    %876 = vector.broadcast %30 : f32 to vector<8x128xf32>
    %877 = arith.mulf %876, %768 : vector<8x128xf32>
    %878 = arith.addf %875, %877 : vector<8x128xf32>
    %879 = vector.broadcast %31 : f32 to vector<8x128xf32>
    %880 = arith.mulf %879, %771 : vector<8x128xf32>
    %881 = arith.addf %878, %880 : vector<8x128xf32>
    %882 = vector.broadcast %32 : f32 to vector<8x128xf32>
    %883 = arith.mulf %882, %774 : vector<8x128xf32>
    %884 = arith.addf %881, %883 : vector<8x128xf32>
    %885 = vector.broadcast %33 : f32 to vector<8x128xf32>
    %886 = arith.mulf %885, %777 : vector<8x128xf32>
    %887 = arith.addf %884, %886 : vector<8x128xf32>
    %888 = vector.broadcast %34 : f32 to vector<8x128xf32>
    %889 = arith.mulf %888, %780 : vector<8x128xf32>
    %890 = arith.addf %887, %889 : vector<8x128xf32>
    %891 = vector.broadcast %35 : f32 to vector<8x128xf32>
    %892 = arith.mulf %891, %783 : vector<8x128xf32>
    %893 = arith.addf %890, %892 : vector<8x128xf32>
    %894 = vector.broadcast %57 : f32 to vector<8x128xf32>
    %895 = arith.addf %893, %894 : vector<8x128xf32>
    %896 = vector.broadcast %36 : f32 to vector<8x128xf32>
    %897 = arith.mulf %896, %759 : vector<8x128xf32>
    %898 = vector.broadcast %37 : f32 to vector<8x128xf32>
    %899 = arith.mulf %898, %762 : vector<8x128xf32>
    %900 = arith.addf %897, %899 : vector<8x128xf32>
    %901 = vector.broadcast %38 : f32 to vector<8x128xf32>
    %902 = arith.mulf %901, %765 : vector<8x128xf32>
    %903 = arith.addf %900, %902 : vector<8x128xf32>
    %904 = vector.broadcast %39 : f32 to vector<8x128xf32>
    %905 = arith.mulf %904, %768 : vector<8x128xf32>
    %906 = arith.addf %903, %905 : vector<8x128xf32>
    %907 = vector.broadcast %40 : f32 to vector<8x128xf32>
    %908 = arith.mulf %907, %771 : vector<8x128xf32>
    %909 = arith.addf %906, %908 : vector<8x128xf32>
    %910 = vector.broadcast %41 : f32 to vector<8x128xf32>
    %911 = arith.mulf %910, %774 : vector<8x128xf32>
    %912 = arith.addf %909, %911 : vector<8x128xf32>
    %913 = vector.broadcast %42 : f32 to vector<8x128xf32>
    %914 = arith.mulf %913, %777 : vector<8x128xf32>
    %915 = arith.addf %912, %914 : vector<8x128xf32>
    %916 = vector.broadcast %43 : f32 to vector<8x128xf32>
    %917 = arith.mulf %916, %780 : vector<8x128xf32>
    %918 = arith.addf %915, %917 : vector<8x128xf32>
    %919 = vector.broadcast %44 : f32 to vector<8x128xf32>
    %920 = arith.mulf %919, %783 : vector<8x128xf32>
    %921 = arith.addf %918, %920 : vector<8x128xf32>
    %922 = vector.broadcast %58 : f32 to vector<8x128xf32>
    %923 = arith.addf %921, %922 : vector<8x128xf32>
    %924 = vector.broadcast %45 : f32 to vector<8x128xf32>
    %925 = arith.mulf %924, %759 : vector<8x128xf32>
    %926 = vector.broadcast %46 : f32 to vector<8x128xf32>
    %927 = arith.mulf %926, %762 : vector<8x128xf32>
    %928 = arith.addf %925, %927 : vector<8x128xf32>
    %929 = vector.broadcast %47 : f32 to vector<8x128xf32>
    %930 = arith.mulf %929, %765 : vector<8x128xf32>
    %931 = arith.addf %928, %930 : vector<8x128xf32>
    %932 = vector.broadcast %48 : f32 to vector<8x128xf32>
    %933 = arith.mulf %932, %768 : vector<8x128xf32>
    %934 = arith.addf %931, %933 : vector<8x128xf32>
    %935 = vector.broadcast %49 : f32 to vector<8x128xf32>
    %936 = arith.mulf %935, %771 : vector<8x128xf32>
    %937 = arith.addf %934, %936 : vector<8x128xf32>
    %938 = vector.broadcast %50 : f32 to vector<8x128xf32>
    %939 = arith.mulf %938, %774 : vector<8x128xf32>
    %940 = arith.addf %937, %939 : vector<8x128xf32>
    %941 = vector.broadcast %51 : f32 to vector<8x128xf32>
    %942 = arith.mulf %941, %777 : vector<8x128xf32>
    %943 = arith.addf %940, %942 : vector<8x128xf32>
    %944 = vector.broadcast %52 : f32 to vector<8x128xf32>
    %945 = arith.mulf %944, %780 : vector<8x128xf32>
    %946 = arith.addf %943, %945 : vector<8x128xf32>
    %947 = vector.broadcast %53 : f32 to vector<8x128xf32>
    %948 = arith.mulf %947, %783 : vector<8x128xf32>
    %949 = arith.addf %946, %948 : vector<8x128xf32>
    %950 = vector.broadcast %59 : f32 to vector<8x128xf32>
    %951 = arith.addf %949, %950 : vector<8x128xf32>
    %952 = math.tanh %811 : vector<8x128xf32>
    %953 = math.tanh %839 : vector<8x128xf32>
    %954 = math.tanh %867 : vector<8x128xf32>
    %955 = math.tanh %895 : vector<8x128xf32>
    %956 = math.tanh %923 : vector<8x128xf32>
    %957 = math.tanh %951 : vector<8x128xf32>
    %958 = vector.broadcast %60 : f32 to vector<8x128xf32>
    %959 = arith.mulf %958, %952 : vector<8x128xf32>
    %960 = vector.broadcast %61 : f32 to vector<8x128xf32>
    %961 = arith.mulf %960, %953 : vector<8x128xf32>
    %962 = arith.addf %959, %961 : vector<8x128xf32>
    %963 = vector.broadcast %62 : f32 to vector<8x128xf32>
    %964 = arith.mulf %963, %954 : vector<8x128xf32>
    %965 = arith.addf %962, %964 : vector<8x128xf32>
    %966 = vector.broadcast %63 : f32 to vector<8x128xf32>
    %967 = arith.mulf %966, %955 : vector<8x128xf32>
    %968 = arith.addf %965, %967 : vector<8x128xf32>
    %969 = vector.broadcast %64 : f32 to vector<8x128xf32>
    %970 = arith.mulf %969, %956 : vector<8x128xf32>
    %971 = arith.addf %968, %970 : vector<8x128xf32>
    %972 = vector.broadcast %65 : f32 to vector<8x128xf32>
    %973 = arith.mulf %972, %957 : vector<8x128xf32>
    %974 = arith.addf %971, %973 : vector<8x128xf32>
    %975 = vector.broadcast %84 : f32 to vector<8x128xf32>
    %976 = arith.addf %974, %975 : vector<8x128xf32>
    %977 = vector.broadcast %66 : f32 to vector<8x128xf32>
    %978 = arith.mulf %977, %952 : vector<8x128xf32>
    %979 = vector.broadcast %67 : f32 to vector<8x128xf32>
    %980 = arith.mulf %979, %953 : vector<8x128xf32>
    %981 = arith.addf %978, %980 : vector<8x128xf32>
    %982 = vector.broadcast %68 : f32 to vector<8x128xf32>
    %983 = arith.mulf %982, %954 : vector<8x128xf32>
    %984 = arith.addf %981, %983 : vector<8x128xf32>
    %985 = vector.broadcast %69 : f32 to vector<8x128xf32>
    %986 = arith.mulf %985, %955 : vector<8x128xf32>
    %987 = arith.addf %984, %986 : vector<8x128xf32>
    %988 = vector.broadcast %70 : f32 to vector<8x128xf32>
    %989 = arith.mulf %988, %956 : vector<8x128xf32>
    %990 = arith.addf %987, %989 : vector<8x128xf32>
    %991 = vector.broadcast %71 : f32 to vector<8x128xf32>
    %992 = arith.mulf %991, %957 : vector<8x128xf32>
    %993 = arith.addf %990, %992 : vector<8x128xf32>
    %994 = vector.broadcast %85 : f32 to vector<8x128xf32>
    %995 = arith.addf %993, %994 : vector<8x128xf32>
    %996 = vector.broadcast %72 : f32 to vector<8x128xf32>
    %997 = arith.mulf %996, %952 : vector<8x128xf32>
    %998 = vector.broadcast %73 : f32 to vector<8x128xf32>
    %999 = arith.mulf %998, %953 : vector<8x128xf32>
    %1000 = arith.addf %997, %999 : vector<8x128xf32>
    %1001 = vector.broadcast %74 : f32 to vector<8x128xf32>
    %1002 = arith.mulf %1001, %954 : vector<8x128xf32>
    %1003 = arith.addf %1000, %1002 : vector<8x128xf32>
    %1004 = vector.broadcast %75 : f32 to vector<8x128xf32>
    %1005 = arith.mulf %1004, %955 : vector<8x128xf32>
    %1006 = arith.addf %1003, %1005 : vector<8x128xf32>
    %1007 = vector.broadcast %76 : f32 to vector<8x128xf32>
    %1008 = arith.mulf %1007, %956 : vector<8x128xf32>
    %1009 = arith.addf %1006, %1008 : vector<8x128xf32>
    %1010 = vector.broadcast %77 : f32 to vector<8x128xf32>
    %1011 = arith.mulf %1010, %957 : vector<8x128xf32>
    %1012 = arith.addf %1009, %1011 : vector<8x128xf32>
    %1013 = vector.broadcast %86 : f32 to vector<8x128xf32>
    %1014 = arith.addf %1012, %1013 : vector<8x128xf32>
    %1015 = vector.broadcast %78 : f32 to vector<8x128xf32>
    %1016 = arith.mulf %1015, %952 : vector<8x128xf32>
    %1017 = vector.broadcast %79 : f32 to vector<8x128xf32>
    %1018 = arith.mulf %1017, %953 : vector<8x128xf32>
    %1019 = arith.addf %1016, %1018 : vector<8x128xf32>
    %1020 = vector.broadcast %80 : f32 to vector<8x128xf32>
    %1021 = arith.mulf %1020, %954 : vector<8x128xf32>
    %1022 = arith.addf %1019, %1021 : vector<8x128xf32>
    %1023 = vector.broadcast %81 : f32 to vector<8x128xf32>
    %1024 = arith.mulf %1023, %955 : vector<8x128xf32>
    %1025 = arith.addf %1022, %1024 : vector<8x128xf32>
    %1026 = vector.broadcast %82 : f32 to vector<8x128xf32>
    %1027 = arith.mulf %1026, %956 : vector<8x128xf32>
    %1028 = arith.addf %1025, %1027 : vector<8x128xf32>
    %1029 = vector.broadcast %83 : f32 to vector<8x128xf32>
    %1030 = arith.mulf %1029, %957 : vector<8x128xf32>
    %1031 = arith.addf %1028, %1030 : vector<8x128xf32>
    %1032 = vector.broadcast %87 : f32 to vector<8x128xf32>
    %1033 = arith.addf %1031, %1032 : vector<8x128xf32>
    %1034 = math.tanh %976 : vector<8x128xf32>
    %1035 = math.tanh %995 : vector<8x128xf32>
    %1036 = math.tanh %1014 : vector<8x128xf32>
    %1037 = math.tanh %1033 : vector<8x128xf32>
    %1038 = vector.broadcast %88 : f32 to vector<8x128xf32>
    %1039 = arith.mulf %1038, %1034 : vector<8x128xf32>
    %1040 = vector.broadcast %89 : f32 to vector<8x128xf32>
    %1041 = arith.mulf %1040, %1035 : vector<8x128xf32>
    %1042 = arith.addf %1039, %1041 : vector<8x128xf32>
    %1043 = vector.broadcast %90 : f32 to vector<8x128xf32>
    %1044 = arith.mulf %1043, %1036 : vector<8x128xf32>
    %1045 = arith.addf %1042, %1044 : vector<8x128xf32>
    %1046 = vector.broadcast %91 : f32 to vector<8x128xf32>
    %1047 = arith.mulf %1046, %1037 : vector<8x128xf32>
    %1048 = arith.addf %1045, %1047 : vector<8x128xf32>
    %1049 = vector.broadcast %112 : f32 to vector<8x128xf32>
    %1050 = arith.addf %1048, %1049 : vector<8x128xf32>
    %1051 = vector.broadcast %92 : f32 to vector<8x128xf32>
    %1052 = arith.mulf %1051, %1034 : vector<8x128xf32>
    %1053 = vector.broadcast %93 : f32 to vector<8x128xf32>
    %1054 = arith.mulf %1053, %1035 : vector<8x128xf32>
    %1055 = arith.addf %1052, %1054 : vector<8x128xf32>
    %1056 = vector.broadcast %94 : f32 to vector<8x128xf32>
    %1057 = arith.mulf %1056, %1036 : vector<8x128xf32>
    %1058 = arith.addf %1055, %1057 : vector<8x128xf32>
    %1059 = vector.broadcast %95 : f32 to vector<8x128xf32>
    %1060 = arith.mulf %1059, %1037 : vector<8x128xf32>
    %1061 = arith.addf %1058, %1060 : vector<8x128xf32>
    %1062 = vector.broadcast %113 : f32 to vector<8x128xf32>
    %1063 = arith.addf %1061, %1062 : vector<8x128xf32>
    %1064 = vector.broadcast %96 : f32 to vector<8x128xf32>
    %1065 = arith.mulf %1064, %1034 : vector<8x128xf32>
    %1066 = vector.broadcast %97 : f32 to vector<8x128xf32>
    %1067 = arith.mulf %1066, %1035 : vector<8x128xf32>
    %1068 = arith.addf %1065, %1067 : vector<8x128xf32>
    %1069 = vector.broadcast %98 : f32 to vector<8x128xf32>
    %1070 = arith.mulf %1069, %1036 : vector<8x128xf32>
    %1071 = arith.addf %1068, %1070 : vector<8x128xf32>
    %1072 = vector.broadcast %99 : f32 to vector<8x128xf32>
    %1073 = arith.mulf %1072, %1037 : vector<8x128xf32>
    %1074 = arith.addf %1071, %1073 : vector<8x128xf32>
    %1075 = vector.broadcast %114 : f32 to vector<8x128xf32>
    %1076 = arith.addf %1074, %1075 : vector<8x128xf32>
    %1077 = vector.broadcast %100 : f32 to vector<8x128xf32>
    %1078 = arith.mulf %1077, %1034 : vector<8x128xf32>
    %1079 = vector.broadcast %101 : f32 to vector<8x128xf32>
    %1080 = arith.mulf %1079, %1035 : vector<8x128xf32>
    %1081 = arith.addf %1078, %1080 : vector<8x128xf32>
    %1082 = vector.broadcast %102 : f32 to vector<8x128xf32>
    %1083 = arith.mulf %1082, %1036 : vector<8x128xf32>
    %1084 = arith.addf %1081, %1083 : vector<8x128xf32>
    %1085 = vector.broadcast %103 : f32 to vector<8x128xf32>
    %1086 = arith.mulf %1085, %1037 : vector<8x128xf32>
    %1087 = arith.addf %1084, %1086 : vector<8x128xf32>
    %1088 = vector.broadcast %115 : f32 to vector<8x128xf32>
    %1089 = arith.addf %1087, %1088 : vector<8x128xf32>
    %1090 = vector.broadcast %104 : f32 to vector<8x128xf32>
    %1091 = arith.mulf %1090, %1034 : vector<8x128xf32>
    %1092 = vector.broadcast %105 : f32 to vector<8x128xf32>
    %1093 = arith.mulf %1092, %1035 : vector<8x128xf32>
    %1094 = arith.addf %1091, %1093 : vector<8x128xf32>
    %1095 = vector.broadcast %106 : f32 to vector<8x128xf32>
    %1096 = arith.mulf %1095, %1036 : vector<8x128xf32>
    %1097 = arith.addf %1094, %1096 : vector<8x128xf32>
    %1098 = vector.broadcast %107 : f32 to vector<8x128xf32>
    %1099 = arith.mulf %1098, %1037 : vector<8x128xf32>
    %1100 = arith.addf %1097, %1099 : vector<8x128xf32>
    %1101 = vector.broadcast %116 : f32 to vector<8x128xf32>
    %1102 = arith.addf %1100, %1101 : vector<8x128xf32>
    %1103 = vector.broadcast %108 : f32 to vector<8x128xf32>
    %1104 = arith.mulf %1103, %1034 : vector<8x128xf32>
    %1105 = vector.broadcast %109 : f32 to vector<8x128xf32>
    %1106 = arith.mulf %1105, %1035 : vector<8x128xf32>
    %1107 = arith.addf %1104, %1106 : vector<8x128xf32>
    %1108 = vector.broadcast %110 : f32 to vector<8x128xf32>
    %1109 = arith.mulf %1108, %1036 : vector<8x128xf32>
    %1110 = arith.addf %1107, %1109 : vector<8x128xf32>
    %1111 = vector.broadcast %111 : f32 to vector<8x128xf32>
    %1112 = arith.mulf %1111, %1037 : vector<8x128xf32>
    %1113 = arith.addf %1110, %1112 : vector<8x128xf32>
    %1114 = vector.broadcast %117 : f32 to vector<8x128xf32>
    %1115 = arith.addf %1113, %1114 : vector<8x128xf32>
    %1116 = math.tanh %1050 : vector<8x128xf32>
    %1117 = math.tanh %1063 : vector<8x128xf32>
    %1118 = math.tanh %1076 : vector<8x128xf32>
    %1119 = math.tanh %1089 : vector<8x128xf32>
    %1120 = math.tanh %1102 : vector<8x128xf32>
    %1121 = math.tanh %1115 : vector<8x128xf32>
    %1122 = vector.broadcast %118 : f32 to vector<8x128xf32>
    %1123 = arith.mulf %1122, %1116 : vector<8x128xf32>
    %1124 = vector.broadcast %119 : f32 to vector<8x128xf32>
    %1125 = arith.mulf %1124, %1117 : vector<8x128xf32>
    %1126 = arith.addf %1123, %1125 : vector<8x128xf32>
    %1127 = vector.broadcast %120 : f32 to vector<8x128xf32>
    %1128 = arith.mulf %1127, %1118 : vector<8x128xf32>
    %1129 = arith.addf %1126, %1128 : vector<8x128xf32>
    %1130 = vector.broadcast %121 : f32 to vector<8x128xf32>
    %1131 = arith.mulf %1130, %1119 : vector<8x128xf32>
    %1132 = arith.addf %1129, %1131 : vector<8x128xf32>
    %1133 = vector.broadcast %122 : f32 to vector<8x128xf32>
    %1134 = arith.mulf %1133, %1120 : vector<8x128xf32>
    %1135 = arith.addf %1132, %1134 : vector<8x128xf32>
    %1136 = vector.broadcast %123 : f32 to vector<8x128xf32>
    %1137 = arith.mulf %1136, %1121 : vector<8x128xf32>
    %1138 = arith.addf %1135, %1137 : vector<8x128xf32>
    %1139 = vector.broadcast %172 : f32 to vector<8x128xf32>
    %1140 = arith.addf %1138, %1139 : vector<8x128xf32>
    %1141 = vector.broadcast %124 : f32 to vector<8x128xf32>
    %1142 = arith.mulf %1141, %1116 : vector<8x128xf32>
    %1143 = vector.broadcast %125 : f32 to vector<8x128xf32>
    %1144 = arith.mulf %1143, %1117 : vector<8x128xf32>
    %1145 = arith.addf %1142, %1144 : vector<8x128xf32>
    %1146 = vector.broadcast %126 : f32 to vector<8x128xf32>
    %1147 = arith.mulf %1146, %1118 : vector<8x128xf32>
    %1148 = arith.addf %1145, %1147 : vector<8x128xf32>
    %1149 = vector.broadcast %127 : f32 to vector<8x128xf32>
    %1150 = arith.mulf %1149, %1119 : vector<8x128xf32>
    %1151 = arith.addf %1148, %1150 : vector<8x128xf32>
    %1152 = vector.broadcast %128 : f32 to vector<8x128xf32>
    %1153 = arith.mulf %1152, %1120 : vector<8x128xf32>
    %1154 = arith.addf %1151, %1153 : vector<8x128xf32>
    %1155 = vector.broadcast %129 : f32 to vector<8x128xf32>
    %1156 = arith.mulf %1155, %1121 : vector<8x128xf32>
    %1157 = arith.addf %1154, %1156 : vector<8x128xf32>
    %1158 = vector.broadcast %173 : f32 to vector<8x128xf32>
    %1159 = arith.addf %1157, %1158 : vector<8x128xf32>
    %1160 = vector.broadcast %130 : f32 to vector<8x128xf32>
    %1161 = arith.mulf %1160, %1116 : vector<8x128xf32>
    %1162 = vector.broadcast %131 : f32 to vector<8x128xf32>
    %1163 = arith.mulf %1162, %1117 : vector<8x128xf32>
    %1164 = arith.addf %1161, %1163 : vector<8x128xf32>
    %1165 = vector.broadcast %132 : f32 to vector<8x128xf32>
    %1166 = arith.mulf %1165, %1118 : vector<8x128xf32>
    %1167 = arith.addf %1164, %1166 : vector<8x128xf32>
    %1168 = vector.broadcast %133 : f32 to vector<8x128xf32>
    %1169 = arith.mulf %1168, %1119 : vector<8x128xf32>
    %1170 = arith.addf %1167, %1169 : vector<8x128xf32>
    %1171 = vector.broadcast %134 : f32 to vector<8x128xf32>
    %1172 = arith.mulf %1171, %1120 : vector<8x128xf32>
    %1173 = arith.addf %1170, %1172 : vector<8x128xf32>
    %1174 = vector.broadcast %135 : f32 to vector<8x128xf32>
    %1175 = arith.mulf %1174, %1121 : vector<8x128xf32>
    %1176 = arith.addf %1173, %1175 : vector<8x128xf32>
    %1177 = vector.broadcast %174 : f32 to vector<8x128xf32>
    %1178 = arith.addf %1176, %1177 : vector<8x128xf32>
    %1179 = vector.broadcast %136 : f32 to vector<8x128xf32>
    %1180 = arith.mulf %1179, %1116 : vector<8x128xf32>
    %1181 = vector.broadcast %137 : f32 to vector<8x128xf32>
    %1182 = arith.mulf %1181, %1117 : vector<8x128xf32>
    %1183 = arith.addf %1180, %1182 : vector<8x128xf32>
    %1184 = vector.broadcast %138 : f32 to vector<8x128xf32>
    %1185 = arith.mulf %1184, %1118 : vector<8x128xf32>
    %1186 = arith.addf %1183, %1185 : vector<8x128xf32>
    %1187 = vector.broadcast %139 : f32 to vector<8x128xf32>
    %1188 = arith.mulf %1187, %1119 : vector<8x128xf32>
    %1189 = arith.addf %1186, %1188 : vector<8x128xf32>
    %1190 = vector.broadcast %140 : f32 to vector<8x128xf32>
    %1191 = arith.mulf %1190, %1120 : vector<8x128xf32>
    %1192 = arith.addf %1189, %1191 : vector<8x128xf32>
    %1193 = vector.broadcast %141 : f32 to vector<8x128xf32>
    %1194 = arith.mulf %1193, %1121 : vector<8x128xf32>
    %1195 = arith.addf %1192, %1194 : vector<8x128xf32>
    %1196 = vector.broadcast %175 : f32 to vector<8x128xf32>
    %1197 = arith.addf %1195, %1196 : vector<8x128xf32>
    %1198 = vector.broadcast %142 : f32 to vector<8x128xf32>
    %1199 = arith.mulf %1198, %1116 : vector<8x128xf32>
    %1200 = vector.broadcast %143 : f32 to vector<8x128xf32>
    %1201 = arith.mulf %1200, %1117 : vector<8x128xf32>
    %1202 = arith.addf %1199, %1201 : vector<8x128xf32>
    %1203 = vector.broadcast %144 : f32 to vector<8x128xf32>
    %1204 = arith.mulf %1203, %1118 : vector<8x128xf32>
    %1205 = arith.addf %1202, %1204 : vector<8x128xf32>
    %1206 = vector.broadcast %145 : f32 to vector<8x128xf32>
    %1207 = arith.mulf %1206, %1119 : vector<8x128xf32>
    %1208 = arith.addf %1205, %1207 : vector<8x128xf32>
    %1209 = vector.broadcast %146 : f32 to vector<8x128xf32>
    %1210 = arith.mulf %1209, %1120 : vector<8x128xf32>
    %1211 = arith.addf %1208, %1210 : vector<8x128xf32>
    %1212 = vector.broadcast %147 : f32 to vector<8x128xf32>
    %1213 = arith.mulf %1212, %1121 : vector<8x128xf32>
    %1214 = arith.addf %1211, %1213 : vector<8x128xf32>
    %1215 = vector.broadcast %176 : f32 to vector<8x128xf32>
    %1216 = arith.addf %1214, %1215 : vector<8x128xf32>
    %1217 = vector.broadcast %148 : f32 to vector<8x128xf32>
    %1218 = arith.mulf %1217, %1116 : vector<8x128xf32>
    %1219 = vector.broadcast %149 : f32 to vector<8x128xf32>
    %1220 = arith.mulf %1219, %1117 : vector<8x128xf32>
    %1221 = arith.addf %1218, %1220 : vector<8x128xf32>
    %1222 = vector.broadcast %150 : f32 to vector<8x128xf32>
    %1223 = arith.mulf %1222, %1118 : vector<8x128xf32>
    %1224 = arith.addf %1221, %1223 : vector<8x128xf32>
    %1225 = vector.broadcast %151 : f32 to vector<8x128xf32>
    %1226 = arith.mulf %1225, %1119 : vector<8x128xf32>
    %1227 = arith.addf %1224, %1226 : vector<8x128xf32>
    %1228 = vector.broadcast %152 : f32 to vector<8x128xf32>
    %1229 = arith.mulf %1228, %1120 : vector<8x128xf32>
    %1230 = arith.addf %1227, %1229 : vector<8x128xf32>
    %1231 = vector.broadcast %153 : f32 to vector<8x128xf32>
    %1232 = arith.mulf %1231, %1121 : vector<8x128xf32>
    %1233 = arith.addf %1230, %1232 : vector<8x128xf32>
    %1234 = vector.broadcast %177 : f32 to vector<8x128xf32>
    %1235 = arith.addf %1233, %1234 : vector<8x128xf32>
    %1236 = vector.broadcast %154 : f32 to vector<8x128xf32>
    %1237 = arith.mulf %1236, %1116 : vector<8x128xf32>
    %1238 = vector.broadcast %155 : f32 to vector<8x128xf32>
    %1239 = arith.mulf %1238, %1117 : vector<8x128xf32>
    %1240 = arith.addf %1237, %1239 : vector<8x128xf32>
    %1241 = vector.broadcast %156 : f32 to vector<8x128xf32>
    %1242 = arith.mulf %1241, %1118 : vector<8x128xf32>
    %1243 = arith.addf %1240, %1242 : vector<8x128xf32>
    %1244 = vector.broadcast %157 : f32 to vector<8x128xf32>
    %1245 = arith.mulf %1244, %1119 : vector<8x128xf32>
    %1246 = arith.addf %1243, %1245 : vector<8x128xf32>
    %1247 = vector.broadcast %158 : f32 to vector<8x128xf32>
    %1248 = arith.mulf %1247, %1120 : vector<8x128xf32>
    %1249 = arith.addf %1246, %1248 : vector<8x128xf32>
    %1250 = vector.broadcast %159 : f32 to vector<8x128xf32>
    %1251 = arith.mulf %1250, %1121 : vector<8x128xf32>
    %1252 = arith.addf %1249, %1251 : vector<8x128xf32>
    %1253 = vector.broadcast %178 : f32 to vector<8x128xf32>
    %1254 = arith.addf %1252, %1253 : vector<8x128xf32>
    %1255 = vector.broadcast %160 : f32 to vector<8x128xf32>
    %1256 = arith.mulf %1255, %1116 : vector<8x128xf32>
    %1257 = vector.broadcast %161 : f32 to vector<8x128xf32>
    %1258 = arith.mulf %1257, %1117 : vector<8x128xf32>
    %1259 = arith.addf %1256, %1258 : vector<8x128xf32>
    %1260 = vector.broadcast %162 : f32 to vector<8x128xf32>
    %1261 = arith.mulf %1260, %1118 : vector<8x128xf32>
    %1262 = arith.addf %1259, %1261 : vector<8x128xf32>
    %1263 = vector.broadcast %163 : f32 to vector<8x128xf32>
    %1264 = arith.mulf %1263, %1119 : vector<8x128xf32>
    %1265 = arith.addf %1262, %1264 : vector<8x128xf32>
    %1266 = vector.broadcast %164 : f32 to vector<8x128xf32>
    %1267 = arith.mulf %1266, %1120 : vector<8x128xf32>
    %1268 = arith.addf %1265, %1267 : vector<8x128xf32>
    %1269 = vector.broadcast %165 : f32 to vector<8x128xf32>
    %1270 = arith.mulf %1269, %1121 : vector<8x128xf32>
    %1271 = arith.addf %1268, %1270 : vector<8x128xf32>
    %1272 = vector.broadcast %179 : f32 to vector<8x128xf32>
    %1273 = arith.addf %1271, %1272 : vector<8x128xf32>
    %1274 = vector.broadcast %166 : f32 to vector<8x128xf32>
    %1275 = arith.mulf %1274, %1116 : vector<8x128xf32>
    %1276 = vector.broadcast %167 : f32 to vector<8x128xf32>
    %1277 = arith.mulf %1276, %1117 : vector<8x128xf32>
    %1278 = arith.addf %1275, %1277 : vector<8x128xf32>
    %1279 = vector.broadcast %168 : f32 to vector<8x128xf32>
    %1280 = arith.mulf %1279, %1118 : vector<8x128xf32>
    %1281 = arith.addf %1278, %1280 : vector<8x128xf32>
    %1282 = vector.broadcast %169 : f32 to vector<8x128xf32>
    %1283 = arith.mulf %1282, %1119 : vector<8x128xf32>
    %1284 = arith.addf %1281, %1283 : vector<8x128xf32>
    %1285 = vector.broadcast %170 : f32 to vector<8x128xf32>
    %1286 = arith.mulf %1285, %1120 : vector<8x128xf32>
    %1287 = arith.addf %1284, %1286 : vector<8x128xf32>
    %1288 = vector.broadcast %171 : f32 to vector<8x128xf32>
    %1289 = arith.mulf %1288, %1121 : vector<8x128xf32>
    %1290 = arith.addf %1287, %1289 : vector<8x128xf32>
    %1291 = vector.broadcast %180 : f32 to vector<8x128xf32>
    %1292 = arith.addf %1290, %1291 : vector<8x128xf32>
    %c0_182 = arith.constant 0 : index
    %1293 = arith.index_cast %756 : i32 to index
    %c0_183 = arith.constant 0 : index
    %1294 = vector.load %arg10[%c0_182, %1293, %c0_183] : memref<9x16x128xf32, #tpu.memory_space<vmem>>, vector<1x8x128xf32>
    %1295 = vector.shape_cast %1294 : vector<1x8x128xf32> to vector<8x128xf32>
    %1296 = vector.shape_cast %1140 : vector<8x128xf32> to vector<1x8x128xf32>
    tpu.vector_store %arg10[%c0_182, %1293, %c0_183], %1296 {strides = array<i32>} : memref<9x16x128xf32, #tpu.memory_space<vmem>>, vector<1x8x128xf32>,
    %c1_184 = arith.constant 1 : index
    %1297 = arith.index_cast %756 : i32 to index
    %c0_185 = arith.constant 0 : index
    %1298 = vector.load %arg10[%c1_184, %1297, %c0_185] : memref<9x16x128xf32, #tpu.memory_space<vmem>>, vector<1x8x128xf32>
    %1299 = vector.shape_cast %1298 : vector<1x8x128xf32> to vector<8x128xf32>
    %1300 = vector.shape_cast %1159 : vector<8x128xf32> to vector<1x8x128xf32>
    tpu.vector_store %arg10[%c1_184, %1297, %c0_185], %1300 {strides = array<i32>} : memref<9x16x128xf32, #tpu.memory_space<vmem>>, vector<1x8x128xf32>,
    %c2_186 = arith.constant 2 : index
    %1301 = arith.index_cast %756 : i32 to index
    %c0_187 = arith.constant 0 : index
    %1302 = vector.load %arg10[%c2_186, %1301, %c0_187] : memref<9x16x128xf32, #tpu.memory_space<vmem>>, vector<1x8x128xf32>
    %1303 = vector.shape_cast %1302 : vector<1x8x128xf32> to vector<8x128xf32>
    %1304 = vector.shape_cast %1178 : vector<8x128xf32> to vector<1x8x128xf32>
    tpu.vector_store %arg10[%c2_186, %1301, %c0_187], %1304 {strides = array<i32>} : memref<9x16x128xf32, #tpu.memory_space<vmem>>, vector<1x8x128xf32>,
    %c3_188 = arith.constant 3 : index
    %1305 = arith.index_cast %756 : i32 to index
    %c0_189 = arith.constant 0 : index
    %1306 = vector.load %arg10[%c3_188, %1305, %c0_189] : memref<9x16x128xf32, #tpu.memory_space<vmem>>, vector<1x8x128xf32>
    %1307 = vector.shape_cast %1306 : vector<1x8x128xf32> to vector<8x128xf32>
    %1308 = vector.shape_cast %1197 : vector<8x128xf32> to vector<1x8x128xf32>
    tpu.vector_store %arg10[%c3_188, %1305, %c0_189], %1308 {strides = array<i32>} : memref<9x16x128xf32, #tpu.memory_space<vmem>>, vector<1x8x128xf32>,
    %c4_190 = arith.constant 4 : index
    %1309 = arith.index_cast %756 : i32 to index
    %c0_191 = arith.constant 0 : index
    %1310 = vector.load %arg10[%c4_190, %1309, %c0_191] : memref<9x16x128xf32, #tpu.memory_space<vmem>>, vector<1x8x128xf32>
    %1311 = vector.shape_cast %1310 : vector<1x8x128xf32> to vector<8x128xf32>
    %1312 = vector.shape_cast %1216 : vector<8x128xf32> to vector<1x8x128xf32>
    tpu.vector_store %arg10[%c4_190, %1309, %c0_191], %1312 {strides = array<i32>} : memref<9x16x128xf32, #tpu.memory_space<vmem>>, vector<1x8x128xf32>,
    %c5_192 = arith.constant 5 : index
    %1313 = arith.index_cast %756 : i32 to index
    %c0_193 = arith.constant 0 : index
    %1314 = vector.load %arg10[%c5_192, %1313, %c0_193] : memref<9x16x128xf32, #tpu.memory_space<vmem>>, vector<1x8x128xf32>
    %1315 = vector.shape_cast %1314 : vector<1x8x128xf32> to vector<8x128xf32>
    %1316 = vector.shape_cast %1235 : vector<8x128xf32> to vector<1x8x128xf32>
    tpu.vector_store %arg10[%c5_192, %1313, %c0_193], %1316 {strides = array<i32>} : memref<9x16x128xf32, #tpu.memory_space<vmem>>, vector<1x8x128xf32>,
    %c6_194 = arith.constant 6 : index
    %1317 = arith.index_cast %756 : i32 to index
    %c0_195 = arith.constant 0 : index
    %1318 = vector.load %arg10[%c6_194, %1317, %c0_195] : memref<9x16x128xf32, #tpu.memory_space<vmem>>, vector<1x8x128xf32>
    %1319 = vector.shape_cast %1318 : vector<1x8x128xf32> to vector<8x128xf32>
    %1320 = vector.shape_cast %1254 : vector<8x128xf32> to vector<1x8x128xf32>
    tpu.vector_store %arg10[%c6_194, %1317, %c0_195], %1320 {strides = array<i32>} : memref<9x16x128xf32, #tpu.memory_space<vmem>>, vector<1x8x128xf32>,
    %c7_196 = arith.constant 7 : index
    %1321 = arith.index_cast %756 : i32 to index
    %c0_197 = arith.constant 0 : index
    %1322 = vector.load %arg10[%c7_196, %1321, %c0_197] : memref<9x16x128xf32, #tpu.memory_space<vmem>>, vector<1x8x128xf32>
    %1323 = vector.shape_cast %1322 : vector<1x8x128xf32> to vector<8x128xf32>
    %1324 = vector.shape_cast %1273 : vector<8x128xf32> to vector<1x8x128xf32>
    tpu.vector_store %arg10[%c7_196, %1321, %c0_197], %1324 {strides = array<i32>} : memref<9x16x128xf32, #tpu.memory_space<vmem>>, vector<1x8x128xf32>,
    %c8_198 = arith.constant 8 : index
    %1325 = arith.index_cast %756 : i32 to index
    %c0_199 = arith.constant 0 : index
    %1326 = vector.load %arg10[%c8_198, %1325, %c0_199] : memref<9x16x128xf32, #tpu.memory_space<vmem>>, vector<1x8x128xf32>
    %1327 = vector.shape_cast %1326 : vector<1x8x128xf32> to vector<8x128xf32>
    %1328 = vector.shape_cast %1292 : vector<8x128xf32> to vector<1x8x128xf32>
    tpu.vector_store %arg10[%c8_198, %1325, %c0_199], %1328 {strides = array<i32>} : memref<9x16x128xf32, #tpu.memory_space<vmem>>, vector<1x8x128xf32>,
    %c2_i32 = arith.constant 2 : i32
    return
  }
  func.func @transform_0(%arg0: i32) -> (i32, i32, i32) {
    %c0_i32 = arith.constant 0 : i32
    %c0_i32_0 = arith.constant 0 : i32
    %c0_i32_1 = arith.constant 0 : i32
    return %c0_i32, %arg0, %c0_i32_0 : i32, i32, i32
  }
  func.func @transform_1(%arg0: i32) -> i32 {
    %c0_i32 = arith.constant 0 : i32
    %c0_i32_0 = arith.constant 0 : i32
    return %c0_i32 : i32
  }
  func.func @transform_2(%arg0: i32) -> i32 {
    %c0_i32 = arith.constant 0 : i32
    %c0_i32_0 = arith.constant 0 : i32
    return %c0_i32 : i32
  }
  func.func @transform_3(%arg0: i32) -> i32 {
    %c0_i32 = arith.constant 0 : i32
    %c0_i32_0 = arith.constant 0 : i32
    return %c0_i32 : i32
  }
  func.func @transform_4(%arg0: i32) -> i32 {
    %c0_i32 = arith.constant 0 : i32
    %c0_i32_0 = arith.constant 0 : i32
    return %c0_i32 : i32
  }
  func.func @transform_5(%arg0: i32) -> i32 {
    %c0_i32 = arith.constant 0 : i32
    %c0_i32_0 = arith.constant 0 : i32
    return %c0_i32 : i32
  }
  func.func @transform_6(%arg0: i32) -> i32 {
    %c0_i32 = arith.constant 0 : i32
    %c0_i32_0 = arith.constant 0 : i32
    return %c0_i32 : i32
  }
  func.func @transform_7(%arg0: i32) -> i32 {
    %c0_i32 = arith.constant 0 : i32
    %c0_i32_0 = arith.constant 0 : i32
    return %c0_i32 : i32
  }
  func.func @transform_8(%arg0: i32) -> i32 {
    %c0_i32 = arith.constant 0 : i32
    %c0_i32_0 = arith.constant 0 : i32
    return %c0_i32 : i32
  }
  func.func @transform_9(%arg0: i32) -> (i32, i32, i32) {
    %c0_i32 = arith.constant 0 : i32
    %c0_i32_0 = arith.constant 0 : i32
    %c0_i32_1 = arith.constant 0 : i32
    return %c0_i32, %arg0, %c0_i32_0 : i32, i32, i32
  }
}

</mosaic_0001>

<bundles_post_ra>
// kernel: autoencoder_forward_fm.1
= control target key start
LH: loop header
LB: loop body
LE: loop exit
PB: predicated region body
PF: predicated region fallthrough
CT: control target
= control target key end

     0   :  { %s3428_s0 = inlined_call_operand.vmem [shape: f32[9,16,128], index: 0, kind: input, shape index: {}]   ;;  %s3429_s1 = inlined_call_operand.vmem [shape: f32[54], index: 1, kind: input, shape index: {}]   ;;  %s3430_s2 = inlined_call_operand.vmem [shape: f32[6], index: 2, kind: input, shape index: {}]   ;;  %s3431_s3 = inlined_call_operand.vmem [shape: f32[24], index: 3, kind: input, shape index: {}]   ;;  %s3432_s4 = inlined_call_operand.vmem [shape: f32[4], index: 4, kind: input, shape index: {}]   ;;  %s3433_s5 = inlined_call_operand.vmem [shape: f32[24], index: 5, kind: input, shape index: {}]   ;;  %s3434_s6 = inlined_call_operand.vmem [shape: f32[6], index: 6, kind: input, shape index: {}]   ;;  %s3435_s7 = inlined_call_operand.vmem [shape: f32[54], index: 7, kind: input, shape index: {}]   ;;  %s3436_s8 = inlined_call_operand.vmem [shape: f32[9], index: 8, kind: input, shape index: {}]   ;;  %s3437_s9 = inlined_call_operand.vmem [shape: f32[9,16,128], index: 9, kind: output, shape index: {}]  }
   0x1   :  { %3790 = sst [smem:[#allocation196_spill]] %s3428_s0 }
   0x2   :  { %3791 = sst [smem:[#allocation197_spill]] %s3437_s9 }
   0x3   :  { %14 = vsyncpa [#allocation3], 0 }
   0x4   :  { %15 = vsyncpa [#allocation5], 0 }
   0x5   :  { %16 = vsyncpa [#allocation8], 0 }
   0x6   :  { %17 = vsyncpa [#allocation11], 0  ;;  %s37_s11 = sshll.u32 %s3430_s2, 4  ;;  %s38_s11 = int_to_ptr.vmem [resolvable:$true] %s37_s11 }
   0x7   :  { %18 = vsyncpa [#allocation14], 0  ;;  %s57_s14 = sshll.u32 %s3432_s4, 4  ;;  %s1550_s15 = scalar_lea.vmem %s38_s11, 16  ;;  %s58_s14 = int_to_ptr.vmem [resolvable:$true] %s57_s14 }
   0x8   :  { %p1551_p0 = scmp.ne.s32.totalorder %s38_s11, %s1550_s15  ;;  %p1555_p1 = scmp.lt.s32.totalorder %s38_s11, %s38_s11 }
   0x9   :  { %p1556_p2 = scmp.lt.s32.totalorder %s1550_s15, %s1550_s15 }
   0xb   :  { %p1557_p3 = por %p1556_p2, %p1555_p1 }
   0xd   :  { %p1558_p4 = pnand %p1557_p3, %p1551_p0 }
   0xf   :  { %1561 = shalt.err (!%p1558_p4)
}
  0x10   :  { %s1656_s16 = smov [#allocation4]   ;;  %s1562_s17 = scalar_lea.vmem %s58_s14, 16 }
  0x11   :  { %40 = dma.vmem_to_smem %s38_s11, 16, %s1656_s16, [#allocation5]  }
  0x12   :  { %p1563_p5 = scmp.ne.s32.totalorder %s58_s14, %s1562_s17  ;;  %p1567_p6 = scmp.lt.s32.totalorder %s58_s14, %s58_s14 }
  0x13   :  { %p1568_p7 = scmp.lt.s32.totalorder %s1562_s17, %s1562_s17 }
  0x15   :  { %p1569_p8 = por %p1568_p7, %p1567_p6 }
  0x17   :  { %p1570_p9 = pnand %p1569_p8, %p1563_p5 }
  0x19   :  { %1573 = shalt.err (!%p1570_p9)
}
  0x1a   :  { %s1657_s2 = smov [#allocation7]   ;;  %s77_s19 = sshll.u32 %s3434_s6, 4  ;;  %s78_s19 = int_to_ptr.vmem [resolvable:$true] %s77_s19 }
  0x1b   :  { %60 = dma.vmem_to_smem %s58_s14, 16, %s1657_s2, [#allocation8]  }
  0x1c   :  { %s27_s22 = sshll.u32 %s3429_s1, 4  ;;  %s1574_s23 = scalar_lea.vmem %s78_s19, 16  ;;  %s28_s22 = int_to_ptr.vmem [resolvable:$true] %s27_s22 }
  0x1d   :  { %p1575_p10 = scmp.ne.s32.totalorder %s78_s19, %s1574_s23  ;;  %p1579_p11 = scmp.lt.s32.totalorder %s78_s19, %s78_s19 }
  0x1e   :  { %p1580_p12 = scmp.lt.s32.totalorder %s1574_s23, %s1574_s23 }
  0x20   :  { %p1581_p13 = por %p1580_p12, %p1579_p11 }
  0x22   :  { %p1582_p0 = pnand %p1581_p13, %p1575_p10 }
  0x24   :  { %1585 = shalt.err (!%p1582_p0)
}
  0x25   :  { %s1658_s24 = smov [#allocation10]   ;;  %s1586_s25 = scalar_lea.vmem %s28_s22, 16 }
  0x26   :  { %80 = dma.vmem_to_smem %s78_s19, 16, %s1658_s24, [#allocation11]  }
  0x27   :  { %p1587_p1 = scmp.ne.s32.totalorder %s28_s22, %s1586_s25  ;;  %p1591_p2 = scmp.lt.s32.totalorder %s28_s22, %s28_s22 }
  0x28   :  { %p1592_p3 = scmp.lt.s32.totalorder %s1586_s25, %s1586_s25 }
  0x2a   :  { %p1593_p4 = por %p1592_p3, %p1591_p2 }
  0x2c   :  { %p1594_p5 = pnand %p1593_p4, %p1587_p1 }
  0x2e   :  { %1597 = shalt.err (!%p1594_p5)
}
  0x2f   :  { %s1659_s6 = smov [#allocation2]   ;;  %s47_s27 = sshll.u32 %s3431_s3, 4  ;;  %s48_s27 = int_to_ptr.vmem [resolvable:$true] %s47_s27 }
  0x30   :  { %30 = dma.vmem_to_smem %s28_s22, 16, %s1659_s6, [#allocation3]  }
  0x31   :  { %s67_s30 = sshll.u32 %s3433_s5, 4  ;;  %s1598_s10 = scalar_lea.vmem %s48_s27, 16  ;;  %s68_s30 = int_to_ptr.vmem [resolvable:$true] %s67_s30 }
  0x32   :  { %p1599_p6 = scmp.ne.s32.totalorder %s48_s27, %s1598_s10  ;;  %p1603_p7 = scmp.lt.s32.totalorder %s48_s27, %s48_s27 }
  0x33   :  { %p1604_p8 = scmp.lt.s32.totalorder %s1598_s10, %s1598_s10 }
  0x35   :  { %p1605_p9 = por %p1604_p8, %p1603_p7 }
  0x37   :  { %p1606_p10 = pnand %p1605_p9, %p1599_p6 }
  0x39   :  { %1609 = shalt.err (!%p1606_p10)
}
  0x3a   :  { %s1660_s11 = smov [#allocation6]   ;;  %s1610_s12 = scalar_lea.vmem %s68_s30, 16 }
  0x3b   :  { %50 = dma.vmem_to_smem %s48_s27, 16, %s1660_s11, [#allocation5]  }
  0x3c   :  { %p1611_p11 = scmp.ne.s32.totalorder %s68_s30, %s1610_s12  ;;  %p1615_p12 = scmp.lt.s32.totalorder %s68_s30, %s68_s30 }
  0x3d   :  { %p1616_p13 = scmp.lt.s32.totalorder %s1610_s12, %s1610_s12 }
  0x3f   :  { %p1617_p0 = por %p1616_p13, %p1615_p12 }
  0x41   :  { %p1618_p1 = pnand %p1617_p0, %p1611_p11 }
  0x43   :  { %1621 = shalt.err (!%p1618_p1)
}
  0x44   :  { %s1661_s3 = smov [#allocation9]   ;;  %s87_s14 = sshll.u32 %s3435_s7, 4  ;;  %s88_s14 = int_to_ptr.vmem [resolvable:$true] %s87_s14 }
  0x45   :  { %70 = dma.vmem_to_smem %s68_s30, 16, %s1661_s3, [#allocation8]  }
  0x46   :  { %s97_s17 = sshll.u32 %s3436_s8, 4  ;;  %s1622_s2 = scalar_lea.vmem %s88_s14, 16  ;;  %s98_s17 = int_to_ptr.vmem [resolvable:$true] %s97_s17 }
  0x47   :  { %p1623_p2 = scmp.ne.s32.totalorder %s88_s14, %s1622_s2  ;;  %p1627_p3 = scmp.lt.s32.totalorder %s88_s14, %s88_s14 }
  0x48   :  { %p1628_p4 = scmp.lt.s32.totalorder %s1622_s2, %s1622_s2 }
  0x4a   :  { %p1629_p5 = por %p1628_p4, %p1627_p3 }
  0x4c   :  { %p1630_p6 = pnand %p1629_p5, %p1623_p2 }
  0x4e   :  { %1633 = shalt.err (!%p1630_p6)
}
  0x4f   :  { %s1662_s4 = smov [#allocation12]   ;;  %s1634_s18 = scalar_lea.vmem %s98_s17, 16 }
  0x50   :  { %90 = dma.vmem_to_smem %s88_s14, 16, %s1662_s4, [#allocation11]  }
  0x51   :  { %p1635_p7 = scmp.ne.s32.totalorder %s98_s17, %s1634_s18  ;;  %p1639_p8 = scmp.lt.s32.totalorder %s98_s17, %s98_s17 }
  0x52   :  { %p1640_p9 = scmp.lt.s32.totalorder %s1634_s18, %s1634_s18 }
  0x54   :  { %p1641_p10 = por %p1640_p9, %p1639_p8 }
  0x56   :  { %p1642_p11 = pnand %p1641_p10, %p1635_p7 }
  0x58   :  { %1645 = shalt.err (!%p1642_p11)
}
  0x59   :  { %s1663_s7 = smov [#allocation13]  }
  0x5a   :  { %100 = dma.vmem_to_smem %s98_s17, 16, %s1663_s7, [#allocation14]  }
  0x5b   :  { %1646 = dma.done.wait [#allocation3], 16  }
  0x5c   :  { %1647 = vsyncadd [#allocation3], 4294967280 }
  0x5d   :  { %1648 = dma.done.wait [#allocation5], 32  }
  0x5e   :  { %1649 = vsyncadd [#allocation5], 4294967264 }
  0x5f   :  { %1650 = dma.done.wait [#allocation8], 32  }
  0x60   :  { %1651 = vsyncadd [#allocation8], 4294967264 }
  0x61   :  { %1652 = dma.done.wait [#allocation11], 32  }
  0x62   :  { %1653 = vsyncadd [#allocation11], 4294967264 }
  0x63   :  { %1654 = dma.done.wait [#allocation14], 16  }
  0x64   :  { %1655 = vsyncadd [#allocation14], 4294967280 }
  0x65   :  { %125 = sfence }
  0x66   :  { %s1738_s8 = sld [smem:[#allocation2]]  ;;  %s1740_s19 = sld [smem:[#allocation2 + $0x1]]  ;;  %v1761_v0 = vld [vmem:[%s3428_s0] sm:$0xff]  ;;  %v1766_v1 = vld [vmem:[%s3428_s0 + $0x10] sm:$0xff] }
  0x67   :  { %s1742_s20 = sld [smem:[#allocation2 + $0x2]]  ;;  %s1744_s21 = sld [smem:[#allocation2 + $0x3]]  ;;  %v1775_v2 = vld [vmem:[%s3428_s0 + $0x20] sm:$0xff]  ;;  %v1784_v3 = vld [vmem:[%s3428_s0 + $0x30] sm:$0xff] }
  0x68   :  { %s1746_s22 = sld [smem:[#allocation2 + $0x4]]  ;;  %s1748_s23 = sld [smem:[#allocation2 + $0x5]]  ;;  %v1795_v6 = vld [vmem:[%s3428_s0 + $0x40] sm:$0xff]  ;;  %v1820_v13 = vld [vmem:[%s3428_s0 + $0x50] sm:$0xff] }
  0x69   :  { %s1750_s24 = sld [smem:[#allocation2 + $0x6]]  ;;  %s1752_s25 = sld [smem:[#allocation2 + $0x7]]  ;;  %v1832_v16 = vld [vmem:[%s3428_s0 + $0x60] sm:$0xff]  ;;  %v1845_v21 = vld [vmem:[%s3428_s0 + $0x70] sm:$0xff] }
  0x6a   :  { %s1754_s6 = sld [smem:[#allocation2 + $0x8]]  ;;  %s1756_s1 = sld [smem:[#allocation2 + $0x9]]  ;;  %v1850_v22 = vld [vmem:[%s3428_s0 + $0x80] sm:$0xff] }
  0x6b   :  { %s1768_s30 = sld [smem:[#allocation2 + $0xa]]  ;;  %s1770_s10 = sld [smem:[#allocation2 + $0xb]] }
  0x6c   :  { %3792 = sst [smem:[#allocation20_spill]] %s1738_s8  ;;  %s1777_s3 = sld [smem:[#allocation2 + $0xc]]  ;;  %v332_v4 = vstv %s1738_s8  ;;  %v334_v5 = vstv %s1740_s19 }
  0x6d   :  { %3793 = sst [smem:[#allocation21_spill]] %s1740_s19  ;;  %s1779_s5 = sld [smem:[#allocation2 + $0xd]]  ;;  %v333_v7 = vmul.f32 %v332_v4, %v1761_v0  ;;  %v335_v8 = vmul.f32 %v1766_v1, %v334_v5  ;;  %v337_v9 = vstv %s1742_s20  ;;  %v340_v10 = vstv %s1744_s21 }
  0x6e   :  { %3794 = sst [smem:[#allocation22_spill]] %s1742_s20  ;;  %s1788_s15 = sld [smem:[#allocation2 + $0xe]]  ;;  %v338_v11 = vmul.f32 %v1775_v2, %v337_v9  ;;  %v343_v12 = vstv %s1746_s22  ;;  %v341_v15 = vmul.f32 %v1784_v3, %v340_v10  ;;  %v346_v18 = vstv %s1748_s23 }
  0x6f   :  { %3795 = sst [smem:[#allocation23_spill]] %s1744_s21  ;;  %s1790_s16 = sld [smem:[#allocation2 + $0xf]]  ;;  %v336_v14 = vadd.f32 %v335_v8, %v333_v7  ;;  %v344_v17 = vmul.f32 %v1795_v6, %v343_v12  ;;  %v349_v19 = vstv %s1750_s24  ;;  %v352_v24 = vstv %s1752_s25 }
  0x70   :  { %3796 = sst [smem:[#allocation24_spill]] %s1746_s22  ;;  %s1805_s4 = sld [smem:[#allocation2 + $0x10]]  ;;  %v360_v20 = vstv %s1756_s1  ;;  %v3670_v25 = vstv %s1754_s6  ;;  %v347_v32 = vmul.f32 %v1820_v13, %v346_v18  ;;  %v350_v35 = vmul.f32 %v1832_v16, %v349_v19 }
  0x71   :  { %3797 = sst [smem:[#allocation25_spill]] %s1748_s23  ;;  %s1807_s18 = sld [smem:[#allocation2 + $0x11]]  ;;  %v339_v23 = vadd.f32 %v338_v11, %v336_v14  ;;  %v361_v26 = vmul.f32 %v360_v20, %v1761_v0  ;;  %v362_v27 = vstv %s1768_s30  ;;  %v365_v28 = vstv %s1770_s10 }
  0x72   :  { %3798 = sst [smem:[#allocation26_spill]] %s1750_s24  ;;  %s1813_s7 = sld [smem:[#allocation2 + $0x12]]  ;;  %v3690_v29 = vstv %s1777_s3  ;;  %v363_v33 = vmul.f32 %v1766_v1, %v362_v27  ;;  %v366_v34 = vmul.f32 %v1775_v2, %v365_v28  ;;  %v353_v36 = vmul.f32 %v1845_v21, %v352_v24 }
  0x73   :  { %3799 = sst [smem:[#allocation27_spill]] %s1752_s25  ;;  %s1815_s26 = sld [smem:[#allocation2 + $0x13]]  ;;  %v3679_v30 = vstv %s1779_s5  ;;  %v342_v31 = vadd.f32 %v341_v15, %v339_v23  ;;  %v1887_v37 = vmul.f32 %v1850_v22, %v3670_v25  ;;  %v369_v38 = vmul.f32 %v1784_v3, %v3690_v29 }
  0x74   :  { %3800 = sst [smem:[#allocation28_spill]] %s1754_s6  ;;  %s1825_s29 = sld [smem:[#allocation2 + $0x14]]  ;;  %v364_v40 = vadd.f32 %v363_v33, %v361_v26  ;;  %v372_v41 = vmul.f32 %v1795_v6, %v3679_v30  ;;  %v3678_v42 = vstv %s1788_s15 }
  0x75   :  { %3801 = sst [smem:[#allocation29_spill]] %s1756_s1  ;;  %s1827_s11 = sld [smem:[#allocation2 + $0x15]]  ;;  %v345_v39 = vadd.f32 %v344_v17, %v342_v31  ;;  %v3671_v43 = vstv %s1790_s16  ;;  %v375_v57 = vmul.f32 %v1820_v13, %v3678_v42 }
  0x76   :  { %3802 = sst [smem:[#allocation30_spill]] %s1768_s30  ;;  %s1840_s14 = sld [smem:[#allocation2 + $0x16]]  ;;  %v3645_v44 = vstv %s1805_s4  ;;  %v367_v48 = vadd.f32 %v366_v34, %v364_v40  ;;  %v378_v59 = vmul.f32 %v1832_v16, %v3671_v43 }
  0x77   :  { %3803 = sst [smem:[#allocation31_spill]] %s1770_s10  ;;  %s1857_s12 = sld [smem:[#allocation2 + $0x17]]  ;;  %v348_v47 = vadd.f32 %v347_v32, %v345_v39  ;;  %v3575_v49 = vstv %s1807_s18  ;;  %v381_v7 = vmul.f32 %v1845_v21, %v3645_v44 }
  0x78   :  { %3804 = sst [smem:[#allocation32_spill]] %s1777_s3  ;;  %s1863_s13 = sld [smem:[#allocation2 + $0x18]]  ;;  %v3677_v45 = vstv %s1813_s7  ;;  %v370_v56 = vadd.f32 %v369_v38, %v367_v48  ;;  %v1957_v8 = vmul.f32 %v1850_v22, %v3575_v49 }
  0x79   :  { %3805 = sst [smem:[#allocation33_spill]] %s1779_s5  ;;  %s1874_s17 = sld [smem:[#allocation2 + $0x19]]  ;;  %v3676_v46 = vstv %s1815_s26  ;;  %v389_v50 = vmul.f32 %v3677_v45, %v1761_v0  ;;  %v351_v55 = vadd.f32 %v350_v35, %v348_v47 }
  0x7a   :  { %3806 = sst [smem:[#allocation34_spill]] %s1788_s15  ;;  %s1876_s2 = sld [smem:[#allocation2 + $0x1b]]  ;;  %v391_v51 = vmul.f32 %v1766_v1, %v3676_v46  ;;  %v3673_v52 = vstv %s1825_s29  ;;  %v373_v63 = vadd.f32 %v372_v41, %v370_v56 }
  0x7b   :  { %3807 = sst [smem:[#allocation35_spill]] %s1790_s16  ;;  %s1892_s27 = sld [smem:[#allocation2 + $0x1a]]  ;;  %v3672_v53 = vstv %s1827_s11  ;;  %v394_v58 = vmul.f32 %v1775_v2, %v3673_v52  ;;  %v354_v14 = vadd.f32 %v353_v36, %v351_v55 }
  0x7c   :  { %3808 = sst [smem:[#allocation36_spill]] %s1805_s4  ;;  %s1894_s28 = sld [smem:[#allocation2 + $0x1c]]  ;;  %v3669_v54 = vstv %s1840_s14  ;;  %v392_v60 = vadd.f32 %v391_v51, %v389_v50  ;;  %v397_v61 = vmul.f32 %v1784_v3, %v3672_v53  ;;  %v376_v26 = vadd.f32 %v375_v57, %v373_v63 }
  0x7d   :  { %3809 = sst [smem:[#allocation37_spill]] %s1807_s18  ;;  %s1900_s6 = sld [smem:[#allocation2 + $0x1d]]  ;;  %v3643_v62 = vstv %s1857_s12  ;;  %v400_v11 = vmul.f32 %v1795_v6, %v3669_v54  ;;  %v357_v56 = vadd.f32 %v1887_v37, %v354_v14 }
  0x7e   :  { %3810 = sst [smem:[#allocation38_spill]] %s1813_s7  ;;  %s1902_s9 = sld [smem:[#allocation2 + $0x1e]]  ;;  %v395_v15 = vadd.f32 %v394_v58, %v392_v60  ;;  %v3567_v17 = vstv %s1863_s13  ;;  %v403_v31 = vmul.f32 %v1820_v13, %v3643_v62  ;;  %v379_v39 = vadd.f32 %v378_v59, %v376_v26 }
  0x7f   :  { %3811 = sst [smem:[#allocation39_spill]] %s1815_s26  ;;  %s1908_s3 = sld [smem:[#allocation2 + $0x1f]]  ;;  %v3562_v32 = vstv %s1874_s17  ;;  %v406_v50 = vmul.f32 %v1832_v16, %v3567_v17 }
  0x80   :  { %3812 = sst [smem:[#allocation40_spill]] %s1825_s29  ;;  %s1910_s10 = sld [smem:[#allocation2 + $0x20]]  ;;  %v3644_v23 = vstv %s1876_s2  ;;  %v398_v34 = vadd.f32 %v397_v61, %v395_v15  ;;  %v409_v57 = vmul.f32 %v1845_v21, %v3562_v32  ;;  %v382_v60 = vadd.f32 %v381_v7, %v379_v39 }
  0x81   :  { %3813 = sst [smem:[#allocation41_spill]] %s1827_s11  ;;  %s1916_s5 = sld [smem:[#allocation2 + $0x21]]  ;;  %v3475_v33 = vstv %s1892_s27  ;;  %v417_v35 = vmul.f32 %v3644_v23, %v1761_v0 }
  0x82   :  { %3814 = sst [smem:[#allocation42_spill]] %s1840_s14  ;;  %s1918_s30 = sld [smem:[#allocation2 + $0x22]]  ;;  %v3633_v36 = vstv %s1894_s28  ;;  %v401_v48 = vadd.f32 %v400_v11, %v398_v34  ;;  %v412_v63 = vmul.f32 %v1850_v22, %v3475_v33 }
  0x83   :  { %3815 = sst [smem:[#allocation43_spill]] %s1857_s12  ;;  %s1926_s1 = sld [smem:[#allocation2 + $0x23]]  ;;  %v3568_v38 = vstv %s1900_s6  ;;  %v419_v40 = vmul.f32 %v1766_v1, %v3633_v36 }
  0x84   :  { %3816 = sst [smem:[#allocation44_spill]] %s1863_s13  ;;  %s1928_s25 = sld [smem:[#allocation2 + $0x24]]  ;;  %v422_v41 = vmul.f32 %v1775_v2, %v3568_v38  ;;  %v3563_v47 = vstv %s1902_s9  ;;  %v404_v61 = vadd.f32 %v403_v31, %v401_v48 }
  0x85   :  { %3817 = sst [smem:[#allocation45_spill]] %s1874_s17  ;;  %s1936_s26 = sld [smem:[#allocation2 + $0x25]]  ;;  %v3561_v51 = vstv %s1908_s3  ;;  %v420_v58 = vadd.f32 %v419_v40, %v417_v35  ;;  %v425_v59 = vmul.f32 %v1784_v3, %v3563_v47 }
  0x86   :  { %3818 = sst [smem:[#allocation46_spill]] %s1876_s2  ;;  %s1938_s7 = sld [smem:[#allocation2 + $0x26]]  ;;  %v3474_v55 = vstv %s1910_s10  ;;  %v428_v37 = vmul.f32 %v1795_v6, %v3561_v51  ;;  %v407_v26 = vadd.f32 %v406_v50, %v404_v61 }
  0x87   :  { %3819 = sst [smem:[#allocation47_spill]] %s1892_s27  ;;  %s1947_s15 = sld [smem:[#allocation2 + $0x27]]  ;;  %v423_v11 = vadd.f32 %v422_v41, %v420_v58  ;;  %v431_v14 = vmul.f32 %v1820_v13, %v3474_v55  ;;  %v3480_v15 = vstv %s1916_s5 }
  0x88   :  { %3820 = sst [smem:[#allocation48_spill]] %s1894_s28  ;;  %s1949_s29 = sld [smem:[#allocation2 + $0x28]]  ;;  %v3491_v7 = vstv %s1918_s30  ;;  %v410_v50 = vadd.f32 %v409_v57, %v407_v26  ;;  %v434_v58 = vmul.f32 %v1832_v16, %v3480_v15  ;;  %v385_v57 = vadd.f32 %v1957_v8, %v382_v60 }
  0x89   :  { %3821 = sst [smem:[#allocation49_spill]] %s1900_s6  ;;  %s1962_s16 = sld [smem:[#allocation2 + $0x29]]  ;;  %v3486_v31 = vstv %s1926_s1  ;;  %v426_v39 = vadd.f32 %v425_v59, %v423_v11  ;;  %v437_v15 = vmul.f32 %v1845_v21, %v3491_v7 }
  0x8a   :  { %3822 = sst [smem:[#allocation50_spill]] %s1902_s9  ;;  %s1964_s11 = sld [smem:[#allocation2 + $0x2a]]  ;;  %v3558_v34 = vstv %s1928_s25  ;;  %v413_v60 = vadd.f32 %v412_v63, %v410_v50 }
  0x8b   :  { %3823 = sst [smem:[#allocation51_spill]] %s1908_s3  ;;  %s1968_s4 = sld [smem:[#allocation2 + $0x2b]]  ;;  %v3476_v35 = vstv %s1936_s26  ;;  %v445_v40 = vmul.f32 %v3558_v34, %v1761_v0  ;;  %v429_v55 = vadd.f32 %v428_v37, %v426_v39 }
  0x8c   :  { %3824 = sst [smem:[#allocation52_spill]] %s1910_s10  ;;  %s1970_s18 = sld [smem:[#allocation2 + $0x2c]]  ;;  %v447_v41 = vmul.f32 %v1766_v1, %v3476_v35  ;;  %v3481_v48 = vstv %s1938_s7 }
  0x8d   :  { %3825 = sst [smem:[#allocation53_spill]] %s1916_s5  ;;  %s1977_s14 = sld [smem:[#allocation2 + $0x2d]]  ;;  %v450_v59 = vmul.f32 %v1775_v2, %v3481_v48  ;;  %v3500_v61 = vstv %s1947_s15  ;;  %v440_v48 = vmul.f32 %v1850_v22, %v3486_v31  ;;  %v432_v39 = vadd.f32 %v431_v14, %v429_v55 }
  0x8e   :  { %3826 = sst [smem:[#allocation54_spill]] %s1918_s30  ;;  %s1979_s24 = sld [smem:[#allocation2 + $0x2e]]  ;;  %v448_v33 = vadd.f32 %v447_v41, %v445_v40  ;;  %v3492_v35 = vstv %s1949_s29  ;;  %v453_v8 = vmul.f32 %v1784_v3, %v3500_v61 }
  0x8f   :  { %3827 = sst [smem:[#allocation55_spill]] %s1926_s1  ;;  %s1986_s23 = sld [smem:[#allocation2 + $0x2f]]  ;;  %v456_v41 = vmul.f32 %v1795_v6, %v3492_v35  ;;  %v3498_v31 = vstv %s1962_s16  ;;  %v435_v55 = vadd.f32 %v434_v58, %v432_v39 }
  0x90   :  { %3828 = sst [smem:[#allocation56_spill]] %s1928_s25  ;;  %s1988_s12 = sld [smem:[#allocation2 + $0x30]]  ;;  %v451_v40 = vadd.f32 %v450_v59, %v448_v33  ;;  %v459_v59 = vmul.f32 %v1820_v13, %v3498_v31 }
  0x91   :  { %3829 = sst [smem:[#allocation57_spill]] %s1936_s26  ;;  %s1997_s22 = sld [smem:[#allocation2 + $0x31]]  ;;  %v3505_v7 = vstv %s1968_s4  ;;  %v438_v58 = vadd.f32 %v437_v15, %v435_v55 }
  0x92   :  { %3830 = sst [smem:[#allocation58_spill]] %s1938_s7  ;;  %s1999_s2 = sld [smem:[#allocation2 + $0x32]]  ;;  %v454_v14 = vadd.f32 %v453_v8, %v451_v40  ;;  %v465_v40 = vmul.f32 %v1845_v21, %v3505_v7  ;;  %v3510_v8 = vstv %s1970_s18 }
  0x93   :  { %3831 = sst [smem:[#allocation59_spill]] %s1947_s15  ;;  %s2006_s28 = sld [smem:[#allocation4]]  ;;  %v3557_v35 = vstv %s1977_s14  ;;  %v441_v15 = vadd.f32 %v440_v48, %v438_v58  ;;  %v468_v7 = vmul.f32 %v1850_v22, %v3510_v8 }
  0x94   :  { %3832 = sst [smem:[#allocation60_spill]] %s1949_s29  ;;  %s2008_s6 = sld [smem:[#allocation4 + $0x1]]  ;;  %v457_v39 = vadd.f32 %v456_v41, %v454_v14  ;;  %v3555_v31 = vstv %s1979_s24 }
  0x95   :  { %3833 = sst [smem:[#allocation61_spill]] %s1962_s16  ;;  %s2017_s13 = sld [smem:[#allocation2 + $0x33]]  ;;  %v475_v55 = vmul.f32 %v1766_v1, %v3555_v31 }
  0x96   :  { %3834 = sst [smem:[#allocation62_spill]] %s1964_s11  ;;  %s2019_s21 = sld [smem:[#allocation2 + $0x34]]  ;;  %v3550_v61 = vstv %s1988_s12  ;;  %v460_v41 = vadd.f32 %v459_v59, %v457_v39 }
  0x97   :  { %3835 = sst [smem:[#allocation63_spill]] %s1968_s4  ;;  %s2027_s17 = sld [smem:[#allocation2 + $0x35]]  ;;  %v481_v48 = vmul.f32 %v1784_v3, %v3550_v61  ;;  %v3548_v59 = vstv %s1997_s22 }
  0x98   :  { %3836 = sst [smem:[#allocation64_spill]] %s1970_s18  ;;  %s2029_s9 = sld [smem:[#allocation4 + $0x2]]  ;;  %v3545_v58 = vstv %s1999_s2 }
  0x99   :  { %3837 = sst [smem:[#allocation65_spill]] %s1977_s14  ;;  %s2036_s27 = sld [smem:[#allocation4 + $0x3]]  ;;  %v3499_v11 = vstv %s2006_s28 }
  0x9a   :  { %3838 = sst [smem:[#allocation66_spill]] %s1979_s24  ;;  %s2038_s3 = sld [smem:[#allocation4 + $0x4]]  ;;  %v3556_v26 = vstv %s2008_s6  ;;  %v2089_v37 = vadd.f32 %v3499_v11, %v357_v56  ;;  %v3497_v56 = vstv %s1964_s11  ;;  %v3554_v11 = vstv %s1986_s23 }
  0x9b   :  { %3839 = sst [smem:[#allocation67_spill]] %s1986_s23  ;;  %s2043_s20 = sld [smem:[#allocation4 + $0x5]]  ;;  %v462_v50 = vmul.f32 %v1832_v16, %v3497_v56  ;;  %v473_v56 = vmul.f32 %v3557_v35, %v1761_v0  ;;  %v478_v14 = vmul.f32 %v1775_v2, %v3554_v11  ;;  %v387_v0 = vadd.f32 %v3556_v26, %v385_v57 }
  0x9c   :  { %3840 = sst [smem:[#allocation68_spill]] %s1988_s12  ;;  %s2054_s10 = sld [smem:[#allocation6 + $0x1]]  ;;  %v3544_v39 = vstv %s2017_s13  ;;  %v3543_v8 = vstv %s2019_s21  ;;  %1486 = vtanh.f32 %v2089_v37 }
  0x9d   :  { %3841 = sst [smem:[#allocation69_spill]] %s1997_s22  ;;  %s2045_s19 = sld [smem:[#allocation6]]  ;;  %v463_v1 = vadd.f32 %v462_v50, %v460_v41  ;;  %v476_v2 = vadd.f32 %v475_v55, %v473_v56  ;;  %v484_v41 = vmul.f32 %v1795_v6, %v3548_v59  ;;  %v3541_v55 = vstv %s2027_s17 }
  0x9e   :  { %3842 = sst [smem:[#allocation70_spill]] %s1999_s2  ;;  %s2065_s26 = sld [smem:[#allocation6 + $0x3]]  ;;  %v3549_v33 = vstv %s2029_s9  ;;  %1488 = vtanh.f32 %v387_v0 }
  0x9f   :  { %3843 = sst [smem:[#allocation71_spill]] %s2006_s28  ;;  %s2056_s8 = sld [smem:[#allocation6 + $0x2]]  ;;  %v3515_v63 = vstv %s2036_s27  ;;  %v415_v3 = vadd.f32 %v3549_v33, %v413_v60  ;;  %v466_v56 = vadd.f32 %v465_v40, %v463_v1  ;;  %v479_v50 = vadd.f32 %v478_v14, %v476_v2 }
  0xa0   :  { %3844 = sst [smem:[#allocation72_spill]] %s2008_s6  ;;  %s2071_s0 = sld [smem:[#allocation6 + $0x5]]  ;;  %v443_v57 = vadd.f32 %v3515_v63, %v441_v15  ;;  %v3538_v60 = vstv %s2038_s3  ;;  %v487_v15 = vmul.f32 %v1820_v13, %v3545_v58  ;;  %v490_v63 = vmul.f32 %v1832_v16, %v3544_v39 }
  0xa1   :  { %3845 = sst [smem:[#allocation73_spill]] %s2017_s13  ;;  %s2067_s25 = sld [smem:[#allocation6 + $0x4]]  ;;  %v469_v6 = vadd.f32 %v468_v7, %v466_v56  ;;  %v482_v40 = vadd.f32 %v481_v48, %v479_v50  ;;  %v493_v14 = vmul.f32 %v1845_v21, %v3543_v8  ;;  %v496_v13 = vmul.f32 %v1850_v22, %v3541_v55 }
  0xa2   :  { %3846 = sst [smem:[#allocation74_spill]] %s2019_s21  ;;  %s2083_s7 = sld [smem:[#allocation6 + $0x7]]  ;;  %v3584_v16 = vstv %s2043_s20  ;;  %1490 = vtanh.f32 %v415_v3  ;;  %v3574_v0 = vstv %s2054_s10 }
  0xa3   :  { %3847 = sst [smem:[#allocation75_spill]] %s2027_s17  ;;  %s2073_s5 = sld [smem:[#allocation6 + $0x6]]  ;;  %v3569_v37 = vstv %s2045_s19  ;;  %v471_v21 = vadd.f32 %v3538_v60, %v469_v6  ;;  %v485_v7 = vadd.f32 %v484_v41, %v482_v40  ;;  %1492 = vtanh.f32 %v443_v57 }
  0xa4   :  { %3848 = sst [smem:[#allocation76_spill]] %s2029_s9  ;;  %s2094_s30 = sld [smem:[#allocation6 + $0x9]]  ;;  %v3626_v48 = vstv %s2065_s26 }
  0xa5   :  { %3849 = sst [smem:[#allocation77_spill]] %s2036_s27  ;;  %s2096_s1 = sld [smem:[#allocation6 + $0xa]]  ;;  %v3632_v22 = vstv %s2056_s8  ;;  %v488_v3 = vadd.f32 %v487_v15, %v485_v7  ;;  %1494 = vtanh.f32 %v471_v21 }
  0xa6   :  { %3850 = sst [smem:[#allocation78_spill]] %s2038_s3  ;;  %s2103_s28 = sld [smem:[#allocation6 + $0xb]]  ;;  %v3642_v2 = vstv %s2071_s0  ;;  %v1487_v61 = vpop.eup %1486 }
  0xa7   :  { %3851 = sst [smem:[#allocation79_spill]] %s2043_s20  ;;  %s2105_s15 = sld [smem:[#allocation6 + $0xc]]  ;;  %v491_v15 = vadd.f32 %v490_v63, %v488_v3 }
  0xa8   :  { %3852 = sst [smem:[#allocation80_spill]] %s2045_s19  ;;  %s2113_s29 = sld [smem:[#allocation6 + $0xe]]  ;;  %v3581_v50 = vstv %s2083_s7  ;;  %v1489_v34 = vpop.eup %1488 }
  0xa9   :  { %3853 = sst [smem:[#allocation81_spill]] %s2054_s10  ;;  %s2123_s16 = sld [smem:[#allocation6 + $0x10]]  ;;  %v3573_v56 = vstv %s2073_s5  ;;  %v494_v63 = vadd.f32 %v493_v14, %v491_v15  ;;  %v507_v15 = vmul.f32 %v1487_v61, %v3569_v37  ;;  %v509_v17 = vmul.f32 %v1489_v34, %v3574_v0 }
  0xaa   :  { %3854 = sst [smem:[#allocation82_spill]] %s2056_s8  ;;  %s2131_s11 = sld [smem:[#allocation6 + $0x12]]  ;;  %v3588_v6 = vstv %s2094_s30  ;;  %v526_v51 = vmul.f32 %v1487_v61, %v3573_v56  ;;  %v528_v38 = vmul.f32 %v1489_v34, %v3581_v50 }
  0xab   :  { %3855 = sst [smem:[#allocation83_spill]] %s2065_s26  ;;  %s2141_s4 = sld [smem:[#allocation6 + $0x14]]  ;;  %v497_v14 = vadd.f32 %v496_v13, %v494_v63 }
  0xac   :  { %3856 = sst [smem:[#allocation84_spill]] %s2067_s25  ;;  %s2149_s14 = sld [smem:[#allocation6 + $0x15]]  ;;  %v3639_v21 = vstv %s2103_s28  ;;  %v1491_v47 = vpop.eup %1490 }
  0xad   :  { %3857 = sst [smem:[#allocation85_spill]] %s2071_s0  ;;  %s2085_s25 = sld [smem:[#allocation6 + $0x8]]  ;;  %v1493_v37 = vpop.eup %1492  ;;  %v512_v56 = vmul.f32 %v1491_v47, %v3632_v22 }
  0xae   :  { %3858 = sst [smem:[#allocation86_spill]] %s2073_s5  ;;  %s2162_s23 = sld [smem:[#allocation6 + $0x17]]  ;;  %v534_v50 = vmul.f32 %v1493_v37, %v3588_v6 }
  0xaf   :  { %3859 = sst [smem:[#allocation87_spill]] %s2083_s7  ;;  %s2164_s24 = sld [smem:[#allocation7]] }
  0xb0   :  { %3861 = sst [smem:[#allocation89_spill]] %s2094_s30  ;;  %s2168_s18 = sld [smem:[#allocation7 + $0x1]] }
  0xb1   :  { %3862 = sst [smem:[#allocation90_spill]] %s2096_s1  ;;  %s2111_s1 = sld [smem:[#allocation6 + $0xd]]  ;;  %v3629_v31 = vstv %s2141_s4 }
  0xb2   :  { %3863 = sst [smem:[#allocation91_spill]] %s2103_s28  ;;  %s2170_s6 = sld [smem:[#allocation7 + $0x2]]  ;;  %v3624_v26 = vstv %s2149_s14 }
  0xb3   :  { %3860 = sst [smem:[#allocation88_spill]] %s2085_s25  ;;  %s2177_s12 = sld [smem:[#allocation7 + $0x3]]  ;;  %v3631_v41 = vstv %s2085_s25 }
  0xb4   :  { %3864 = sst [smem:[#allocation92_spill]] %s2105_s15  ;;  %s2121_s15 = sld [smem:[#allocation6 + $0xf]]  ;;  %v531_v0 = vmul.f32 %v1491_v47, %v3631_v41 }
  0xb5   :  { %3866 = sst [smem:[#allocation94_spill]] %s2113_s29  ;;  %s2129_s29 = sld [smem:[#allocation6 + $0x11]]  ;;  %v3668_v57 = vstv %s2164_s24 }
  0xb6   :  { %3868 = sst [smem:[#allocation96_spill]] %s2123_s16  ;;  %s2139_s16 = sld [smem:[#allocation6 + $0x13]]  ;;  %v3667_v7 = vstv %s2168_s18 }
  0xb7   :  { %3865 = sst [smem:[#allocation93_spill]] %s2111_s1  ;;  %s2187_s9 = sld [smem:[#allocation9 + $0x2]]  ;;  %v3580_v55 = vstv %s2111_s1 }
  0xb8   :  { %3870 = sst [smem:[#allocation98_spill]] %s2131_s11  ;;  %s2197_s27 = sld [smem:[#allocation9 + $0x3]]  ;;  %v3665_v59 = vstv %s2170_s6  ;;  %v547_v13 = vmul.f32 %v1489_v34, %v3580_v55  ;;  %v529_v55 = vadd.f32 %v528_v38, %v526_v51 }
  0xb9   :  { %3872 = sst [smem:[#allocation100_spill]] %s2141_s4  ;;  %s2151_s11 = sld [smem:[#allocation6 + $0x16]] }
  0xba   :  { %3867 = sst [smem:[#allocation95_spill]] %s2121_s15  ;;  %s2199_s22 = sld [smem:[#allocation9 + $0x4]]  ;;  %v3625_v39 = vstv %s2121_s15 }
  0xbb   :  { %3869 = sst [smem:[#allocation97_spill]] %s2129_s29  ;;  %s3886_s13 = sld [smem:[#allocation84_spill]]  ;;  %v3638_v3 = vstv %s2129_s29 }
  0xbc   :  { %3871 = sst [smem:[#allocation99_spill]] %s2139_s16  ;;  %s2204_s2 = sld [smem:[#allocation9 + $0x5]]  ;;  %v3630_v11 = vstv %s2139_s16 }
  0xbd   :  { %3873 = sst [smem:[#allocation101_spill]] %s2149_s14  ;;  %s2215_s21 = sld [smem:[#allocation9 + $0x8]] }
  0xbe   :  { %3875 = sst [smem:[#allocation103_spill]] %s2162_s23  ;;  %s2179_s23 = sld [smem:[#allocation9]] }
  0xbf   :  { %3874 = sst [smem:[#allocation102_spill]] %s2151_s11  ;;  %s2185_s11 = sld [smem:[#allocation9 + $0x1]] }
  0xc0   :  { %3876 = sst [smem:[#allocation104_spill]] %s2164_s24  ;;  %s2220_s17 = sld [smem:[#allocation9 + $0x9]] }
  0xc1   :  { %3877 = sst [smem:[#allocation105_spill]] %s2168_s18  ;;  %v3597_v1 = vstv %s3886_s13  ;;  %s2230_s3 = sld [smem:[#allocation9 + $0xc]] }
  0xc2   :  { %3878 = sst [smem:[#allocation106_spill]] %s2170_s6  ;;  %s2242_s0 = sld [smem:[#allocation9 + $0xf]] }
  0xc3   :  { %3879 = sst [smem:[#allocation107_spill]] %s2177_s12  ;;  %s3902_s24 = sld [smem:[#allocation98_spill]] }
  0xc4   :  { %3880 = sst [smem:[#allocation108_spill]] %s2179_s23  ;;  %s2264_s18 = sld [smem:[#allocation9 + $0x15]] }
  0xc5   :  { %3881 = sst [smem:[#allocation109_spill]] %s2185_s11  ;;  %s3899_s11 = sld [smem:[#allocation96_spill]] }
  0xc6   :  { %3882 = sst [smem:[#allocation110_spill]] %s2187_s9  ;;  %s2206_s9 = sld [smem:[#allocation9 + $0x6]] }
  0xc7   :  { %3883 = sst [smem:[#allocation111_spill]] %s2197_s27  ;;  %s2234_s27 = sld [smem:[#allocation9 + $0xd]] }
  0xc8   :  { %3884 = sst [smem:[#allocation112_spill]] %s2199_s22  ;;  %s2213_s22 = sld [smem:[#allocation9 + $0x7]] }
  0xc9   :  { %3885 = sst [smem:[#allocation113_spill]] %s2204_s2  ;;  %s3892_s2 = sld [smem:[#allocation90_spill]]  ;;  %v3579_v33 = vstv %s3902_s24 }
  0xca   :  { %3889 = sst [smem:[#allocation116_spill]] %s2215_s21  ;;  %s2228_s21 = sld [smem:[#allocation9 + $0xb]]  ;;  %v564_v63 = vmul.f32 %v1487_v61, %v3579_v33  ;;  %v515_v33 = vmul.f32 %v1493_v37, %v3626_v48  ;;  %v3757_v44 = vstv %s2264_s18 }
  0xcb   :  { %3890 = sst [smem:[#allocation117_spill]] %s2220_s17  ;;  %s3896_s17 = sld [smem:[#allocation94_spill]]  ;;  %v3623_v58 = vstv %s3899_s11 }
  0xcc   :  { %3887 = sst [smem:[#allocation114_spill]] %s2206_s9  ;;  %s2222_s9 = sld [smem:[#allocation9 + $0xa]] }
  0xcd   :  { %3894 = sst [smem:[#allocation120_spill]] %s2230_s3  ;;  %s2244_s3 = sld [smem:[#allocation9 + $0x10]] }
  0xce   :  { %3888 = sst [smem:[#allocation115_spill]] %s2213_s22  ;;  %s3895_s22 = sld [smem:[#allocation92_spill]] }
  0xcf   :  { %3897 = sst [smem:[#allocation121_spill]] %s2234_s27  ;;  %v3596_v40 = vstv %s3892_s2  ;;  %s2249_s27 = sld [smem:[#allocation9 + $0x11]] }
  0xd0   :  { %3893 = sst [smem:[#allocation119_spill]] %s2228_s21  ;;  %s3905_s21 = sld [smem:[#allocation102_spill]] }
  0xd1   :  { %3900 = sst [smem:[#allocation123_spill]] %s2242_s0  ;;  %v3585_v8 = vstv %s3896_s17  ;;  %s2257_s0 = sld [smem:[#allocation9 + $0x13]] }
  0xd2   :  { %3891 = sst [smem:[#allocation118_spill]] %s2222_s9  ;;  %s2236_s9 = sld [smem:[#allocation9 + $0xe]]  ;;  %v550_v49 = vmul.f32 %v1491_v47, %v3585_v8  ;;  %v553_v8 = vmul.f32 %v1493_v37, %v3625_v39 }
  0xd3   :  { %3901 = sst [smem:[#allocation124_spill]] %s2244_s3  ;;  %s2259_s3 = sld [smem:[#allocation9 + $0x14]] }
  0xd4   :  { %v3572_v60 = vstv %s3895_s22  ;;  %3908 = sst [smem:[#allocation129_spill]] %s2264_s18  ;;  %s2284_s6 = sld [smem:[#allocation10 + $0x2]] }
  0xd5   :  { %3903 = sst [smem:[#allocation125_spill]] %s2249_s27  ;;  %v545_v32 = vmul.f32 %v1487_v61, %v3572_v60  ;;  %s2294_s5 = sld [smem:[#allocation10 + $0x3]]  ;;  %v499_v60 = vadd.f32 %v3584_v16, %v497_v14  ;;  %v510_v61 = vadd.f32 %v509_v17, %v507_v15  ;;  %v1495_v14 = vpop.eup %1494  ;;  %v566_v17 = vmul.f32 %v1489_v34, %v3630_v11 }
  0xd6   :  { %v3622_v35 = vstv %s3905_s21  ;;  %s2296_s22 = sld [smem:[#allocation10 + $0x4]]  ;;  %s2306_s7 = sld [smem:[#allocation10 + $0x5]]  ;;  %v518_v51 = vmul.f32 %v1495_v14, %v3597_v1  ;;  %v532_v15 = vadd.f32 %v531_v0, %v529_v55  ;;  %v556_v55 = vmul.f32 %v1495_v14, %v3623_v58 }
  0xd7   :  { %3906 = sst [smem:[#allocation127_spill]] %s2257_s0  ;;  %s2274_s0 = sld [smem:[#allocation10]]  ;;  %1496 = vtanh.f32 %v499_v60  ;;  %v548_v16 = vadd.f32 %v547_v13, %v545_v32  ;;  %v513_v38 = vadd.f32 %v512_v56, %v510_v61  ;;  %v537_v32 = vmul.f32 %v1495_v14, %v3596_v40 }
  0xd8   :  { %3898 = sst [smem:[#allocation122_spill]] %s2236_s9  ;;  %s2251_s9 = sld [smem:[#allocation9 + $0x12]]  ;;  %v567_v60 = vadd.f32 %v566_v17, %v564_v63  ;;  %v569_v13 = vmul.f32 %v1491_v47, %v3629_v31  ;;  %v535_v61 = vadd.f32 %v534_v50, %v532_v15  ;;  %v572_v0 = vmul.f32 %v1493_v37, %v3624_v26 }
  0xd9   :  { %3907 = sst [smem:[#allocation128_spill]] %s2259_s3  ;;  %s2272_s3 = sld [smem:[#allocation9 + $0x17]]  ;;  %v551_v34 = vadd.f32 %v550_v49, %v548_v16  ;;  %v516_v56 = vadd.f32 %v515_v33, %v513_v38  ;;  %v3664_v49 = vstv %s2177_s12  ;;  %v3699_v16 = vstv %s2179_s23 }
  0xda   :  { %3913 = sst [smem:[#allocation134_spill]] %s2284_s6  ;;  %s2308_s24 = sld [smem:[#allocation12]]  ;;  %v570_v1 = vadd.f32 %v569_v13, %v567_v60  ;;  %v575_v47 = vmul.f32 %v1495_v14, %v3622_v35  ;;  %v538_v63 = vadd.f32 %v537_v32, %v535_v61  ;;  %v3766_v22 = vstv %s2249_s27 }
  0xdb   :  { %3914 = sst [smem:[#allocation135_spill]] %s2294_s5  ;;  %s2314_s20 = sld [smem:[#allocation12 + $0x1]]  ;;  %v554_v40 = vadd.f32 %v553_v8, %v551_v34  ;;  %v519_v8 = vadd.f32 %v518_v51, %v516_v56  ;;  %v3750_v11 = vstv %s2294_s5 }
  0xdc   :  { %3915 = sst [smem:[#allocation136_spill]] %s2296_s22  ;;  %s3918_s1 = sld [smem:[#allocation103_spill]]  ;;  %v573_v17 = vadd.f32 %v572_v0, %v570_v1  ;;  %v3741_v62 = vstv %s2296_s22 }
  0xdd   :  { %3911 = sst [smem:[#allocation132_spill]] %s2274_s0  ;;  %s2316_s25 = sld [smem:[#allocation12 + $0x2]]  ;;  %v3755_v38 = vstv %s2274_s0  ;;  %v557_v14 = vadd.f32 %v556_v55, %v554_v40  ;;  %v3753_v55 = vstv %s2284_s6 }
  0xde   :  { %3904 = sst [smem:[#allocation126_spill]] %s2251_s9  ;;  %s2266_s9 = sld [smem:[#allocation9 + $0x16]]  ;;  %v576_v40 = vadd.f32 %v575_v47, %v573_v17 }
  0xdf   :  { %3910 = sst [smem:[#allocation131_spill]] %s2272_s3  ;;  %s2322_s26 = sld [smem:[#allocation12 + $0x3]] }
  0xe0   :  { %3916 = sst [smem:[#allocation137_spill]] %s2306_s7  ;;  %s2324_s17 = sld [smem:[#allocation12 + $0x4]] }
  0xe1   :  { %3917 = sst [smem:[#allocation138_spill]] %s2308_s24  ;;  %s2329_s30 = sld [smem:[#allocation12 + $0x5]]  ;;  %v1497_v0 = vpop.eup %1496 }
  0xe2   :  { %3919 = sst [smem:[#allocation139_spill]] %s2314_s20  ;;  %v3637_v6 = vstv %s3918_s1  ;;  %s2331_s8 = sld [smem:[#allocation13]]  ;;  %v521_v47 = vmul.f32 %v1497_v0, %v3642_v2  ;;  %v540_v17 = vmul.f32 %v1497_v0, %v3639_v21  ;;  %v559_v48 = vmul.f32 %v1497_v0, %v3638_v3 }
  0xe3   :  { %3920 = sst [smem:[#allocation140_spill]] %s2316_s25  ;;  %s3925_s15 = sld [smem:[#allocation109_spill]]  ;;  %v578_v31 = vmul.f32 %v1497_v0, %v3637_v6 }
  0xe4   :  { %3909 = sst [smem:[#allocation130_spill]] %s2266_s9  ;;  %s2282_s9 = sld [smem:[#allocation10 + $0x1]]  ;;  %v522_v0 = vadd.f32 %v521_v47, %v519_v8  ;;  %v541_v6 = vadd.f32 %v540_v17, %v538_v63  ;;  %v560_v3 = vadd.f32 %v559_v48, %v557_v14  ;;  %v3748_v47 = vstv %s2306_s7 }
  0xe5   :  { %3921 = sst [smem:[#allocation141_spill]] %s2322_s26  ;;  %s3926_s16 = sld [smem:[#allocation110_spill]]  ;;  %v579_v21 = vadd.f32 %v578_v31, %v576_v40  ;;  %v3749_v40 = vstv %s2272_s3  ;;  %v3760_v17 = vstv %s2308_s24 }
  0xe6   :  { %3922 = sst [smem:[#allocation142_spill]] %s2324_s17  ;;  %s3927_s10 = sld [smem:[#allocation111_spill]]  ;;  %v524_v31 = vadd.f32 %v3668_v57, %v522_v0  ;;  %v543_v48 = vadd.f32 %v3667_v7, %v541_v6  ;;  %v562_v8 = vadd.f32 %v3665_v59, %v560_v3  ;;  %v3765_v6 = vstv %s2314_s20 }
  0xe7   :  { %3923 = sst [smem:[#allocation143_spill]] %s2329_s30  ;;  %s2341_s13 = sld [smem:[#allocation12 + $0x6]]  ;;  %v581_v14 = vadd.f32 %v3664_v49, %v579_v21 }
  0xe8   :  { %3924 = sst [smem:[#allocation144_spill]] %s2331_s8  ;;  %s2343_s19 = sld [smem:[#allocation12 + $0x7]]  ;;  %1498 = vtanh.f32 %v524_v31 }
  0xe9   :  { %s3930_s2 = sld [smem:[#allocation112_spill]]  ;;  %s2347_s4 = sld [smem:[#allocation12 + $0x8]]  ;;  %v3706_v33 = vstv %s3925_s15  ;;  %1500 = vtanh.f32 %v543_v48 }
  0xea   :  { %3912 = sst [smem:[#allocation133_spill]] %s2282_s9  ;;  %s3932_s8 = sld [smem:[#allocation113_spill]]  ;;  %v3754_v51 = vstv %s2282_s9  ;;  %1502 = vtanh.f32 %v562_v8 }
  0xeb   :  { %s2349_s30 = sld [smem:[#allocation12 + $0x9]]  ;;  %s3934_s11 = sld [smem:[#allocation114_spill]]  ;;  %v3710_v37 = vstv %s3926_s16  ;;  %1504 = vtanh.f32 %v581_v14 }
  0xec   :  { %s3935_s14 = sld [smem:[#allocation115_spill]]  ;;  %v3776_v50 = vstv %s3927_s10  ;;  %s2358_s17 = sld [smem:[#allocation12 + $0xb]] }
  0xed   :  { %3928 = sst [smem:[#allocation145_spill]] %s2341_s13  ;;  %s3937_s13 = sld [smem:[#allocation116_spill]] }
  0xee   :  { %3929 = sst [smem:[#allocation146_spill]] %s2343_s19  ;;  %s2356_s19 = sld [smem:[#allocation12 + $0xa]] }
  0xef   :  { %3931 = sst [smem:[#allocation147_spill]] %s2347_s4  ;;  %s3939_s23 = sld [smem:[#allocation117_spill]]  ;;  %v3701_v15 = vstv %s3930_s2 }
  0xf0   :  { %s3940_s4 = sld [smem:[#allocation118_spill]]  ;;  %s3942_s21 = sld [smem:[#allocation119_spill]]  ;;  %v3705_v34 = vstv %s3932_s8 }
  0xf1   :  { %3933 = sst [smem:[#allocation148_spill]] %s2349_s30  ;;  %s2361_s30 = sld [smem:[#allocation13 + $0x1]]  ;;  %v3709_v60 = vstv %s3934_s11 }
  0xf2   :  { %3938 = sst [smem:[#allocation150_spill]] %s2358_s17  ;;  %s2363_s26 = sld [smem:[#allocation12 + $0xc]]  ;;  %v3774_v1 = vstv %s3935_s14  ;;  %v1499_v29 = vpop.eup %1498 }
  0xf3   :  { %s3944_s10 = sld [smem:[#allocation120_spill]]  ;;  %s2368_s16 = sld [smem:[#allocation12 + $0xd]]  ;;  %v3700_v32 = vstv %s3937_s13  ;;  %v1501_v14 = vpop.eup %1500  ;;  %v587_v57 = vmul.f32 %v1499_v29, %v3699_v16  ;;  %v600_v0 = vmul.f32 %v1499_v29, %v3701_v15 }
  0xf4   :  { %3936 = sst [smem:[#allocation149_spill]] %s2356_s19  ;;  %s3946_s15 = sld [smem:[#allocation121_spill]]  ;;  %v613_v8 = vmul.f32 %v1499_v29, %v3700_v32  ;;  %v1503_v49 = vpop.eup %1502  ;;  %v589_v54 = vmul.f32 %v1501_v14, %v3706_v33  ;;  %v602_v21 = vmul.f32 %v1501_v14, %v3705_v34 }
  0xf5   :  { %s2370_s17 = sld [smem:[#allocation12 + $0xe]]  ;;  %s3949_s0 = sld [smem:[#allocation123_spill]]  ;;  %v3704_v13 = vstv %s3939_s23  ;;  %v1505_v16 = vpop.eup %1504  ;;  %v592_v32 = vmul.f32 %v1503_v49, %v3710_v37  ;;  %v605_v15 = vmul.f32 %v1503_v49, %v3709_v60 }
  0xf6   :  { %s3948_s19 = sld [smem:[#allocation122_spill]]  ;;  %s2376_s25 = sld [smem:[#allocation12 + $0xf]]  ;;  %v3707_v56 = vstv %s3940_s4  ;;  %v3772_v61 = vstv %s3942_s21  ;;  %v615_v46 = vmul.f32 %v1501_v14, %v3704_v13  ;;  %v595_v13 = vmul.f32 %v1505_v16, %v3776_v50 }
  0xf7   :  { %3941 = sst [smem:[#allocation151_spill]] %s2361_s30  ;;  %s2383_s11 = sld [smem:[#allocation12 + $0x11]]  ;;  %v603_v34 = vadd.f32 %v602_v21, %v600_v0  ;;  %v608_v33 = vmul.f32 %v1505_v16, %v3774_v1  ;;  %v641_v21 = vmul.f32 %v1501_v14, %v3766_v22 }
  0xf8   :  { %3943 = sst [smem:[#allocation152_spill]] %s2363_s26  ;;  %s2378_s26 = sld [smem:[#allocation12 + $0x10]] }
  0xf9   :  { %3945 = sst [smem:[#allocation153_spill]] %s2368_s16  ;;  %s3954_s14 = sld [smem:[#allocation124_spill]]  ;;  %v3702_v35 = vstv %s3944_s10  ;;  %v3769_v53 = vstv %s2368_s16 }
  0xfa   :  { %s2385_s8 = sld [smem:[#allocation13 + $0x2]]  ;;  %v3703_v58 = vstv %s3946_s15  ;;  %s2393_s13 = sld [smem:[#allocation12 + $0x13]]  ;;  %v626_v25 = vmul.f32 %v1499_v29, %v3702_v35  ;;  %v618_v35 = vmul.f32 %v1503_v49, %v3707_v56  ;;  %v616_v56 = vadd.f32 %v615_v46, %v613_v8 }
  0xfb   :  { %3947 = sst [smem:[#allocation154_spill]] %s2370_s17  ;;  %s3956_s9 = sld [smem:[#allocation126_spill]]  ;;  %v3771_v39 = vstv %s3949_s0  ;;  %v3777_v52 = vstv %s2370_s17  ;;  %v628_v45 = vmul.f32 %v1501_v14, %v3703_v58  ;;  %v590_v58 = vadd.f32 %v589_v54, %v587_v57 }
  0xfc   :  { %3951 = sst [smem:[#allocation155_spill]] %s2376_s25  ;;  %v3708_v26 = vstv %s3948_s19  ;;  %s2391_s23 = sld [smem:[#allocation12 + $0x12]]  ;;  %v634_v37 = vmul.f32 %v1505_v16, %v3771_v39  ;;  %v606_v57 = vadd.f32 %v605_v15, %v603_v34 }
  0xfd   :  { %3953 = sst [smem:[#allocation157_spill]] %s2383_s11  ;;  %s3958_s6 = sld [smem:[#allocation127_spill]]  ;;  %v631_v42 = vmul.f32 %v1503_v49, %v3708_v26  ;;  %v621_v26 = vmul.f32 %v1505_v16, %v3772_v61  ;;  %v629_v60 = vadd.f32 %v628_v45, %v626_v25  ;;  %v593_v54 = vadd.f32 %v592_v32, %v590_v58 }
  0xfe   :  { %3952 = sst [smem:[#allocation156_spill]] %s2378_s26  ;;  %s2403_s21 = sld [smem:[#allocation12 + $0x14]]  ;;  %v619_v25 = vadd.f32 %v618_v35, %v616_v56  ;;  %v609_v15 = vadd.f32 %v608_v33, %v606_v57 }
  0xff   :  { %s3960_s4 = sld [smem:[#allocation128_spill]]  ;;  %s2405_s15 = sld [smem:[#allocation12 + $0x15]]  ;;  %v3768_v41 = vstv %s3954_s14  ;;  %v632_v45 = vadd.f32 %v631_v42, %v629_v60  ;;  %v596_v58 = vadd.f32 %v595_v13, %v593_v54  ;;  %v654_v60 = vmul.f32 %v1501_v14, %v3757_v44 }
 0x100   :  { %3955 = sst [smem:[#allocation158_spill]] %s2385_s8  ;;  %s2411_s28 = sld [smem:[#allocation12 + $0x16]]  ;;  %v3770_v59 = vstv %s2393_s13  ;;  %v639_v0 = vmul.f32 %v1499_v29, %v3768_v41  ;;  %v622_v42 = vadd.f32 %v621_v26, %v619_v25  ;;  %v611_v33 = vadd.f32 %v3754_v51, %v609_v15 }
 0x101   :  { %3957 = sst [smem:[#allocation159_spill]] %s2393_s13  ;;  %v3763_v36 = vstv %s3956_s9  ;;  %s2413_s19 = sld [smem:[#allocation12 + $0x17]]  ;;  %v635_v35 = vadd.f32 %v634_v37, %v632_v45  ;;  %v660_v14 = vmul.f32 %v1505_v16, %v3749_v40 }
 0x102   :  { %s3967_s1 = sld [smem:[#allocation130_spill]]  ;;  %s2415_s10 = sld [smem:[#allocation13 + $0x3]]  ;;  %v3764_v30 = vstv %s2391_s23  ;;  %v644_v46 = vmul.f32 %v1503_v49, %v3763_v36  ;;  %v642_v34 = vadd.f32 %v641_v21, %v639_v0  ;;  %v624_v26 = vadd.f32 %v3753_v55, %v622_v42 }
 0x103   :  { %s2417_s5 = sld [smem:[#allocation12 + $0x18]]  ;;  %v3759_v2 = vstv %s3958_s6  ;;  %s2423_s9 = sld [smem:[#allocation12 + $0x19]] }
 0x104   :  { %3959 = sst [smem:[#allocation160_spill]] %s2403_s21  ;;  %s3971_s27 = sld [smem:[#allocation140_spill]]  ;;  %v647_v8 = vmul.f32 %v1505_v16, %v3759_v2  ;;  %v645_v13 = vadd.f32 %v644_v46, %v642_v34 }
 0x105   :  { %3961 = sst [smem:[#allocation161_spill]] %s2405_s15  ;;  %v3758_v23 = vstv %s3960_s4  ;;  %s2425_s14 = sld [smem:[#allocation12 + $0x1a]] }
 0x106   :  { %3964 = sst [smem:[#allocation162_spill]] %s2411_s28  ;;  %s2436_s4 = sld [smem:[#allocation12 + $0x1c]]  ;;  %v652_v32 = vmul.f32 %v1499_v29, %v3758_v23  ;;  %v598_v29 = vadd.f32 %v3755_v38, %v596_v58  ;;  %v648_v57 = vadd.f32 %v647_v8, %v645_v13 }
 0x107   :  { %3966 = sst [smem:[#allocation163_spill]] %s2413_s19  ;;  %s3979_s0 = sld [smem:[#allocation145_spill]] }
 0x108   :  { %3968 = sst [smem:[#allocation164_spill]] %s2415_s10  ;;  %v3756_v63 = vstv %s3967_s1  ;;  %s2434_s10 = sld [smem:[#allocation12 + $0x1b]]  ;;  %v655_v37 = vadd.f32 %v654_v60, %v652_v32  ;;  %1506 = vtanh.f32 %v598_v29  ;;  %v650_v46 = vadd.f32 %v3741_v62, %v648_v57 }
 0x109   :  { %3969 = sst [smem:[#allocation165_spill]] %s2417_s5  ;;  %s2443_s6 = sld [smem:[#allocation12 + $0x1d]]  ;;  %v657_v56 = vmul.f32 %v1503_v49, %v3756_v63  ;;  %v637_v49 = vadd.f32 %v3750_v11, %v635_v35  ;;  %1508 = vtanh.f32 %v611_v33 }
 0x10a   :  { %3970 = sst [smem:[#allocation166_spill]] %s2423_s9  ;;  %s3981_s30 = sld [smem:[#allocation146_spill]]  ;;  %v3773_v3 = vstv %s3971_s27  ;;  %1510 = vtanh.f32 %v624_v26 }
 0x10b   :  { %3972 = sst [smem:[#allocation167_spill]] %s2425_s14  ;;  %s2445_s14 = sld [smem:[#allocation13 + $0x4]]  ;;  %v658_v25 = vadd.f32 %v657_v56, %v655_v37  ;;  %1512 = vtanh.f32 %v637_v49 }
 0x10c   :  { %3977 = sst [smem:[#allocation169_spill]] %s2436_s4  ;;  %s3983_s29 = sld [smem:[#allocation147_spill]]  ;;  %1514 = vtanh.f32 %v650_v46 }
 0x10d   :  { %s3984_s1 = sld [smem:[#allocation148_spill]]  ;;  %s2452_s4 = sld [smem:[#allocation12 + $0x1f]]  ;;  %v3761_v31 = vstv %s3979_s0  ;;  %v661_v32 = vadd.f32 %v660_v14, %v658_v25 }
 0x10e   :  { %3975 = sst [smem:[#allocation168_spill]] %s2434_s10  ;;  %s2450_s10 = sld [smem:[#allocation12 + $0x1e]] }
 0x10f   :  { %3980 = sst [smem:[#allocation170_spill]] %s2443_s6  ;;  %s3990_s7 = sld [smem:[#allocation152_spill]]  ;;  %v663_v49 = vadd.f32 %v3748_v47, %v661_v32 }
 0x110   :  { %s2459_s27 = sld [smem:[#allocation12 + $0x21]]  ;;  %v3767_v7 = vstv %s3981_s30  ;;  %s2464_s5 = sld [smem:[#allocation12 + $0x22]] }
 0x111   :  { %3982 = sst [smem:[#allocation171_spill]] %s2445_s14  ;;  %s2457_s14 = sld [smem:[#allocation12 + $0x20]]  ;;  %1516 = vtanh.f32 %v663_v49 }
 0x112   :  { %v3775_v48 = vstv %s3983_s29  ;;  %s2466_s22 = sld [smem:[#allocation12 + $0x23]]  ;;  %s2515_s24 = sld [smem:[#allocation13 + $0x5]] }
 0x113   :  { %3987 = sst [smem:[#allocation173_spill]] %s2452_s4  ;;  %s2525_s8 = sld [smem:[#allocation12 + $0x24]]  ;;  %v4079_v1 = vstv %s3984_s1 }
 0x114   :  { %3985 = sst [smem:[#allocation172_spill]] %s2450_s10  ;;  %s2527_s21 = sld [smem:[#allocation12 + $0x25]] }
 0x115   :  { %v3762_v43 = vstv %s3990_s7  ;;  %s2533_s18 = sld [smem:[#allocation12 + $0x26]]  ;;  %s2535_s11 = sld [smem:[#allocation12 + $0x27]] }
 0x116   :  { %3992 = sst [smem:[#allocation174_spill]] %s2459_s27  ;;  %s2541_s30 = sld [smem:[#allocation12 + $0x28]] }
 0x117   :  { %3991 = sst [smem:[#allocation152_spill]] %s2457_s14  ;;  %s2543_s3 = sld [smem:[#allocation12 + $0x29]] }
 0x118   :  { %3993 = sst [smem:[#allocation175_spill]] %s2464_s5  ;;  %s2549_s6 = sld [smem:[#allocation13 + $0x6]] }
 0x119   :  { %3994 = sst [smem:[#allocation176_spill]] %s2466_s22  ;;  %s2551_s27 = sld [smem:[#allocation12 + $0x2a]]  ;;  %v784_v0 = vstv %s2525_s8 }
 0x11a   :  { %4016 = sst [smem:[#allocation177_spill]] %s2515_s24  ;;  %s2557_s4 = sld [smem:[#allocation12 + $0x2b]]  ;;  %v786_v21 = vstv %s2527_s21 }
 0x11b   :  { %4018 = sst [smem:[#allocation178_spill]] %s2525_s8  ;;  %s2559_s12 = sld [smem:[#allocation12 + $0x2c]]  ;;  %v789_v45 = vstv %s2533_s18  ;;  %v792_v16 = vstv %s2535_s11 }
 0x11c   :  { %4020 = sst [smem:[#allocation179_spill]] %s2527_s21  ;;  %s2563_s20 = sld [smem:[#allocation12 + $0x2d]]  ;;  %v795_v8 = vstv %s2541_s30 }
 0x11d   :  { %4023 = sst [smem:[#allocation180_spill]] %s2535_s11  ;;  %s2565_s19 = sld [smem:[#allocation12 + $0x2e]]  ;;  %v798_v58 = vstv %s2543_s3 }
 0x11e   :  { %4025 = sst [smem:[#allocation181_spill]] %s2541_s30  ;;  %s2571_s29 = sld [smem:[#allocation12 + $0x2f]] }
 0x11f   :  { %4026 = sst [smem:[#allocation182_spill]] %s2543_s3  ;;  %s2573_s28 = sld [smem:[#allocation13 + $0x7]]  ;;  %v803_v35 = vstv %s2551_s27 }
 0x120   :  { %4028 = sst [smem:[#allocation183_spill]] %s2549_s6  ;;  %s2580_s0 = sld [smem:[#allocation12 + $0x30]]  ;;  %v805_v29 = vstv %s2557_s4 }
 0x121   :  { %4030 = sst [smem:[#allocation184_spill]] %s2551_s27  ;;  %s2582_s2 = sld [smem:[#allocation12 + $0x31]]  ;;  %v808_v33 = vstv %s2559_s12 }
 0x122   :  { %4034 = sst [smem:[#allocation185_spill]] %s2559_s12  ;;  %s2590_s14 = sld [smem:[#allocation12 + $0x32]]  ;;  %v811_v13 = vstv %s2563_s20 }
 0x123   :  { %4037 = sst [smem:[#allocation186_spill]] %s2563_s20  ;;  %s2592_s26 = sld [smem:[#allocation12 + $0x33]]  ;;  %v814_v37 = vstv %s2565_s19 }
 0x124   :  { %4038 = sst [smem:[#allocation187_spill]] %s2565_s19  ;;  %s2596_s15 = sld [smem:[#allocation12 + $0x34]] }
 0x125   :  { %4040 = sst [smem:[#allocation188_spill]] %s2571_s29  ;;  %s2598_s10 = sld [smem:[#allocation12 + $0x35]] }
 0x126   :  { %4041 = sst [smem:[#allocation189_spill]] %s2573_s28  ;;  %s4050_s21 = sld [smem:[#allocation196_spill]]  ;;  %v822_v46 = vstv %s2580_s0 }
 0x127   :  { %4042 = sst [smem:[#allocation190_spill]] %s2580_s0  ;;  %v824_v62 = vstv %s2582_s2  ;;  %s4062_s12 = sld [smem:[#allocation138_spill]] }
 0x128   :  { %4043 = sst [smem:[#allocation191_spill]] %s2582_s2  ;;  %v827_v55 = vstv %s2590_s14  ;;  %s4063_s25 = sld [smem:[#allocation145_spill]] }
 0x129   :  { %4045 = sst [smem:[#allocation192_spill]] %s2590_s14  ;;  %s4064_s19 = sld [smem:[#allocation139_spill]] }
 0x12a   :  { %4046 = sst [smem:[#allocation193_spill]] %s2592_s26  ;;  %s4065_s30 = sld [smem:[#allocation146_spill]] }
 0x12b   :  { %4047 = sst [smem:[#allocation194_spill]] %s2596_s15  ;;  %s4068_s9 = sld [smem:[#allocation32_spill]] }
 0x12c   :  { %4048 = sst [smem:[#allocation195_spill]] %s2598_s10  ;;  %v2609_v15 = vld [vmem:[%s4050_s21 + $0x8] sm:$0xff]  ;;  %v2614_v34 = vld [vmem:[%s4050_s21 + $0x18] sm:$0xff]  ;;  %s4069_s27 = sld [smem:[#allocation141_spill]] }
 0x12d   :  { %v2621_v60 = vld [vmem:[%s4050_s21 + $0x28] sm:$0xff]  ;;  %v2626_v56 = vld [vmem:[%s4050_s21 + $0x38] sm:$0xff]  ;;  %v884_v40 = vmul.f32 %v2609_v15, %v332_v4  ;;  %v885_v11 = vmul.f32 %v2614_v34, %v334_v5  ;;  %s4070_s28 = sld [smem:[#allocation142_spill]]  ;;  %s4071_s8 = sld [smem:[#allocation155_spill]] }
 0x12e   :  { %v2634_v26 = vld [vmem:[%s4050_s21 + $0x48] sm:$0xff]  ;;  %v2644_v25 = vld [vmem:[%s4050_s21 + $0x58] sm:$0xff]  ;;  %v887_v38 = vmul.f32 %v2621_v60, %v337_v9  ;;  %v2674_v4 = vmul.f32 %v2626_v56, %v340_v10  ;;  %s4072_s22 = sld [smem:[#allocation160_spill]]  ;;  %s4073_s5 = sld [smem:[#allocation149_spill]] }
 0x12f   :  { %v2651_v32 = vld [vmem:[%s4050_s21 + $0x68] sm:$0xff]  ;;  %v2656_v47 = vld [vmem:[%s4050_s21 + $0x78] sm:$0xff]  ;;  %v886_v23 = vadd.f32 %v885_v11, %v884_v40  ;;  %v2679_v5 = vmul.f32 %v2634_v26, %v343_v12  ;;  %v2684_v49 = vmul.f32 %v2644_v25, %v346_v18  ;;  %v2696_v11 = vpop.eup %1506  ;;  %v2703_v18 = vmul.f32 %v2609_v15, %v360_v20  ;;  %s4075_s6 = sld [smem:[#allocation156_spill]]  ;;  %s4076_s3 = sld [smem:[#allocation161_spill]] }
 0x130   :  { %v2689_v9 = vmul.f32 %v2651_v32, %v349_v19  ;;  %v2694_v10 = vmul.f32 %v2656_v47, %v352_v24  ;;  %v2708_v19 = vmul.f32 %v2614_v34, %v362_v27  ;;  %v2713_v24 = vmul.f32 %v2621_v60, %v365_v28  ;;  %v2715_v40 = vpop.eup %1508  ;;  %s4078_s24 = sld [smem:[#allocation165_spill]]  ;;  %s4080_s20 = sld [smem:[#allocation143_spill]] }
 0x131   :  { %v2698_v12 = vadd.f32 %v887_v38, %v886_v23  ;;  %v671_v23 = vmul.f32 %v2696_v11, %v3760_v17  ;;  %v690_v20 = vmul.f32 %v2696_v11, %v3761_v31  ;;  %v709_v38 = vmul.f32 %v2696_v11, %v3762_v43  ;;  %v2729_v2 = vpop.eup %1510  ;;  %s4085_s17 = sld [smem:[#allocation157_spill]]  ;;  %s4088_s1 = sld [smem:[#allocation166_spill]] }
 0x132   :  { %v728_v27 = vmul.f32 %v2696_v11, %v3764_v30  ;;  %v673_v28 = vmul.f32 %v2715_v40, %v3765_v6  ;;  %v692_v17 = vmul.f32 %v2715_v40, %v3767_v7  ;;  %v711_v31 = vmul.f32 %v2715_v40, %v3769_v53  ;;  %v2743_v36 = vpop.eup %1512  ;;  %s4147_s11 = sld [smem:[#allocation38_spill]]  ;;  %s4148_s14 = sld [smem:[#allocation39_spill]] }
 0x133   :  { %v730_v43 = vmul.f32 %v2715_v40, %v3770_v59  ;;  %v676_v30 = vmul.f32 %v2729_v2, %v3773_v3  ;;  %v695_v6 = vmul.f32 %v2729_v2, %v3775_v48  ;;  %v714_v22 = vmul.f32 %v2729_v2, %v3777_v52  ;;  %v2759_v53 = vpop.eup %1514  ;;  %s4149_s2 = sld [smem:[#allocation183_spill]]  ;;  %s4151_s0 = sld [smem:[#allocation40_spill]] }
 0x134   :  { %v4074_v7 = vstv %s4068_s9  ;;  %v674_v59 = vadd.f32 %v673_v28, %v671_v23  ;;  %v4077_v39 = vstv %s4069_s27  ;;  %v693_v3 = vadd.f32 %v692_v17, %v690_v20  ;;  %s4082_s9 = sld [smem:[#allocation150_spill]]  ;;  %s4086_s27 = sld [smem:[#allocation162_spill]] }
 0x135   :  { %v2757_v41 = vmul.f32 %v2626_v56, %v4074_v7  ;;  %v679_v61 = vmul.f32 %v2743_v36, %v4077_v39  ;;  %v698_v48 = vmul.f32 %v2743_v36, %v4079_v1  ;;  %v4081_v50 = vstv %s4070_s28  ;;  %v2779_v1 = vpop.eup %1516  ;;  %s4089_s28 = sld [smem:[#allocation167_spill]]  ;;  %s4171_s13 = sld [smem:[#allocation49_spill]] }
 0x136   :  { %v682_v52 = vmul.f32 %v2759_v53, %v4081_v50  ;;  %v712_v7 = vadd.f32 %v711_v31, %v709_v38  ;;  %v4083_v57 = vstv %s4071_s8  ;;  %v4084_v44 = vstv %s4072_s22  ;;  %s4093_s22 = sld [smem:[#allocation163_spill]]  ;;  %s4094_s8 = sld [smem:[#allocation168_spill]] }
 0x137   :  { %v717_v42 = vmul.f32 %v2743_v36, %v4083_v57  ;;  %v733_v23 = vmul.f32 %v2729_v2, %v4084_v44  ;;  %v677_v28 = vadd.f32 %v676_v30, %v674_v59  ;;  %v696_v39 = vadd.f32 %v695_v6, %v693_v3  ;;  %s4259_s16 = sld [smem:[#allocation100_spill]]  ;;  %s4438_s29 = sld [smem:[#allocation171_spill]] }
 0x138   :  { %v4087_v17 = vstv %s4073_s5  ;;  %v731_v63 = vadd.f32 %v730_v43, %v728_v27  ;;  %v715_v50 = vadd.f32 %v714_v22, %v712_v7  ;;  %v4090_v31 = vstv %s4075_s6  ;;  %s4097_s5 = sld [smem:[#allocation169_spill]]  ;;  %s4102_s6 = sld [smem:[#allocation144_spill]] }
 0x139   :  { %v701_v20 = vmul.f32 %v2759_v53, %v4087_v17  ;;  %v720_v38 = vmul.f32 %v2759_v53, %v4090_v31  ;;  %v4091_v57 = vstv %s4076_s3  ;;  %v4092_v51 = vstv %s4078_s24  ;;  %s4100_s24 = sld [smem:[#allocation172_spill]]  ;;  %s4101_s3 = sld [smem:[#allocation173_spill]] }
 0x13a   :  { %v736_v54 = vmul.f32 %v2743_v36, %v4091_v57  ;;  %v747_v30 = vmul.f32 %v2696_v11, %v4092_v51  ;;  %v680_v44 = vadd.f32 %v679_v61, %v677_v28  ;;  %v4095_v59 = vstv %s4080_s20  ;;  %s4104_s20 = sld [smem:[#allocation151_spill]]  ;;  %s4445_s4 = sld [smem:[#allocation188_spill]] }
 0x13b   :  { %v685_v43 = vmul.f32 %v2779_v1, %v4095_v59  ;;  %v699_v6 = vadd.f32 %v698_v48, %v696_v39  ;;  %v4096_v3 = vstv %s4082_s9  ;;  %v718_v22 = vadd.f32 %v717_v42, %v715_v50  ;;  %s4106_s9 = sld [smem:[#allocation152_spill]] }
 0x13c   :  { %v704_v27 = vmul.f32 %v2779_v1, %v4096_v3  ;;  %v4098_v7 = vstv %s4085_s17  ;;  %v734_v31 = vadd.f32 %v733_v23, %v731_v63  ;;  %v4099_v57 = vstv %s4086_s27  ;;  %s4107_s17 = sld [smem:[#allocation158_spill]] }
 0x13d   :  { %v723_v17 = vmul.f32 %v2779_v1, %v4098_v7  ;;  %v739_v14 = vmul.f32 %v2759_v53, %v4099_v57  ;;  %v683_v51 = vadd.f32 %v682_v52, %v680_v44  ;;  %v702_v61 = vadd.f32 %v701_v20, %v699_v6  ;;  %s4110_s27 = sld [smem:[#allocation174_spill]] }
 0x13e   :  { %v4103_v28 = vstv %s4088_s1  ;;  %v4105_v39 = vstv %s4089_s28  ;;  %v721_v42 = vadd.f32 %v720_v38, %v718_v22  ;;  %v737_v50 = vadd.f32 %v736_v54, %v734_v31  ;;  %s4112_s28 = sld [smem:[#allocation170_spill]]  ;;  %s4113_s1 = sld [smem:[#allocation175_spill]] }
 0x13f   :  { %v749_v48 = vmul.f32 %v2715_v40, %v4103_v28  ;;  %v752_v59 = vmul.f32 %v2729_v2, %v4105_v39  ;;  %v4108_v63 = vstv %s4093_s22  ;;  %v4109_v3 = vstv %s4094_s8  ;;  %s4118_s8 = sld [smem:[#allocation164_spill]] }
 0x140   :  { %v742_v23 = vmul.f32 %v2779_v1, %v4108_v63  ;;  %v755_v7 = vmul.f32 %v2743_v36, %v4109_v3  ;;  %v686_v52 = vadd.f32 %v685_v43, %v683_v51  ;;  %v705_v20 = vadd.f32 %v704_v27, %v702_v61  ;;  %s4139_s22 = sld [smem:[#allocation188_spill]] }
 0x141   :  { %v750_v44 = vadd.f32 %v749_v48, %v747_v30  ;;  %v4111_v6 = vstv %s4097_s5  ;;  %v724_v28 = vadd.f32 %v723_v17, %v721_v42  ;;  %v740_v39 = vadd.f32 %v739_v14, %v737_v50  ;;  %s4313_s5 = sld [smem:[#allocation122_spill]] }
 0x142   :  { %v758_v57 = vmul.f32 %v2759_v53, %v4111_v6  ;;  %v4114_v38 = vstv %s4100_s24  ;;  %v4116_v22 = vstv %s4101_s3  ;;  %v4117_v63 = vstv %s4102_s6  ;;  %s4123_s24 = sld [smem:[#allocation176_spill]]  ;;  %s4125_s3 = sld [smem:[#allocation33_spill]] }
 0x143   :  { %v766_v54 = vmul.f32 %v2696_v11, %v4114_v38  ;;  %v768_v31 = vmul.f32 %v2715_v40, %v4116_v22  ;;  %v688_v3 = vadd.f32 %v4117_v63, %v686_v52  ;;  %v4119_v43 = vstv %s4104_s20  ;;  %s4126_s20 = sld [smem:[#allocation197_spill]]  ;;  %s2905_s6 = sld [smem:[#allocation13 + $0x8]] }
 0x144   :  { %v707_v27 = vadd.f32 %v4119_v43, %v705_v20  ;;  %v753_v30 = vadd.f32 %v752_v59, %v750_v44  ;;  %v4121_v51 = vstv %s4106_s9  ;;  %v4122_v61 = vstv %s4107_s17  ;;  %s4142_s9 = sld [smem:[#allocation34_spill]] }
 0x145   :  { %v771_v17 = vmul.f32 %v2729_v2, %v4121_v51  ;;  %v726_v14 = vadd.f32 %v4122_v61, %v724_v28  ;;  %v743_v48 = vadd.f32 %v742_v23, %v740_v39  ;;  %v769_v42 = vadd.f32 %v768_v31, %v766_v54  ;;  %s4447_s17 = sld [smem:[#allocation194_spill]] }
 0x146   :  { %v4124_v50 = vstv %s4110_s27  ;;  %v756_v59 = vadd.f32 %v755_v7, %v753_v30  ;;  %v4127_v52 = vstv %s4112_s28  ;;  %v4129_v23 = vstv %s4113_s1  ;;  %s4136_s27 = sld [smem:[#allocation171_spill]] }
 0x147   :  { %v774_v6 = vmul.f32 %v2743_v36, %v4124_v50  ;;  %v761_v20 = vmul.f32 %v2779_v1, %v4127_v52  ;;  %v777_v44 = vmul.f32 %v2759_v53, %v4129_v23  ;;  %v785_v28 = vmul.f32 %v2696_v11, %v784_v0 }
 0x148   :  { %v4131_v39 = vstv %s4118_s8  ;;  %v772_v7 = vadd.f32 %v771_v17, %v769_v42  ;;  %v787_v54 = vmul.f32 %v2715_v40, %v786_v21  ;;  %v790_v22 = vmul.f32 %v2729_v2, %v789_v45 }
 0x149   :  { %841 = vst [vmem:[%s4126_s20] sm:$0xff] %v688_v3  ;;  %1452 = vst [vmem:[%s4126_s20 + $0x10] sm:$0xff] %v707_v27  ;;  %v745_v38 = vadd.f32 %v4131_v39, %v743_v48  ;;  %v759_v31 = vadd.f32 %v758_v57, %v756_v59  ;;  %v4134_v63 = vstv %s4123_s24  ;;  %v793_v43 = vmul.f32 %v2743_v36, %v792_v16  ;;  %4143 = sst [smem:[#allocation20_spill]] %s2905_s6 }
 0x14a   :  { %1453 = vst [vmem:[%s4126_s20 + $0x20] sm:$0xff] %v726_v14  ;;  %v780_v3 = vmul.f32 %v2779_v1, %v4134_v63  ;;  %v4137_v27 = vstv %s4125_s3  ;;  %v775_v51 = vadd.f32 %v774_v6, %v772_v7  ;;  %v788_v57 = vadd.f32 %v787_v54, %v785_v28  ;;  %s4140_s3 = sld [smem:[#allocation177_spill]] }
 0x14b   :  { %v909_v30 = vmul.f32 %v2634_v26, %v4137_v27  ;;  %1454 = vst [vmem:[%s4126_s20 + $0x30] sm:$0xff] %v745_v38  ;;  %v804_v17 = vmul.f32 %v2696_v11, %v803_v35  ;;  %v806_v61 = vmul.f32 %v2715_v40, %v805_v29  ;;  %v762_v14 = vadd.f32 %v761_v20, %v759_v31 }
 0x14c   :  { %v796_v48 = vmul.f32 %v2759_v53, %v795_v8  ;;  %v799_v42 = vmul.f32 %v2779_v1, %v798_v58  ;;  %v809_v50 = vmul.f32 %v2729_v2, %v808_v33  ;;  %v778_v6 = vadd.f32 %v777_v44, %v775_v51 }
 0x14d   :  { %v791_v59 = vadd.f32 %v790_v22, %v788_v57  ;;  %v807_v52 = vadd.f32 %v806_v61, %v804_v17  ;;  %v812_v23 = vmul.f32 %v2743_v36, %v811_v13  ;;  %v4141_v28 = vstv %s4136_s27  ;;  %s4170_s27 = sld [smem:[#allocation37_spill]] }
 0x14e   :  { %v764_v20 = vadd.f32 %v4141_v28, %v762_v14  ;;  %v823_v39 = vmul.f32 %v2696_v11, %v822_v46  ;;  %v825_v38 = vmul.f32 %v2715_v40, %v824_v62  ;;  %v828_v7 = vmul.f32 %v2729_v2, %v827_v55 }
 0x14f   :  { %v781_v44 = vadd.f32 %v780_v3, %v778_v6  ;;  %v794_v54 = vadd.f32 %v793_v43, %v791_v59  ;;  %v810_v22 = vadd.f32 %v809_v50, %v807_v52  ;;  %v815_v31 = vmul.f32 %v2759_v53, %v814_v37 }
 0x150   :  { %1455 = vst [vmem:[%s4126_s20 + $0x40] sm:$0xff] %v764_v20  ;;  %v4144_v11 = vstv %s4139_s22  ;;  %v826_v63 = vadd.f32 %v825_v38, %v823_v39  ;;  %v4145_v2 = vstv %s2592_s26  ;;  %v890_v43 = vadd.f32 %v2674_v4, %v2698_v12  ;;  %s4160_s22 = sld [smem:[#allocation28_spill]]  ;;  %s4161_s26 = sld [smem:[#allocation42_spill]] }
 0x151   :  { %v818_v40 = vmul.f32 %v2779_v1, %v4144_v11  ;;  %v831_v3 = vmul.f32 %v2743_v36, %v4145_v2  ;;  %v4146_v27 = vstv %s4140_s3  ;;  %v797_v57 = vadd.f32 %v796_v48, %v794_v54  ;;  %s4153_s3 = sld [smem:[#allocation41_spill]] }
 0x152   :  { %v783_v51 = vadd.f32 %v4146_v27, %v781_v44  ;;  %v813_v17 = vadd.f32 %v812_v23, %v810_v22  ;;  %v904_v61 = vadd.f32 %v2708_v19, %v2703_v18  ;;  %v829_v14 = vadd.f32 %v828_v7, %v826_v63 }
 0x153   :  { %v4150_v50 = vstv %s2596_s15  ;;  %v892_v36 = vadd.f32 %v2679_v5, %v890_v43  ;;  %v4152_v59 = vstv %s4142_s9  ;;  %v800_v12 = vadd.f32 %v799_v42, %v797_v57  ;;  %s4155_s15 = sld [smem:[#allocation189_spill]]  ;;  %s4157_s9 = sld [smem:[#allocation35_spill]] }
 0x154   :  { %v834_v6 = vmul.f32 %v2759_v53, %v4150_v50  ;;  %v911_v4 = vmul.f32 %v2644_v25, %v4152_v59  ;;  %1456 = vst [vmem:[%s4126_s20 + $0x50] sm:$0xff] %v783_v51  ;;  %v816_v48 = vadd.f32 %v815_v31, %v813_v17  ;;  %v4154_v52 = vstv %s2598_s10  ;;  %s4206_s10 = sld [smem:[#allocation67_spill]] }
 0x155   :  { %v837_v18 = vmul.f32 %v2779_v1, %v4154_v52  ;;  %v906_v19 = vadd.f32 %v2713_v24, %v904_v61  ;;  %v832_v53 = vadd.f32 %v831_v3, %v829_v14  ;;  %v894_v5 = vadd.f32 %v2684_v49, %v892_v36  ;;  %v2948_v24 = vld [vmem:[%s4050_s21 + $0x88] sm:$0xff]  ;;  %s4167_s21 = sld [smem:[#allocation43_spill]] }
 0x156   :  { %v4156_v23 = vstv %s4147_s11  ;;  %v4158_v20 = vstv %s4148_s14  ;;  %v4159_v42 = vstv %s4149_s2  ;;  %v819_v7 = vadd.f32 %v818_v40, %v816_v48  ;;  %s4163_s11 = sld [smem:[#allocation36_spill]]  ;;  %s4164_s14 = sld [smem:[#allocation46_spill]] }
 0x157   :  { %v920_v28 = vmul.f32 %v2609_v15, %v4156_v23  ;;  %v921_v39 = vmul.f32 %v2614_v34, %v4158_v20  ;;  %v802_v38 = vadd.f32 %v4159_v42, %v800_v12  ;;  %v908_v1 = vadd.f32 %v2757_v41, %v906_v19  ;;  %s4174_s2 = sld [smem:[#allocation44_spill]] }
 0x158   :  { %v4162_v49 = vstv %s4151_s0  ;;  %v835_v54 = vadd.f32 %v834_v6, %v832_v53  ;;  %v896_v22 = vadd.f32 %v2689_v9, %v894_v5  ;;  %v4165_v11 = vstv %s4153_s3  ;;  %s4168_s0 = sld [smem:[#allocation48_spill]]  ;;  %s4183_s3 = sld [smem:[#allocation57_spill]] }
 0x159   :  { %v923_v44 = vmul.f32 %v2621_v60, %v4162_v49  ;;  %v922_v31 = vadd.f32 %v921_v39, %v920_v28  ;;  %v925_v40 = vmul.f32 %v2626_v56, %v4165_v11  ;;  %1457 = vst [vmem:[%s4126_s20 + $0x60] sm:$0xff] %v802_v38  ;;  %v4166_v63 = vstv %s4155_s15  ;;  %s4175_s15 = sld [smem:[#allocation50_spill]] }
 0x15a   :  { %v821_v41 = vadd.f32 %v4166_v63, %v819_v7  ;;  %v839_v2 = vstv %s2905_s6  ;;  %v910_v3 = vadd.f32 %v909_v30, %v908_v1  ;;  %v4169_v43 = vstv %s4157_s9  ;;  %s4178_s9 = sld [smem:[#allocation45_spill]]  ;;  %s4187_s6 = sld [smem:[#allocation52_spill]] }
 0x15b   :  { %v913_v9 = vmul.f32 %v2651_v32, %v4169_v43  ;;  %v838_v27 = vadd.f32 %v837_v18, %v835_v54  ;;  %v4172_v51 = vstv %s4160_s22  ;;  %v924_v17 = vadd.f32 %v923_v44, %v922_v31  ;;  %s4182_s22 = sld [smem:[#allocation56_spill]] }
 0x15c   :  { %v899_v57 = vmul.f32 %v2948_v24, %v4172_v51  ;;  %v4173_v61 = vstv %s4161_s26  ;;  %1458 = vst [vmem:[%s4126_s20 + $0x70] sm:$0xff] %v821_v41  ;;  %v898_v30 = vadd.f32 %v2694_v10, %v896_v22  ;;  %v912_v50 = vadd.f32 %v911_v4, %v910_v3  ;;  %s4179_s26 = sld [smem:[#allocation51_spill]] }
 0x15d   :  { %v927_v14 = vmul.f32 %v2634_v26, %v4173_v61  ;;  %v4176_v6 = vstv %s4163_s11  ;;  %v4177_v59 = vstv %s4164_s14  ;;  %v840_v48 = vadd.f32 %v839_v2, %v838_v27  ;;  %s4186_s11 = sld [smem:[#allocation47_spill]]  ;;  %s4196_s14 = sld [smem:[#allocation60_spill]] }
 0x15e   :  { %v915_v36 = vmul.f32 %v2656_v47, %v4176_v6  ;;  %v938_v12 = vmul.f32 %v2609_v15, %v4177_v59  ;;  %v926_v52 = vadd.f32 %v925_v40, %v924_v17  ;;  %v4180_v18 = vstv %s4167_s21  ;;  %s4188_s21 = sld [smem:[#allocation58_spill]] }
 0x15f   :  { %v929_v19 = vmul.f32 %v2644_v25, %v4180_v18  ;;  %v4181_v53 = vstv %s4168_s0  ;;  %v914_v10 = vadd.f32 %v913_v9, %v912_v50  ;;  %v4184_v4 = vstv %s4170_s27  ;;  %1459 = vst [vmem:[%s4126_s20 + $0x80] sm:$0xff] %v840_v48  ;;  %s4191_s0 = sld [smem:[#allocation59_spill]]  ;;  %s4194_s27 = sld [smem:[#allocation53_spill]] }
 0x160   :  { %v939_v5 = vmul.f32 %v2614_v34, %v4181_v53  ;;  %v917_v23 = vmul.f32 %v2948_v24, %v4184_v4  ;;  %v4185_v28 = vstv %s4171_s13  ;;  %v928_v39 = vadd.f32 %v927_v14, %v926_v52  ;;  %s4192_s13 = sld [smem:[#allocation71_spill]] }
 0x161   :  { %v941_v20 = vmul.f32 %v2621_v60, %v4185_v28  ;;  %v4189_v42 = vstv %s4174_s2  ;;  %v4190_v1 = vstv %s4175_s15  ;;  %v900_v44 = vadd.f32 %v899_v57, %v898_v30  ;;  %s4199_s15 = sld [smem:[#allocation65_spill]]  ;;  %s4200_s2 = sld [smem:[#allocation72_spill]] }
 0x162   :  { %v931_v38 = vmul.f32 %v2651_v32, %v4189_v42  ;;  %v940_v7 = vadd.f32 %v939_v5, %v938_v12  ;;  %v943_v49 = vmul.f32 %v2626_v56, %v4190_v1  ;;  %v916_v54 = vadd.f32 %v915_v36, %v914_v10 }
 0x163   :  { %v4193_v22 = vstv %s4178_s9  ;;  %v4195_v11 = vstv %s4179_s26  ;;  %v930_v63 = vadd.f32 %v929_v19, %v928_v39  ;;  %v4197_v3 = vstv %s4182_s22  ;;  %s4202_s9 = sld [smem:[#allocation54_spill]]  ;;  %s4204_s26 = sld [smem:[#allocation66_spill]] }
 0x164   :  { %v933_v31 = vmul.f32 %v2656_v47, %v4193_v22  ;;  %v945_v40 = vmul.f32 %v2634_v26, %v4195_v11  ;;  %v942_v41 = vadd.f32 %v941_v20, %v940_v7  ;;  %v956_v43 = vmul.f32 %v2609_v15, %v4197_v3  ;;  %s4208_s22 = sld [smem:[#allocation61_spill]] }
 0x165   :  { %v4198_v9 = vstv %s4183_s3  ;;  %v918_v51 = vadd.f32 %v917_v23, %v916_v54  ;;  %v4201_v57 = vstv %s4186_s11  ;;  %v4203_v61 = vstv %s4187_s6  ;;  %s4210_s3 = sld [smem:[#allocation55_spill]]  ;;  %s4212_s6 = sld [smem:[#allocation62_spill]] }
 0x166   :  { %v957_v27 = vmul.f32 %v2614_v34, %v4198_v9  ;;  %v935_v17 = vmul.f32 %v2948_v24, %v4201_v57  ;;  %v947_v14 = vmul.f32 %v2644_v25, %v4203_v61  ;;  %v4205_v30 = vstv %s4188_s21  ;;  %s4214_s11 = sld [smem:[#allocation68_spill]] }
 0x167   :  { %v959_v50 = vmul.f32 %v2621_v60, %v4205_v30  ;;  %v932_v6 = vadd.f32 %v931_v38, %v930_v63  ;;  %v944_v36 = vadd.f32 %v943_v49, %v942_v41  ;;  %v4207_v12 = vstv %s4191_s0  ;;  %s4215_s21 = sld [smem:[#allocation76_spill]]  ;;  %s4220_s0 = sld [smem:[#allocation69_spill]] }
 0x168   :  { %v958_v59 = vadd.f32 %v957_v27, %v956_v43  ;;  %v961_v48 = vmul.f32 %v2626_v56, %v4207_v12  ;;  %v4209_v52 = vstv %s4192_s13  ;;  %v4211_v19 = vstv %s4194_s27  ;;  %s4222_s13 = sld [smem:[#allocation63_spill]]  ;;  %s4226_s27 = sld [smem:[#allocation70_spill]] }
 0x169   :  { %v901_v18 = vadd.f32 %v900_v44, %v4209_v52  ;;  %v949_v53 = vmul.f32 %v2651_v32, %v4211_v19  ;;  %v4213_v5 = vstv %s4196_s14  ;;  %v934_v4 = vadd.f32 %v933_v31, %v932_v6  ;;  %s4229_s14 = sld [smem:[#allocation64_spill]] }
 0x16a   :  { %v963_v10 = vmul.f32 %v2634_v26, %v4213_v5  ;;  %v946_v23 = vadd.f32 %v945_v40, %v944_v36  ;;  %v960_v28 = vadd.f32 %v959_v50, %v958_v59  ;;  %v4216_v20 = vstv %s4199_s15  ;;  %s4230_s15 = sld [smem:[#allocation73_spill]] }
 0x16b   :  { %v974_v39 = vmul.f32 %v2609_v15, %v4216_v20  ;;  %v4217_v42 = vstv %s4200_s2  ;;  %v4218_v7 = vstv %s4202_s9  ;;  %v4219_v49 = vstv %s4204_s26  ;;  %s4231_s2 = sld [smem:[#allocation77_spill]]  ;;  %s4233_s9 = sld [smem:[#allocation74_spill]] }
 0x16c   :  { %v919_v38 = vadd.f32 %v918_v51, %v4217_v42  ;;  %v951_v1 = vmul.f32 %v2656_v47, %v4218_v7  ;;  %v975_v44 = vmul.f32 %v2614_v34, %v4219_v49  ;;  %v4221_v54 = vstv %s4206_s10  ;;  %s4235_s26 = sld [smem:[#allocation75_spill]]  ;;  %s4237_s10 = sld [smem:[#allocation78_spill]] }
 0x16d   :  { %v977_v22 = vmul.f32 %v2621_v60, %v4221_v54  ;;  %v936_v11 = vadd.f32 %v935_v17, %v934_v4  ;;  %v948_v31 = vadd.f32 %v947_v14, %v946_v23  ;;  %v962_v40 = vadd.f32 %v961_v48, %v960_v28 }
 0x16e   :  { %v4223_v63 = vstv %s4208_s22  ;;  %v4224_v15 = vstv %s4210_s3  ;;  %v4225_v43 = vstv %s4212_s6  ;;  %v976_v27 = vadd.f32 %v975_v44, %v974_v39  ;;  %s4239_s22 = sld [smem:[#allocation80_spill]]  ;;  %s4240_s3 = sld [smem:[#allocation86_spill]] }
 0x16f   :  { %v965_v41 = vmul.f32 %v2644_v25, %v4223_v63  ;;  %v953_v3 = vmul.f32 %v2948_v24, %v4224_v15  ;;  %v967_v9 = vmul.f32 %v2651_v32, %v4225_v43  ;;  %v4227_v51 = vstv %s4214_s11  ;;  %s4242_s6 = sld [smem:[#allocation92_spill]]  ;;  %s4244_s11 = sld [smem:[#allocation81_spill]] }
 0x170   :  { %v979_v34 = vmul.f32 %v2626_v56, %v4227_v51  ;;  %v4228_v57 = vstv %s4215_s21  ;;  %v950_v17 = vadd.f32 %v949_v53, %v948_v31  ;;  %v964_v61 = vadd.f32 %v963_v10, %v962_v40  ;;  %s4246_s21 = sld [smem:[#allocation87_spill]] }
 0x171   :  { %v937_v60 = vadd.f32 %v936_v11, %v4228_v57  ;;  %1518 = vtanh.f32 %v901_v18  ;;  %v978_v14 = vadd.f32 %v977_v22, %v976_v27  ;;  %v4232_v30 = vstv %s4220_s0  ;;  %s4247_s0 = sld [smem:[#allocation93_spill]] }
 0x172   :  { %v981_v50 = vmul.f32 %v2634_v26, %v4232_v30  ;;  %1520 = vtanh.f32 %v919_v38  ;;  %v952_v6 = vadd.f32 %v951_v1, %v950_v17  ;;  %v966_v36 = vadd.f32 %v965_v41, %v964_v61 }
 0x173   :  { %v4234_v59 = vstv %s4222_s13  ;;  %1522 = vtanh.f32 %v937_v60  ;;  %v980_v56 = vadd.f32 %v979_v34, %v978_v14  ;;  %v4236_v48 = vstv %s4226_s27  ;;  %s4248_s13 = sld [smem:[#allocation82_spill]]  ;;  %s4250_s27 = sld [smem:[#allocation88_spill]] }
 0x174   :  { %v969_v12 = vmul.f32 %v2656_v47, %v4234_v59  ;;  %v983_v52 = vmul.f32 %v2644_v25, %v4236_v48  ;;  %v954_v19 = vadd.f32 %v953_v3, %v952_v6  ;;  %v968_v18 = vadd.f32 %v967_v9, %v966_v36 }
 0x175   :  { %v4238_v53 = vstv %s4229_s14  ;;  %v982_v5 = vadd.f32 %v981_v50, %v980_v56  ;;  %v4241_v10 = vstv %s4230_s15  ;;  %v4243_v23 = vstv %s4231_s2  ;;  %s4251_s14 = sld [smem:[#allocation94_spill]]  ;;  %s4254_s15 = sld [smem:[#allocation98_spill]] }
 0x176   :  { %v971_v26 = vmul.f32 %v2948_v24, %v4238_v53  ;;  %v985_v4 = vmul.f32 %v2651_v32, %v4241_v10  ;;  %v955_v28 = vadd.f32 %v954_v19, %v4243_v23  ;;  %v970_v20 = vadd.f32 %v969_v12, %v968_v18  ;;  %s4256_s2 = sld [smem:[#allocation79_spill]] }
 0x177   :  { %v984_v39 = vadd.f32 %v983_v52, %v982_v5  ;;  %v4245_v42 = vstv %s4233_s9  ;;  %v4249_v1 = vstv %s4235_s26  ;;  %v4252_v44 = vstv %s4237_s10  ;;  %s4258_s9 = sld [smem:[#allocation99_spill]]  ;;  %s4267_s10 = sld [smem:[#allocation89_spill]] }
 0x178   :  { %v987_v25 = vmul.f32 %v2656_v47, %v4245_v42  ;;  %v972_v38 = vadd.f32 %v971_v26, %v970_v20  ;;  %1524 = vtanh.f32 %v955_v28  ;;  %v989_v49 = vmul.f32 %v2948_v24, %v4249_v1  ;;  %s4265_s26 = sld [smem:[#allocation83_spill]] }
 0x179   :  { %v986_v7 = vadd.f32 %v985_v4, %v984_v39  ;;  %v4253_v31 = vstv %s4239_s22  ;;  %v4255_v63 = vstv %s4240_s3  ;;  %v4257_v41 = vstv %s4242_s6  ;;  %s4268_s22 = sld [smem:[#allocation95_spill]]  ;;  %s4269_s3 = sld [smem:[#allocation101_spill]] }
 0x17a   :  { %v973_v54 = vadd.f32 %v972_v38, %v4252_v44  ;;  %v4260_v43 = vstv %s4244_s11  ;;  %v4261_v9 = vstv %s4246_s21  ;;  %v4262_v51 = vstv %s4247_s0  ;;  %s4274_s6 = sld [smem:[#allocation84_spill]]  ;;  %s4275_s11 = sld [smem:[#allocation90_spill]] }
 0x17b   :  { %v1519_v32 = vpop.eup %1518  ;;  %v988_v11 = vadd.f32 %v987_v25, %v986_v7  ;;  %v4263_v60 = vstv %s4248_s13  ;;  %v4264_v61 = vstv %s4250_s27  ;;  %v4266_v30 = vstv %s4251_s14  ;;  %s4276_s21 = sld [smem:[#allocation96_spill]]  ;;  %s4277_s0 = sld [smem:[#allocation102_spill]] }
 0x17c   :  { %v1521_v22 = vpop.eup %1520  ;;  %v998_v40 = vmul.f32 %v1519_v32, %v4253_v31  ;;  %v1010_v47 = vmul.f32 %v1519_v32, %v4255_v63  ;;  %v1022_v15 = vmul.f32 %v1519_v32, %v4257_v41  ;;  %1526 = vtanh.f32 %v973_v54  ;;  %s4283_s13 = sld [smem:[#allocation91_spill]]  ;;  %s4284_s27 = sld [smem:[#allocation97_spill]] }
 0x17d   :  { %v1523_v3 = vpop.eup %1522  ;;  %v999_v24 = vmul.f32 %v1521_v22, %v4260_v43  ;;  %v1011_v27 = vmul.f32 %v1521_v22, %v4261_v9  ;;  %v1023_v34 = vmul.f32 %v1521_v22, %v4262_v51  ;;  %v990_v57 = vadd.f32 %v989_v49, %v988_v11  ;;  %s4285_s14 = sld [smem:[#allocation103_spill]] }
 0x17e   :  { %v1001_v17 = vmul.f32 %v1523_v3, %v4263_v60  ;;  %v1013_v14 = vmul.f32 %v1523_v3, %v4264_v61  ;;  %v1025_v50 = vmul.f32 %v1523_v3, %v4266_v30  ;;  %v4270_v12 = vstv %s4254_s15  ;;  %s4289_s15 = sld [smem:[#allocation104_spill]] }
 0x17f   :  { %v1000_v6 = vadd.f32 %v999_v24, %v998_v40  ;;  %v1012_v36 = vadd.f32 %v1011_v27, %v1010_v47  ;;  %v1024_v59 = vadd.f32 %v1023_v34, %v1022_v15  ;;  %v1034_v56 = vmul.f32 %v1519_v32, %v4270_v12 }
 0x180   :  { %v4271_v48 = vstv %s4256_s2  ;;  %v4272_v19 = vstv %s4258_s9  ;;  %v4273_v53 = vstv %s4259_s16  ;;  %v4278_v20 = vstv %s4265_s26  ;;  %s4282_s16 = sld [smem:[#allocation85_spill]]  ;;  %s4291_s2 = sld [smem:[#allocation105_spill]] }
 0x181   :  { %v991_v52 = vadd.f32 %v990_v57, %v4271_v48  ;;  %v1035_v18 = vmul.f32 %v1521_v22, %v4272_v19  ;;  %v1037_v26 = vmul.f32 %v1523_v3, %v4273_v53  ;;  %v1002_v4 = vadd.f32 %v1001_v17, %v1000_v6  ;;  %s4292_s9 = sld [smem:[#allocation106_spill]]  ;;  %s4293_s26 = sld [smem:[#allocation107_spill]] }
 0x182   :  { %v1525_v10 = vpop.eup %1524  ;;  %v1014_v23 = vadd.f32 %v1013_v14, %v1012_v36  ;;  %v1026_v28 = vadd.f32 %v1025_v50, %v1024_v59  ;;  %v4279_v42 = vstv %s4267_s10  ;;  %v4280_v38 = vstv %s4268_s22  ;;  %s4298_s10 = sld [smem:[#allocation108_spill]]  ;;  %s4299_s22 = sld [smem:[#allocation112_spill]] }
 0x183   :  { %1528 = vtanh.f32 %v991_v52  ;;  %v1036_v5 = vadd.f32 %v1035_v18, %v1034_v56  ;;  %v1003_v39 = vmul.f32 %v1525_v10, %v4278_v20  ;;  %v1015_v25 = vmul.f32 %v1525_v10, %v4279_v42 }
 0x184   :  { %v1027_v7 = vmul.f32 %v1525_v10, %v4280_v38  ;;  %v4281_v49 = vstv %s4269_s3  ;;  %v4286_v40 = vstv %s4274_s6  ;;  %v4287_v47 = vstv %s4275_s11  ;;  %s4300_s3 = sld [smem:[#allocation116_spill]]  ;;  %s4301_s6 = sld [smem:[#allocation120_spill]] }
 0x185   :  { %v1038_v1 = vadd.f32 %v1037_v26, %v1036_v5  ;;  %v1039_v32 = vmul.f32 %v1525_v10, %v4281_v49  ;;  %v1004_v54 = vadd.f32 %v1003_v39, %v1002_v4  ;;  %v1016_v22 = vadd.f32 %v1015_v25, %v1014_v23  ;;  %s4303_s11 = sld [smem:[#allocation109_spill]] }
 0x186   :  { %v1527_v44 = vpop.eup %1526  ;;  %v1028_v11 = vadd.f32 %v1027_v7, %v1026_v28  ;;  %v4288_v15 = vstv %s4276_s21  ;;  %v4290_v43 = vstv %s4277_s0  ;;  %v4294_v60 = vstv %s4282_s16  ;;  %s4305_s21 = sld [smem:[#allocation113_spill]]  ;;  %s4307_s0 = sld [smem:[#allocation117_spill]] }
 0x187   :  { %v1040_v31 = vadd.f32 %v1039_v32, %v1038_v1  ;;  %v1005_v63 = vmul.f32 %v1527_v44, %v4286_v40  ;;  %v1017_v41 = vmul.f32 %v1527_v44, %v4287_v47  ;;  %v1029_v3 = vmul.f32 %v1527_v44, %v4288_v15  ;;  %s4309_s16 = sld [smem:[#allocation121_spill]] }
 0x188   :  { %v1041_v24 = vmul.f32 %v1527_v44, %v4290_v43  ;;  %v4295_v61 = vstv %s4283_s13  ;;  %v4296_v30 = vstv %s4284_s27  ;;  %v4297_v6 = vstv %s4285_s14  ;;  %s4310_s13 = sld [smem:[#allocation110_spill]]  ;;  %s4311_s27 = sld [smem:[#allocation114_spill]] }
 0x189   :  { %v1006_v9 = vadd.f32 %v1005_v63, %v1004_v54  ;;  %v1018_v27 = vadd.f32 %v1017_v41, %v1016_v22  ;;  %v1030_v51 = vadd.f32 %v1029_v3, %v1028_v11  ;;  %v4302_v52 = vstv %s4289_s15  ;;  %s4312_s14 = sld [smem:[#allocation118_spill]]  ;;  %s4315_s15 = sld [smem:[#allocation111_spill]] }
 0x18a   :  { %v1042_v34 = vadd.f32 %v1041_v24, %v1040_v31  ;;  %v4304_v18 = vstv %s4291_s2  ;;  %v4306_v26 = vstv %s4292_s9  ;;  %v4308_v10 = vstv %s4293_s26  ;;  %s4318_s2 = sld [smem:[#allocation115_spill]]  ;;  %s4320_s9 = sld [smem:[#allocation119_spill]] }
 0x18b   :  { %v4314_v20 = vstv %s4298_s10  ;;  %v4316_v42 = vstv %s4299_s22  ;;  %v4317_v38 = vstv %s4300_s3  ;;  %v4319_v1 = vstv %s4301_s6  ;;  %s4323_s26 = sld [smem:[#allocation123_spill]]  ;;  %s4326_s10 = sld [smem:[#allocation124_spill]] }
 0x18c   :  { %v4321_v44 = vstv %s4303_s11  ;;  %v4322_v22 = vstv %s4305_s21  ;;  %v4324_v31 = vstv %s4307_s0  ;;  %s4328_s22 = sld [smem:[#allocation125_spill]]  ;;  %s4332_s3 = sld [smem:[#allocation126_spill]] }
 0x18d   :  { %v1529_v57 = vpop.eup %1528  ;;  %v4325_v63 = vstv %s4309_s16  ;;  %s4333_s6 = sld [smem:[#allocation127_spill]]  ;;  %s4336_s11 = sld [smem:[#allocation128_spill]] }
 0x18e   :  { %v1007_v17 = vmul.f32 %v1529_v57, %v4294_v60  ;;  %v1019_v14 = vmul.f32 %v1529_v57, %v4295_v61  ;;  %v1031_v50 = vmul.f32 %v1529_v57, %v4296_v30  ;;  %v1043_v36 = vmul.f32 %v1529_v57, %v4297_v6  ;;  %s4339_s21 = sld [smem:[#allocation129_spill]]  ;;  %s4340_s0 = sld [smem:[#allocation130_spill]] }
 0x18f   :  { %v4327_v15 = vstv %s4310_s13  ;;  %v4329_v43 = vstv %s4311_s27  ;;  %v4334_v60 = vstv %s4315_s15  ;;  %s4343_s16 = sld [smem:[#allocation133_spill]]  ;;  %s4345_s13 = sld [smem:[#allocation134_spill]] }
 0x190   :  { %v1008_v59 = vadd.f32 %v1007_v17, %v1006_v9  ;;  %v1020_v12 = vadd.f32 %v1019_v14, %v1018_v27  ;;  %v1032_v56 = vadd.f32 %v1031_v50, %v1030_v51  ;;  %v1044_v48 = vadd.f32 %v1043_v36, %v1042_v34  ;;  %s4346_s27 = sld [smem:[#allocation135_spill]]  ;;  %s4351_s15 = sld [smem:[#allocation136_spill]] }
 0x191   :  { %v4330_v9 = vstv %s4312_s14  ;;  %v4331_v51 = vstv %s4313_s5  ;;  %v4335_v14 = vstv %s4318_s2  ;;  %v4337_v6 = vstv %s4320_s9  ;;  %s4341_s5 = sld [smem:[#allocation132_spill]]  ;;  %s4349_s14 = sld [smem:[#allocation131_spill]] }
 0x192   :  { %v1009_v19 = vadd.f32 %v1008_v59, %v4302_v52  ;;  %v1021_v53 = vadd.f32 %v1020_v12, %v4304_v18  ;;  %v1033_v5 = vadd.f32 %v1032_v56, %v4306_v26  ;;  %v1045_v4 = vadd.f32 %v1044_v48, %v4308_v10  ;;  %s4356_s2 = sld [smem:[#allocation137_spill]] }
 0x193   :  { %v4338_v12 = vstv %s4323_s26  ;;  %s4361_s9 = sld [smem:[#allocation153_spill]]  ;;  %s4362_s26 = sld [smem:[#allocation159_spill]] }
 0x194   :  { %1530 = vtanh.f32 %v1009_v19  ;;  %v4342_v19 = vstv %s4326_s10  ;;  %s4363_s10 = sld [smem:[#allocation140_spill]] }
 0x195   :  { %1532 = vtanh.f32 %v1021_v53  ;;  %v4344_v53 = vstv %s4328_s22  ;;  %s4365_s22 = sld [smem:[#allocation147_spill]] }
 0x196   :  { %1534 = vtanh.f32 %v1033_v5 }
 0x197   :  { %1536 = vtanh.f32 %v1045_v4  ;;  %v4347_v4 = vstv %s4332_s3  ;;  %s4366_s3 = sld [smem:[#allocation154_spill]] }
 0x19e   :  { %v1531_v23 = vpop.eup %1530 }
 0x19f   :  { %v1533_v28 = vpop.eup %1532  ;;  %v1050_v39 = vmul.f32 %v1531_v23, %v4314_v20  ;;  %v1058_v25 = vmul.f32 %v1531_v23, %v4316_v42  ;;  %v1066_v7 = vmul.f32 %v1531_v23, %v4317_v38  ;;  %v1074_v49 = vmul.f32 %v1531_v23, %v4319_v1 }
 0x1a0   :  { %v1535_v32 = vpop.eup %1534  ;;  %v1051_v54 = vmul.f32 %v1533_v28, %v4321_v44  ;;  %v1059_v11 = vmul.f32 %v1533_v28, %v4322_v22  ;;  %v1067_v40 = vmul.f32 %v1533_v28, %v4324_v31  ;;  %v1075_v47 = vmul.f32 %v1533_v28, %v4325_v63 }
 0x1a1   :  { %v1537_v41 = vpop.eup %1536  ;;  %v1053_v3 = vmul.f32 %v1535_v32, %v4327_v15  ;;  %v1061_v24 = vmul.f32 %v1535_v32, %v4329_v43  ;;  %v1069_v27 = vmul.f32 %v1535_v32, %v4330_v9  ;;  %v1077_v34 = vmul.f32 %v1535_v32, %v4331_v51 }
 0x1a2   :  { %v1052_v57 = vadd.f32 %v1051_v54, %v1050_v39  ;;  %v1055_v17 = vmul.f32 %v1537_v41, %v4334_v60  ;;  %v1060_v61 = vadd.f32 %v1059_v11, %v1058_v25  ;;  %v1063_v30 = vmul.f32 %v1537_v41, %v4335_v14 }
 0x1a3   :  { %v1068_v50 = vadd.f32 %v1067_v40, %v1066_v7  ;;  %v1071_v36 = vmul.f32 %v1537_v41, %v4337_v6  ;;  %v1076_v59 = vadd.f32 %v1075_v47, %v1074_v49  ;;  %v1079_v56 = vmul.f32 %v1537_v41, %v4338_v12 }
 0x1a4   :  { %v1054_v48 = vadd.f32 %v1053_v3, %v1052_v57  ;;  %v1062_v52 = vadd.f32 %v1061_v24, %v1060_v61  ;;  %v1082_v18 = vmul.f32 %v1531_v23, %v4342_v19  ;;  %v1083_v26 = vmul.f32 %v1533_v28, %v4344_v53 }
 0x1a5   :  { %v1070_v5 = vadd.f32 %v1069_v27, %v1068_v50  ;;  %v1078_v10 = vadd.f32 %v1077_v34, %v1076_v59  ;;  %v1085_v20 = vmul.f32 %v1535_v32, %v4347_v4  ;;  %v4348_v39 = vstv %s4333_s6  ;;  %s4368_s6 = sld [smem:[#allocation141_spill]] }
 0x1a6   :  { %v1087_v42 = vmul.f32 %v1537_v41, %v4348_v39  ;;  %v1056_v25 = vadd.f32 %v1055_v17, %v1054_v48  ;;  %v1064_v38 = vadd.f32 %v1063_v30, %v1062_v52  ;;  %v1084_v7 = vadd.f32 %v1083_v26, %v1082_v18 }
 0x1a7   :  { %v4350_v1 = vstv %s4336_s11  ;;  %v1072_v44 = vadd.f32 %v1071_v36, %v1070_v5  ;;  %v1080_v54 = vadd.f32 %v1079_v56, %v1078_v10  ;;  %v4352_v22 = vstv %s4339_s21  ;;  %s4371_s11 = sld [smem:[#allocation148_spill]]  ;;  %s4373_s21 = sld [smem:[#allocation142_spill]] }
 0x1a8   :  { %v1090_v49 = vmul.f32 %v1531_v23, %v4350_v1  ;;  %v1091_v11 = vmul.f32 %v1533_v28, %v4352_v22  ;;  %v4353_v31 = vstv %s4340_s0  ;;  %v4354_v63 = vstv %s4341_s5  ;;  %s4375_s0 = sld [smem:[#allocation155_spill]]  ;;  %s4391_s5 = sld [smem:[#allocation150_spill]] }
 0x1a9   :  { %v1093_v40 = vmul.f32 %v1535_v32, %v4353_v31  ;;  %v1057_v47 = vadd.f32 %v1056_v25, %v4354_v63  ;;  %v4355_v15 = vstv %s4343_s16  ;;  %v1086_v43 = vadd.f32 %v1085_v20, %v1084_v7  ;;  %s4394_s16 = sld [smem:[#allocation157_spill]] }
 0x1aa   :  { %v1065_v3 = vadd.f32 %v1064_v38, %v4355_v15  ;;  %v4357_v24 = vstv %s4345_s13  ;;  %v4358_v27 = vstv %s4346_s27  ;;  %v1092_v34 = vadd.f32 %v1091_v11, %v1090_v49  ;;  %s4395_s13 = sld [smem:[#allocation162_spill]]  ;;  %s4397_s27 = sld [smem:[#allocation166_spill]] }
 0x1ab   :  { %v1073_v9 = vadd.f32 %v1072_v44, %v4357_v24  ;;  %v1081_v51 = vadd.f32 %v1080_v54, %v4358_v27  ;;  %v4359_v23 = vstv %s4349_s14  ;;  %v1088_v60 = vadd.f32 %v1087_v42, %v1086_v43  ;;  %s4398_s14 = sld [smem:[#allocation167_spill]] }
 0x1ac   :  { %v1095_v57 = vmul.f32 %v1537_v41, %v4359_v23  ;;  %1538 = vtanh.f32 %v1057_v47  ;;  %v1094_v28 = vadd.f32 %v1093_v40, %v1092_v34  ;;  %v4360_v32 = vstv %s4351_s15  ;;  %s4402_s15 = sld [smem:[#allocation163_spill]] }
 0x1ad   :  { %1540 = vtanh.f32 %v1065_v3  ;;  %v1089_v17 = vadd.f32 %v1088_v60, %v4360_v32  ;;  %v4364_v14 = vstv %s4356_s2  ;;  %v4367_v6 = vstv %s4062_s12  ;;  %s4377_s12 = sld [smem:[#allocation160_spill]] }
 0x1ae   :  { %1542 = vtanh.f32 %v1073_v9  ;;  %v1096_v61 = vadd.f32 %v1095_v57, %v1094_v28  ;;  %v4369_v59 = vstv %s4063_s25  ;;  %v4370_v56 = vstv %s3990_s7  ;;  %s4384_s7 = sld [smem:[#allocation156_spill]]  ;;  %s4385_s25 = sld [smem:[#allocation161_spill]] }
 0x1af   :  { %1544 = vtanh.f32 %v1081_v51  ;;  %v4372_v52 = vstv %s2391_s23  ;;  %v4374_v53 = vstv %s4064_s19  ;;  %v4376_v5 = vstv %s4065_s30  ;;  %s4380_s23 = sld [smem:[#allocation149_spill]]  ;;  %s4389_s30 = sld [smem:[#allocation143_spill]] }
 0x1b0   :  { %1546 = vtanh.f32 %v1089_v17  ;;  %v1097_v41 = vadd.f32 %v1096_v61, %v4364_v14  ;;  %v4378_v4 = vstv %s4361_s9  ;;  %v4379_v39 = vstv %s4362_s26  ;;  %s4387_s19 = sld [smem:[#allocation165_spill]]  ;;  %s4403_s2 = sld [smem:[#allocation168_spill]] }
 0x1b1   :  { %v4381_v38 = vstv %s4363_s10  ;;  %v4382_v1 = vstv %s4365_s22  ;;  %v4383_v44 = vstv %s4366_s3  ;;  %v4386_v31 = vstv %s4368_s6  ;;  %s4406_s9 = sld [smem:[#allocation169_spill]]  ;;  %s4409_s26 = sld [smem:[#allocation172_spill]] }
 0x1b2   :  { %1548 = vtanh.f32 %v1097_v41  ;;  %v4388_v47 = vstv %s4371_s11  ;;  %v4390_v3 = vstv %s4373_s21  ;;  %v4392_v9 = vstv %s4375_s0  ;;  %s4410_s10 = sld [smem:[#allocation173_spill]]  ;;  %s4411_s22 = sld [smem:[#allocation144_spill]] }
 0x1b3   :  { %v4393_v51 = vstv %s4377_s12  ;;  %s4413_s3 = sld [smem:[#allocation151_spill]]  ;;  %s4415_s6 = sld [smem:[#allocation152_spill]] }
 0x1b4   :  { %v4399_v14 = vstv %s4384_s7  ;;  %s4416_s11 = sld [smem:[#allocation158_spill]] }
 0x1b5   :  { %v4396_v60 = vstv %s4380_s23  ;;  %s4419_s21 = sld [smem:[#allocation174_spill]] }
 0x1b6   :  { %v3209_v30 = vpop.eup %1538 }
 0x1b7   :  { %v3211_v50 = vpop.eup %1540  ;;  %v1104_v36 = vmul.f32 %v3209_v30, %v4367_v6  ;;  %v1116_v12 = vmul.f32 %v3209_v30, %v4369_v59  ;;  %v1128_v48 = vmul.f32 %v3209_v30, %v4370_v56  ;;  %v1140_v19 = vmul.f32 %v3209_v30, %v4372_v52 }
 0x1b8   :  { %v3225_v18 = vpop.eup %1542  ;;  %v1105_v26 = vmul.f32 %v3211_v50, %v4374_v53  ;;  %v1117_v10 = vmul.f32 %v3211_v50, %v4376_v5  ;;  %v1129_v20 = vmul.f32 %v3211_v50, %v4378_v4  ;;  %v1141_v42 = vmul.f32 %v3211_v50, %v4379_v39 }
 0x1b9   :  { %v3239_v25 = vpop.eup %1544  ;;  %v1107_v7 = vmul.f32 %v3225_v18, %v4381_v38  ;;  %v1119_v49 = vmul.f32 %v3225_v18, %v4382_v1  ;;  %v1131_v54 = vmul.f32 %v3225_v18, %v4383_v44  ;;  %v1143_v34 = vmul.f32 %v3225_v18, %v4393_v51 }
 0x1ba   :  { %v3250_v22 = vpop.eup %1546  ;;  %v1106_v11 = vadd.f32 %v1105_v26, %v1104_v36  ;;  %v1109_v40 = vmul.f32 %v3239_v25, %v4386_v31  ;;  %v1118_v63 = vadd.f32 %v1117_v10, %v1116_v12  ;;  %v1121_v15 = vmul.f32 %v3239_v25, %v4388_v47 }
 0x1bb   :  { %v1111_v43 = vmul.f32 %v3250_v22, %v4390_v3  ;;  %v1130_v24 = vadd.f32 %v1129_v20, %v1128_v48  ;;  %v1133_v27 = vmul.f32 %v3239_v25, %v4392_v9  ;;  %v1123_v28 = vmul.f32 %v3250_v22, %v4396_v60 }
 0x1bc   :  { %v1108_v23 = vadd.f32 %v1107_v7, %v1106_v11  ;;  %v1120_v57 = vadd.f32 %v1119_v49, %v1118_v63  ;;  %v1142_v32 = vadd.f32 %v1141_v42, %v1140_v19  ;;  %v3270_v17 = vpop.eup %1548  ;;  %v1135_v41 = vmul.f32 %v3250_v22, %v4399_v14 }
 0x1bd   :  { %v1132_v61 = vadd.f32 %v1131_v54, %v1130_v24  ;;  %v4400_v6 = vstv %s4385_s25  ;;  %v4401_v59 = vstv %s4387_s19  ;;  %v4404_v48 = vstv %s4389_s30 }
 0x1be   :  { %v1145_v36 = vmul.f32 %v3239_v25, %v4400_v6  ;;  %v1152_v12 = vmul.f32 %v3209_v30, %v4401_v59  ;;  %v1110_v56 = vadd.f32 %v1109_v40, %v1108_v23  ;;  %v1113_v52 = vmul.f32 %v3270_v17, %v4404_v48 }
 0x1bf   :  { %v1122_v19 = vadd.f32 %v1121_v15, %v1120_v57  ;;  %v4405_v53 = vstv %s4391_s5  ;;  %v1134_v5 = vadd.f32 %v1133_v27, %v1132_v61  ;;  %v4407_v10 = vstv %s4394_s16 }
 0x1c0   :  { %v1125_v26 = vmul.f32 %v3270_v17, %v4405_v53  ;;  %v1137_v4 = vmul.f32 %v3270_v17, %v4407_v10  ;;  %v1144_v20 = vadd.f32 %v1143_v34, %v1142_v32  ;;  %v4408_v39 = vstv %s4395_s13 }
 0x1c1   :  { %v1147_v42 = vmul.f32 %v3250_v22, %v4408_v39  ;;  %v1112_v38 = vadd.f32 %v1111_v43, %v1110_v56  ;;  %v1124_v7 = vadd.f32 %v1123_v28, %v1122_v19  ;;  %v4412_v1 = vstv %s4397_s27 }
 0x1c2   :  { %v1153_v49 = vmul.f32 %v3211_v50, %v4412_v1  ;;  %v4414_v44 = vstv %s4398_s14  ;;  %v1136_v11 = vadd.f32 %v1135_v41, %v1134_v5  ;;  %v1146_v31 = vadd.f32 %v1145_v36, %v1144_v20 }
 0x1c3   :  { %v1155_v54 = vmul.f32 %v3225_v18, %v4414_v44  ;;  %v4417_v40 = vstv %s4402_s15  ;;  %v4418_v47 = vstv %s4403_s2  ;;  %v1114_v3 = vadd.f32 %v1113_v52, %v1112_v38 }
 0x1c4   :  { %v1149_v63 = vmul.f32 %v3270_v17, %v4417_v40  ;;  %v1157_v15 = vmul.f32 %v3239_v25, %v4418_v47  ;;  %v1126_v43 = vadd.f32 %v1125_v26, %v1124_v7  ;;  %v1154_v24 = vadd.f32 %v1153_v49, %v1152_v12 }
 0x1c5   :  { %v4420_v9 = vstv %s4406_s9  ;;  %v1138_v51 = vadd.f32 %v1137_v4, %v1136_v11  ;;  %v1148_v34 = vadd.f32 %v1147_v42, %v1146_v31  ;;  %v4421_v23 = vstv %s4409_s26  ;;  %s4444_s9 = sld [smem:[#allocation177_spill]]  ;;  %s4448_s26 = sld [smem:[#allocation195_spill]] }
 0x1c6   :  { %v1159_v27 = vmul.f32 %v3250_v22, %v4420_v9  ;;  %v1164_v57 = vmul.f32 %v3209_v30, %v4421_v23  ;;  %v4422_v60 = vstv %s4410_s10  ;;  %v4423_v32 = vstv %s4411_s22  ;;  %s4449_s10 = sld [smem:[#allocation183_spill]] }
 0x1c7   :  { %v1165_v28 = vmul.f32 %v3211_v50, %v4422_v60  ;;  %v1115_v61 = vadd.f32 %v1114_v3, %v4423_v32  ;;  %v4424_v14 = vstv %s4413_s3  ;;  %v1156_v6 = vadd.f32 %v1155_v54, %v1154_v24 }
 0x1c8   :  { %v1127_v41 = vadd.f32 %v1126_v43, %v4424_v14  ;;  %v4426_v36 = vstv %s4415_s6  ;;  %v4427_v12 = vstv %s4416_s11  ;;  %v1150_v48 = vadd.f32 %v1149_v63, %v1148_v34  ;;  %s4452_s6 = sld [smem:[#allocation189_spill]] }
 0x1c9   :  { %v1167_v59 = vmul.f32 %v3225_v18, %v4426_v36  ;;  %v1139_v56 = vadd.f32 %v1138_v51, %v4427_v12  ;;  %v1166_v52 = vadd.f32 %v1165_v28, %v1164_v57  ;;  %v4429_v19 = vstv %s4419_s21  ;;  %1469 = vst [vmem:[%s4126_s20 + $0x8] sm:$0xff] %v1115_v61 }
 0x1ca   :  { %v1169_v53 = vmul.f32 %v3239_v25, %v4429_v19  ;;  %1470 = vst [vmem:[%s4126_s20 + $0x18] sm:$0xff] %v1127_v41  ;;  %v1158_v26 = vadd.f32 %v1157_v15, %v1156_v6  ;;  %v4430_v5 = vstv %s4112_s28  ;;  %v4431_v4 = vstv %s4113_s1 }
 0x1cb   :  { %v1161_v10 = vmul.f32 %v3270_v17, %v4430_v5  ;;  %v1171_v20 = vmul.f32 %v3250_v22, %v4431_v4  ;;  %v1176_v39 = vmul.f32 %v3209_v30, %v784_v0  ;;  %1471 = vst [vmem:[%s4126_s20 + $0x28] sm:$0xff] %v1139_v56  ;;  %v4434_v42 = vstv %s4118_s8 }
 0x1cc   :  { %v1151_v38 = vadd.f32 %v1150_v48, %v4434_v42  ;;  %v1168_v7 = vadd.f32 %v1167_v59, %v1166_v52  ;;  %v1177_v1 = vmul.f32 %v3211_v50, %v786_v21  ;;  %v1179_v49 = vmul.f32 %v3225_v18, %v789_v45 }
 0x1cd   :  { %v1160_v44 = vadd.f32 %v1159_v27, %v1158_v26  ;;  %v4437_v54 = vstv %s4123_s24  ;;  %v1181_v11 = vmul.f32 %v3239_v25, %v792_v16  ;;  %v1188_v45 = vmul.f32 %v3209_v30, %v803_v35  ;;  %s4443_s24 = sld [smem:[#allocation193_spill]] }
 0x1ce   :  { %v1173_v0 = vmul.f32 %v3270_v17, %v4437_v54  ;;  %1472 = vst [vmem:[%s4126_s20 + $0x38] sm:$0xff] %v1151_v38  ;;  %v1170_v21 = vadd.f32 %v1169_v53, %v1168_v7  ;;  %v1178_v31 = vadd.f32 %v1177_v1, %v1176_v39  ;;  %v1189_v40 = vmul.f32 %v3211_v50, %v805_v29 }
 0x1cf   :  { %v1162_v63 = vadd.f32 %v1161_v10, %v1160_v44  ;;  %v1183_v47 = vmul.f32 %v3250_v22, %v795_v8  ;;  %v1185_v16 = vmul.f32 %v3270_v17, %v798_v58  ;;  %v1191_v15 = vmul.f32 %v3225_v18, %v808_v33 }
 0x1d0   :  { %v1172_v3 = vadd.f32 %v1171_v20, %v1170_v21  ;;  %v1180_v43 = vadd.f32 %v1179_v49, %v1178_v31  ;;  %v1190_v24 = vadd.f32 %v1189_v40, %v1188_v45  ;;  %v1193_v35 = vmul.f32 %v3239_v25, %v811_v13 }
 0x1d1   :  { %v4446_v29 = vstv %s4438_s29  ;;  %v1200_v8 = vmul.f32 %v3209_v30, %v822_v46  ;;  %v1201_v58 = vmul.f32 %v3211_v50, %v824_v62  ;;  %v1203_v33 = vmul.f32 %v3225_v18, %v827_v55 }
 0x1d2   :  { %v1163_v9 = vadd.f32 %v1162_v63, %v4446_v29  ;;  %v1174_v27 = vadd.f32 %v1173_v0, %v1172_v3  ;;  %v1182_v51 = vadd.f32 %v1181_v11, %v1180_v43  ;;  %v1192_v34 = vadd.f32 %v1191_v15, %v1190_v24 }
 0x1d3   :  { %v1195_v13 = vmul.f32 %v3250_v22, %v814_v37  ;;  %v1202_v23 = vadd.f32 %v1201_v58, %v1200_v8  ;;  %v4450_v46 = vstv %s4443_s24  ;;  %v4451_v62 = vstv %s4444_s9 }
 0x1d4   :  { %1473 = vst [vmem:[%s4126_s20 + $0x48] sm:$0xff] %v1163_v9  ;;  %v1205_v30 = vmul.f32 %v3239_v25, %v4450_v46  ;;  %v1175_v50 = vadd.f32 %v1174_v27, %v4451_v62  ;;  %v1184_v55 = vadd.f32 %v1183_v47, %v1182_v51  ;;  %v1194_v18 = vadd.f32 %v1193_v35, %v1192_v34 }
 0x1d5   :  { %v4453_v57 = vstv %s4445_s4  ;;  %v1204_v28 = vadd.f32 %v1203_v33, %v1202_v23  ;;  %v4455_v32 = vstv %s4447_s17  ;;  %v4456_v41 = vstv %s4448_s26 }
 0x1d6   :  { %v1197_v60 = vmul.f32 %v3270_v17, %v4453_v57  ;;  %v1207_v37 = vmul.f32 %v3250_v22, %v4455_v32  ;;  %1474 = vst [vmem:[%s4126_s20 + $0x58] sm:$0xff] %v1175_v50  ;;  %v1186_v61 = vadd.f32 %v1185_v16, %v1184_v55  ;;  %v1196_v14 = vadd.f32 %v1195_v13, %v1194_v18 }
 0x1d7   :  { %v1206_v25 = vadd.f32 %v1205_v30, %v1204_v28  ;;  %v1209_v6 = vmul.f32 %v3270_v17, %v4456_v41  ;;  %v4457_v36 = vstv %s4449_s10  ;;  %v4458_v48 = vstv %s4452_s6 }
 0x1d8   :  { %v1187_v59 = vadd.f32 %v1186_v61, %v4457_v36  ;;  %v1198_v12 = vadd.f32 %v1197_v60, %v1196_v14 }
 0x1d9   :  { %v1208_v56 = vadd.f32 %v1207_v37, %v1206_v25 }
 0x1da   :  { %1475 = vst [vmem:[%s4126_s20 + $0x68] sm:$0xff] %v1187_v59  ;;  %v1199_v22 = vadd.f32 %v1198_v12, %v4458_v48 }
 0x1db   :  { %v1210_v52 = vadd.f32 %v1209_v6, %v1208_v56 }
 0x1dc   :  { %1476 = vst [vmem:[%s4126_s20 + $0x78] sm:$0xff] %v1199_v22 }
 0x1dd   :  { %v1211_v19 = vadd.f32 %v1210_v52, %v839_v2 }
 0x1df   :  { %1477 = vst [vmem:[%s4126_s20 + $0x88] sm:$0xff] %v1211_v19 }
 0x1e0   :  { %1234 = vsyncpa [#allocation3], 1 }
 0x1e1   :  { %1235 = vsyncpa [#allocation5], 1 }
 0x1e2   :  { %1236 = vsyncpa [#allocation8], 1 }
 0x1e3   :  { %1237 = vsyncpa [#allocation11], 1 }
 0x1e4   :  { %1238 = vsyncpa [#allocation14], 1 }

</bundles_post_ra>
